<compile_context>
chip_gen: v7x
topology: tpu7x:2x2x1
jax: 0.10.0
libtpu: 0.0.40
codegen_flags: <defaults>
</compile_context>

<pallas_src>
import functools

import jax
import jax.numpy as jnp
from jax.experimental import pallas as pl
from jax.experimental.pallas import tpu as pltpu


# ----------------------------- hardware-aware config ---------------------------

def _device_kind():
    try:
        return jax.devices()[0].device_kind.lower()
    except Exception:
        return ""


def _vmem_budget_bytes():
    kind = _device_kind()
    if "v7" in kind:
        return 44 << 20     # 64 MiB / TensorCore physical -> leave headroom
    return 96 << 20         # v2..v6: 128 MiB physical


def _tm_preference():
    kind = _device_kind()
    if any(g in kind for g in ("v2", "v3", "v4", "v5")):
        return (128, 256, 64, 32, 16, 8)     # 4x128x128-MXU generations
    return (256, 128, 64, 32, 16, 8)         # v6e / v7x: 2x256x256 MXU


_TT_PREFERENCE = (1024, 512, 256, 128)
_SMALL_PROBLEM_BYTES = 8 << 20               # below this, use a single block


def _tile_candidates(dim, preferred, align):
    """Tile sizes that evenly divide `dim`, in preference order.

    Preferred divisors first; if none divides, the largest `align`-aligned
    divisor; the full extent is appended as a last resort (always valid)."""
    cands = [t for t in preferred if 0 < t <= dim and dim % t == 0]
    if not cands:
        d = (dim // align) * align
        while d >= align:
            if dim % d == 0:
                cands.append(d)
                break
            d -= align
    if dim not in cands:
        cands.append(dim)
    return cands


def _select_tiles(dim0, dim1, pref0, align0, pref1, align1, needed_fn, budget,
                  fixed0=None, fixed1=None):
    """Pick (t0, t1) in preference order whose per-step VMEM fits `budget`."""
    if fixed0 is None and fixed1 is None and needed_fn(dim0, dim1) <= _SMALL_PROBLEM_BYTES:
        return dim0, dim1                       # tiny problem: single block
    cands0 = [fixed0] if fixed0 is not None else _tile_candidates(dim0, pref0, align0)
    cands1 = [fixed1] if fixed1 is not None else _tile_candidates(dim1, pref1, align1)
    for t0 in cands0:                           # t0 (row tile) first: it divides
        for t1 in cands1:                       # the dominant x HBM re-read term
            if needed_fn(t0, t1) <= budget:
                return t0, t1
    return min(cands0), min(cands1)             # nothing fits: smallest tiles


def _vmem_limit(needed, budget):
    return int(min(budget, max(32 << 20, int(needed * 1.2) + (2 << 20))))


# ----------------------------- kernels ----------------------------------------

def _full_kernel(mxu_dtype, w_ref, x_ref, out_ref, wsm_ref, *scratch):
    # Grid: (row tiles i [parallel], T tiles j [arbitrary, innermost]).
    # Softmax over the full row (dim=1) is computed once per row tile (j == 0)
    # into the j-resident wsm output block; a VMEM scratch copy only exists
    # when the dot-LHS dtype differs from the wsm dtype.
    sm_ref = scratch[0] if scratch else wsm_ref

    @pl.when(pl.program_id(1) == 0)
    def _():
        w = w_ref[...].astype(jnp.float32)
        w = w - jnp.max(w, axis=1, keepdims=True)
        e = jnp.exp(w)
        # Exact divide (not approx reciprocal): runs once per row tile and the
        # softmaxed weights are returned to the user.
        sm = e / jnp.sum(e, axis=1, keepdims=True)
        wsm_ref[...] = sm.astype(wsm_ref.dtype)
        if scratch:
            sm_ref[...] = sm.astype(sm_ref.dtype)

    rhs = x_ref[...]
    if mxu_dtype is not None and rhs.dtype != jnp.dtype(mxu_dtype):
        rhs = rhs.astype(mxu_dtype)
    out_ref[...] = jnp.dot(
        sm_ref[...], rhs, preferred_element_type=jnp.float32
    ).astype(out_ref.dtype)


def _line_kernel(wsig_ref, x_ref, out_ref):
    # Pure broadcast multiply; mem-bound, lane-dense tiles.
    out_ref[...] = (wsig_ref[...] * x_ref[...]).astype(out_ref.dtype)


# ----------------------------- wrappers ----------------------------------------

def ensembler_full(weights, x, *, tm=None, tt=None, mxu_dtype=None):
    """style='full': out = softmax(weights, dim=1) @ x ; returns (out, softmaxed_weights).

    mxu_dtype: optional dtype (e.g. jnp.bfloat16) to feed the MXU operands in;
    accumulation stays f32. Default None = use x's dtype (exact for f32 inputs).
    """
    N, N2 = weights.shape
    assert N == N2, "full-style weights must be square [N, N]"
    Nx, T = x.shape
    assert Nx == N, "x must be [N, T]"

    w_bytes = jnp.dtype(weights.dtype).itemsize
    x_bytes = jnp.dtype(x.dtype).itemsize
    out_bytes = x_bytes
    lhs_dtype = jnp.dtype(mxu_dtype) if mxu_dtype is not None else jnp.dtype(x.dtype)
    need_scratch = lhs_dtype != jnp.dtype(weights.dtype)

    def _needed(tm_, tt_):
        b = 2 * tm_ * N * w_bytes            # W row tile (double-buffered)
        b += 2 * N * tt_ * x_bytes           # x column tile
        b += 2 * tm_ * tt_ * out_bytes       # out tile
        b += 2 * tm_ * N * w_bytes           # wsm output (j-resident)
        if need_scratch:
            b += tm_ * N * lhs_dtype.itemsize  # cached softmax rows (1 buffer)
        return b

    budget = _vmem_budget_bytes()
    tm, tt = _select_tiles(N, T, _tm_preference(), 8, _TT_PREFERENCE, 128,
                           _needed, budget, fixed0=tm, fixed1=tt)
    grid = (N // tm, T // tt)
    scratch_shapes = [pltpu.VMEM((tm, N), lhs_dtype)] if need_scratch else []

    out, w_sm = pl.pallas_call(
        functools.partial(_full_kernel, mxu_dtype),
        out_shape=(
            jax.ShapeDtypeStruct((N, T), x.dtype),
            jax.ShapeDtypeStruct((N, N), weights.dtype),
        ),
        grid_spec=pltpu.PrefetchScalarGridSpec(
            num_scalar_prefetch=0,
            grid=grid,
            in_specs=[
                pl.BlockSpec((tm, N), lambda i, j: (i, 0)),   # W row tile (full K)
                pl.BlockSpec((N, tt), lambda i, j: (0, j)),   # x column tile
            ],
            out_specs=(
                pl.BlockSpec((tm, tt), lambda i, j: (i, j)),  # out tile
                pl.BlockSpec((tm, N), lambda i, j: (i, 0)),   # wsm resident over j
            ),
            scratch_shapes=scratch_shapes,
        ),
        compiler_params=pltpu.CompilerParams(
            dimension_semantics=("parallel", "arbitrary"),
            vmem_limit_bytes=_vmem_limit(_needed(tm, tt), budget),
        ),
    )(weights, x)
    return out, w_sm


def ensembler_line(weights, x, *, tn=None, tt=None):
    """style='line': out = sigmoid(weights) * x ; returns (out, sigmoid_weights)."""
    N, one = weights.shape
    assert one == 1, "line-style weights must be [N, 1]"
    Nx, T = x.shape
    assert Nx == N, "x must be [N, T]"

    # O(N) transcendental: done in XLA; keeps the (N, 1) side output out of the
    # kernel (a last-dim-1 kernel output would force masked vst.msk stores).
    w_sig = jax.nn.sigmoid(weights.astype(jnp.float32)).astype(weights.dtype)

    w_bytes = jnp.dtype(weights.dtype).itemsize
    x_bytes = jnp.dtype(x.dtype).itemsize

    def _needed(tn_, tt_):
        return 2 * tn_ * w_bytes + 2 * tn_ * tt_ * x_bytes * 2   # in + out tiles

    budget = _vmem_budget_bytes()
    tn, tt = _select_tiles(N, T, (512, 256, 128, 64, 32, 16, 8), 8,
                           _TT_PREFERENCE, 128, _needed, budget,
                           fixed0=tn, fixed1=tt)
    grid = (N // tn, T // tt)

    out = pl.pallas_call(
        _line_kernel,
        out_shape=jax.ShapeDtypeStruct((N, T), x.dtype),
        grid_spec=pltpu.PrefetchScalarGridSpec(
            num_scalar_prefetch=0,
            grid=grid,
            in_specs=[
                pl.BlockSpec((tn, 1), lambda i, j: (i, 0)),    # per-row scale
                pl.BlockSpec((tn, tt), lambda i, j: (i, j)),   # x tile
            ],
            out_specs=pl.BlockSpec((tn, tt), lambda i, j: (i, j)),
        ),
        compiler_params=pltpu.CompilerParams(
            dimension_semantics=("parallel", "parallel"),
            vmem_limit_bytes=_vmem_limit(_needed(tn, tt), budget),
        ),
    )(w_sig, x)
    return out, w_sig


# ----------------------------- main --------------------------------------------

if __name__ == "__main__":
    key = jax.random.PRNGKey(0)
    k_wf, k_wl, k_x = jax.random.split(key, 3)

    N, T = 256, 1024  # small, lane/sublane-aligned; picker collapses to 1 block

    # Deterministic parameter init (mirrors torch.randn-based init in __init__):
    w_full = jax.random.normal(k_wf, (N, N), dtype=jnp.float32)              # style='full'
    w_line = jax.random.normal(k_wl, (N, 1), dtype=jnp.float32) * 0.1 - 5.0  # style='line'

    x = jax.random.normal(k_x, (N, T), dtype=jnp.float32)

    # --- style='full' ---
    out_f, wsm = ensembler_full(w_full, x)
    jax.block_until_ready((out_f, wsm))
    ref_w = jax.nn.softmax(w_full, axis=1)
    ref_out = ref_w @ x
    assert out_f.shape == (N, T) and wsm.shape == (N, N)
    assert jnp.allclose(wsm, ref_w, atol=1e-5, rtol=1e-5)
    assert jnp.allclose(out_f, ref_out, atol=1e-3, rtol=1e-3)

    # --- style='line' ---
    out_l, wsig = ensembler_line(w_line, x)
    jax.block_until_ready((out_l, wsig))
    ref_ws = jax.nn.sigmoid(w_line)
    assert out_l.shape == (N, T) and wsig.shape == (N, 1)
    assert jnp.allclose(out_l, ref_ws * x, atol=1e-5, rtol=1e-5)
    assert jnp.allclose(wsig, ref_ws, atol=1e-6, rtol=1e-6)

    print("KERNEL_OK")
</pallas_src>

<mosaic_0001>
module attributes {stable_mosaic.version = 11 : i64} {
  func.func @_full_kernel(%arg0: i32, %arg1: i32, %arg2: memref<256x256xf32, #tpu.memory_space<vmem>>, %arg3: memref<256x1024xf32, #tpu.memory_space<vmem>>, %arg4: memref<256x1024xf32, #tpu.memory_space<vmem>>, %arg5: memref<256x256xf32, #tpu.memory_space<vmem>>) attributes {dimension_semantics = [#tpu.dimension_semantics<parallel>, #tpu.dimension_semantics<arbitrary>], iteration_bounds = array<i64: 1, 1>, scalar_prefetch = 0 : i64, scratch_operands = 0 : i64, tpu.core_type = #tpu.core_type<tc>, window_params = [{transform_indices = @transform_0, window_bounds = array<i64: 256, 256>}, {transform_indices = @transform_1, window_bounds = array<i64: 256, 1024>}, {transform_indices = @transform_2, window_bounds = array<i64: 256, 1024>}, {transform_indices = @transform_3, window_bounds = array<i64: 256, 256>}]} {
    %c0_i32 = arith.constant 0 : i32
    %0 = arith.cmpi eq, %arg1, %c0_i32 : i32
    %1 = arith.extui %0 : i1 to i32
    %c0_i32_0 = arith.constant 0 : i32
    %2 = arith.cmpi ne, %1, %c0_i32_0 : i32
    scf.if %2 {
      %c0_6 = arith.constant 0 : index
      %c0_7 = arith.constant 0 : index
      %7 = vector.load %arg2[%c0_6, %c0_7] : memref<256x256xf32, #tpu.memory_space<vmem>>, vector<256x256xf32>
      %cst_8 = arith.constant dense<0xFF800000> : vector<256xf32>
      %8 = vector.multi_reduction <maximumf>, %7, %cst_8 [1] : vector<256x256xf32> to vector<256xf32>
      %9 = vector.shape_cast %8 : vector<256xf32> to vector<256x1xf32>
      %10 = vector.broadcast %9 : vector<256x1xf32> to vector<256x256xf32>
      %11 = arith.subf %7, %10 : vector<256x256xf32>
      %12 = math.exp %11 : vector<256x256xf32>
      %cst_9 = arith.constant dense<0.000000e+00> : vector<256xf32>
      %13 = vector.multi_reduction <add>, %12, %cst_9 [1] : vector<256x256xf32> to vector<256xf32>
      %14 = vector.shape_cast %13 : vector<256xf32> to vector<256x1xf32>
      %15 = vector.broadcast %14 : vector<256x1xf32> to vector<256x256xf32>
      %16 = arith.divf %12, %15 : vector<256x256xf32>
      %c0_10 = arith.constant 0 : index
      %c0_11 = arith.constant 0 : index
      %17 = vector.load %arg5[%c0_10, %c0_11] : memref<256x256xf32, #tpu.memory_space<vmem>>, vector<256x256xf32>
      tpu.vector_store %arg5[%c0_10, %c0_11], %16 {strides = array<i32>} : memref<256x256xf32, #tpu.memory_space<vmem>>, vector<256x256xf32>,
    } else {
    }
    %c0 = arith.constant 0 : index
    %c0_1 = arith.constant 0 : index
    %3 = vector.load %arg3[%c0, %c0_1] : memref<256x1024xf32, #tpu.memory_space<vmem>>, vector<256x1024xf32>
    %c0_2 = arith.constant 0 : index
    %c0_3 = arith.constant 0 : index
    %4 = vector.load %arg5[%c0_2, %c0_3] : memref<256x256xf32, #tpu.memory_space<vmem>>, vector<256x256xf32>
    %cst = arith.constant dense<0.000000e+00> : vector<256x1024xf32>
    %5 = tpu.matmul %4, %3, %cst {dimension_numbers = #tpu.dot_dimension_numbers<[1], [0], [0], [1], [0, 0, 1, 1], [], []>} : vector<256x256xf32>, vector<256x1024xf32>, vector<256x1024xf32> -> vector<256x1024xf32>
    %c0_4 = arith.constant 0 : index
    %c0_5 = arith.constant 0 : index
    %6 = vector.load %arg4[%c0_4, %c0_5] : memref<256x1024xf32, #tpu.memory_space<vmem>>, vector<256x1024xf32>
    tpu.vector_store %arg4[%c0_4, %c0_5], %5 {strides = array<i32>} : memref<256x1024xf32, #tpu.memory_space<vmem>>, vector<256x1024xf32>,
    return
  }
  func.func @transform_0(%arg0: i32, %arg1: i32) -> (i32, i32) {
    %c0_i32 = arith.constant 0 : i32
    %c0_i32_0 = arith.constant 0 : i32
    return %arg0, %c0_i32 : i32, i32
  }
  func.func @transform_1(%arg0: i32, %arg1: i32) -> (i32, i32) {
    %c0_i32 = arith.constant 0 : i32
    %c0_i32_0 = arith.constant 0 : i32
    return %c0_i32, %arg1 : i32, i32
  }
  func.func @transform_2(%arg0: i32, %arg1: i32) -> (i32, i32) {
    %c0_i32 = arith.constant 0 : i32
    return %arg0, %arg1 : i32, i32
  }
  func.func @transform_3(%arg0: i32, %arg1: i32) -> (i32, i32) {
    %c0_i32 = arith.constant 0 : i32
    %c0_i32_0 = arith.constant 0 : i32
    return %arg0, %c0_i32 : i32, i32
  }
}

</mosaic_0001>

<bundles_post_ra>
// kernel: tpu_custom_call.1
= control target key start
LH: loop header
LB: loop body
LE: loop exit
PB: predicated region body
PF: predicated region fallthrough
CT: control target
= control target key end

     0   :  { %9 = vsyncpa [#allocation3], 0  ;;  %s3879_s0 = inlined_call_operand.hbm [shape: f32[256,256], index: 0, kind: input, shape index: {}]   ;;  %s3880_s1 = inlined_call_operand.hbm [shape: f32[256,1024], index: 1, kind: input, shape index: {}]   ;;  %s3881_s2 = inlined_call_operand.hbm [shape: f32[256,1024], index: 2, kind: output, shape index: {0}]   ;;  %s3882_s3 = inlined_call_operand.hbm [shape: f32[256,256], index: 3, kind: output, shape index: {1}]  }
   0x1   :  { %10 = vsyncpa [#allocation6], 0 }
   0x2   :  { %11 = vsyncpa [#allocation4], 0 }
   0x3   :  { %12 = vsyncpa [#allocation9], 0  ;;  %s2868_s12 = smov [#allocation2]   ;;  %s2772_s16 = scalar_lea.hbm %s3879_s0, 8192 }
   0x4   :  { %s18_s13 = sshll.u32 %s2868_s12, 4  ;;  %p2773_p0 = scmp.ne.s32.totalorder %s3879_s0, %s2772_s16  ;;  %s19_s13 = int_to_ptr.vmem [resolvable:$true] %s18_s13 }
   0x5   :  { %p2776_p1 = scmp.lt.u32.totalorder %s2772_s16, %s3879_s0 }
   0x7   :  { %p2778_p2 = pnand %p2776_p1, %p2773_p0 }
   0x9   :  { %2781 = shalt.err (!%p2778_p2)
}
   0xa   :  { %s2782_s21 = scalar_lea.vmem %s19_s13, 8192  ;;  %p2787_p4 = scmp.lt.s32.totalorder %s19_s13, %s19_s13 }
   0xb   :  { %p2783_p3 = scmp.ne.s32.totalorder %s19_s13, %s2782_s21  ;;  %p2788_p5 = scmp.lt.s32.totalorder %s2782_s21, %s2782_s21 }
   0xd   :  { %p2789_p6 = por %p2788_p5, %p2787_p4 }
   0xf   :  { %p2790_p7 = pnand %p2789_p6, %p2783_p3 }
  0x11   :  { %2793 = shalt.err (!%p2790_p7)
}
  0x12   :  { %s2869_s22 = smov 256   ;;  %s2870_s23 = smov 16  }
  0x13   :  { %24 = dma.hbm_to_vmem [thread:$0]  %s3879_s0, 8192, %s19_s13, [#allocation3], %s2869_s22, %s2869_s22, %s2870_s23  }
  0x14   :  { %s2871_s26 = smov [#allocation5]   ;;  %s2794_s30 = scalar_lea.hbm %s3880_s1, 32768 }
  0x15   :  { %s30_s27 = sshll.u32 %s2871_s26, 4  ;;  %p2795_p8 = scmp.ne.s32.totalorder %s3880_s1, %s2794_s30  ;;  %s31_s27 = int_to_ptr.vmem [resolvable:$true] %s30_s27 }
  0x16   :  { %p2798_p9 = scmp.lt.u32.totalorder %s2794_s30, %s3880_s1 }
  0x18   :  { %p2800_p10 = pnand %p2798_p9, %p2795_p8 }
  0x1a   :  { %2803 = shalt.err (!%p2800_p10)
}
  0x1b   :  { %s2804_s8 = scalar_lea.vmem %s31_s27, 32768  ;;  %p2809_p12 = scmp.lt.s32.totalorder %s31_s27, %s31_s27 }
  0x1c   :  { %p2805_p11 = scmp.ne.s32.totalorder %s31_s27, %s2804_s8  ;;  %p2810_p13 = scmp.lt.s32.totalorder %s2804_s8, %s2804_s8 }
  0x1e   :  { %p2811_p0 = por %p2810_p13, %p2809_p12 }
  0x20   :  { %p2812_p1 = pnand %p2811_p0, %p2805_p11 }
  0x22   :  { %2815 = shalt.err (!%p2812_p1)
}
  0x23   :  { %s2872_s0 = smov 1024   ;;  %s2873_s9 = smov 64  }
  0x24   :  { %36 = dma.hbm_to_vmem [thread:$0]  %s3880_s1, 32768, %s31_s27, [#allocation6], %s2872_s0, %s2872_s0, %s2873_s9  }
  0x25   :  { %2860 = dma.done.wait [#allocation3], 8192  }
  0x26   :  { %2861 = vsyncadd [#allocation3], 4294959104 }
  0x27   :  { %2862 = dma.done.wait [#allocation6], 32768  }
  0x28   :  { %2863 = vsyncadd [#allocation6], 4294934528  ;;  %v2926_v0 = vld [vmem:[#allocation2] sm:$0xff]  ;;  %v2928_v1 = vld [vmem:[#allocation2 + $0x8] sm:$0xff]  ;;  %s2874_s1 = smov [#allocation8]  }
  0x29   :  { %v2930_v2 = vld [vmem:[#allocation2 + $0x10] sm:$0xff]  ;;  %v111_v3 = vmax.f32 %v2926_v0, %v2928_v1  ;;  %v2934_v4 = vld [vmem:[#allocation2 + $0x18] sm:$0xff]  ;;  %v2936_v5 = vld [vmem:[#allocation2 + $0x20] sm:$0xff]  ;;  %s2276_s12 = sshll.u32 %s2874_s1, 4  ;;  %s2277_s12 = int_to_ptr.vmem [resolvable:$true] %s2276_s12 }
  0x2a   :  { %v2938_v6 = vld [vmem:[#allocation2 + $0x28] sm:$0xff]  ;;  %v2942_v8 = vld [vmem:[#allocation2 + $0x30] sm:$0xff]  ;;  %v114_v9 = vmax.f32 %v2930_v2, %v2934_v4  ;;  %v2946_v10 = vld [vmem:[#allocation2 + $0x38] sm:$0xff]  ;;  %s2816_s13 = scalar_lea.vmem %s2277_s12, 8192  ;;  %p2821_p3 = scmp.lt.s32.totalorder %s2277_s12, %s2277_s12 }
  0x2b   :  { %v117_v7 = vmax.f32 %v2936_v5, %v2938_v6  ;;  %112 = vmax.xlane.f32.xlu0 %v111_v3  ;;  %v2948_v11 = vld [vmem:[#allocation2 + $0x40] sm:$0xff]  ;;  %v2950_v12 = vld [vmem:[#allocation2 + $0x48] sm:$0xff]  ;;  %v120_v13 = vmax.f32 %v2942_v8, %v2946_v10  ;;  %v2954_v14 = vld [vmem:[#allocation2 + $0x50] sm:$0xff]  ;;  %p2817_p2 = scmp.ne.s32.totalorder %s2277_s12, %s2816_s13  ;;  %p2822_p4 = scmp.lt.s32.totalorder %s2816_s13, %s2816_s13 }
  0x2c   :  { %v2956_v15 = vld [vmem:[#allocation2 + $0x58] sm:$0xff]  ;;  %v123_v16 = vmax.f32 %v2948_v11, %v2950_v12  ;;  %v2960_v17 = vld [vmem:[#allocation2 + $0x60] sm:$0xff]  ;;  %v2962_v18 = vld [vmem:[#allocation2 + $0x68] sm:$0xff] }
  0x2d   :  { %118 = vmax.xlane.f32.xlu1 %v117_v7  ;;  %v126_v19 = vmax.f32 %v2954_v14, %v2956_v15  ;;  %v2966_v20 = vld [vmem:[#allocation2 + $0x70] sm:$0xff]  ;;  %v2968_v21 = vld [vmem:[#allocation2 + $0x78] sm:$0xff]  ;;  %v129_v22 = vmax.f32 %v2960_v17, %v2962_v18  ;;  %v2972_v23 = vld [vmem:[#allocation2 + $0x80] sm:$0xff]  ;;  %p2823_p5 = por %p2822_p4, %p2821_p3 }
  0x2e   :  { %v2974_v24 = vld [vmem:[#allocation2 + $0x88] sm:$0xff]  ;;  %v132_v25 = vmax.f32 %v2966_v20, %v2968_v21  ;;  %v2978_v26 = vld [vmem:[#allocation2 + $0x90] sm:$0xff]  ;;  %v2980_v27 = vld [vmem:[#allocation2 + $0x98] sm:$0xff] }
  0x2f   :  { %115 = vmax.xlane.f32.xlu0 %v114_v9  ;;  %v135_v28 = vmax.f32 %v2972_v23, %v2974_v24  ;;  %v2984_v29 = vld [vmem:[#allocation2 + $0xa0] sm:$0xff]  ;;  %v2986_v30 = vld [vmem:[#allocation2 + $0xa8] sm:$0xff]  ;;  %v138_v31 = vmax.f32 %v2978_v26, %v2980_v27  ;;  %v2990_v32 = vld [vmem:[#allocation2 + $0xb0] sm:$0xff]  ;;  %p2824_p6 = pnand %p2823_p5, %p2817_p2 }
  0x30   :  { %v2992_v33 = vld [vmem:[#allocation2 + $0xb8] sm:$0xff]  ;;  %v141_v34 = vmax.f32 %v2984_v29, %v2986_v30  ;;  %v2996_v35 = vld [vmem:[#allocation2 + $0xc0] sm:$0xff]  ;;  %v2998_v36 = vld [vmem:[#allocation2 + $0xc8] sm:$0xff] }
  0x31   :  { %121 = vmax.xlane.f32.xlu1 %v120_v13  ;;  %v144_v37 = vmax.f32 %v2990_v32, %v2992_v33  ;;  %v3002_v38 = vld [vmem:[#allocation2 + $0xd0] sm:$0xff]  ;;  %v3004_v39 = vld [vmem:[#allocation2 + $0xd8] sm:$0xff]  ;;  %v147_v40 = vmax.f32 %v2996_v35, %v2998_v36  ;;  %v3008_v41 = vld [vmem:[#allocation2 + $0xe0] sm:$0xff] }
  0x32   :  { %v3010_v42 = vld [vmem:[#allocation2 + $0xe8] sm:$0xff]  ;;  %v150_v43 = vmax.f32 %v3002_v38, %v3004_v39  ;;  %v3014_v44 = vld [vmem:[#allocation2 + $0xf0] sm:$0xff]  ;;  %v3016_v45 = vld [vmem:[#allocation2 + $0xf8] sm:$0xff] }
  0x33   :  { %124 = vmax.xlane.f32.xlu0 %v123_v16  ;;  %v153_v46 = vmax.f32 %v3008_v41, %v3010_v42  ;;  %v3020_v47 = vld [vmem:[#allocation2 + $0x100] sm:$0xff]  ;;  %v3022_v48 = vld [vmem:[#allocation2 + $0x108] sm:$0xff]  ;;  %v156_v49 = vmax.f32 %v3014_v44, %v3016_v45  ;;  %v3026_v50 = vld [vmem:[#allocation2 + $0x110] sm:$0xff] }
  0x34   :  { %3916 = vst [vmem:[#allocation14_spill] sm:$0xff] %v3026_v50  ;;  %v3028_v51 = vld [vmem:[#allocation2 + $0x118] sm:$0xff]  ;;  %v159_v52 = vmax.f32 %v3020_v47, %v3022_v48  ;;  %v3032_v53 = vld [vmem:[#allocation2 + $0x120] sm:$0xff]  ;;  %v3034_v54 = vld [vmem:[#allocation2 + $0x128] sm:$0xff] }
  0x35   :  { %127 = vmax.xlane.f32.xlu1 %v126_v19  ;;  %3917 = vst [vmem:[#allocation15_spill] sm:$0xff] %v3028_v51  ;;  %v162_v55 = vmax.f32 %v3026_v50, %v3028_v51  ;;  %v3038_v56 = vld [vmem:[#allocation2 + $0x130] sm:$0xff]  ;;  %v3040_v57 = vld [vmem:[#allocation2 + $0x138] sm:$0xff]  ;;  %v165_v58 = vmax.f32 %v3032_v53, %v3034_v54  ;;  %v3044_v59 = vld [vmem:[#allocation2 + $0x140] sm:$0xff] }
  0x36   :  { %3918 = vst [vmem:[#allocation16_spill] sm:$0xff] %v3038_v56  ;;  %3919 = vst [vmem:[#allocation17_spill] sm:$0xff] %v3040_v57  ;;  %v3046_v60 = vld [vmem:[#allocation2 + $0x148] sm:$0xff]  ;;  %v168_v61 = vmax.f32 %v3038_v56, %v3040_v57  ;;  %v3050_v62 = vld [vmem:[#allocation2 + $0x150] sm:$0xff] }
  0x37   :  { %130 = vmax.xlane.f32.xlu0 %v129_v22  ;;  %3920 = vst [vmem:[#allocation18_spill] sm:$0xff] %v3050_v62  ;;  %v90_v63 = vld [vmem:[#allocation2 + $0x158] sm:$0xff]  ;;  %v171_v3 = vmax.f32 %v3044_v59, %v3046_v60  ;;  %v3054_v7 = vld [vmem:[#allocation2 + $0x160] sm:$0xff]  ;;  %v3056_v9 = vld [vmem:[#allocation2 + $0x168] sm:$0xff] }
  0x38   :  { %3921 = vst [vmem:[#allocation19_spill] sm:$0xff] %v3054_v7  ;;  %3922 = vst [vmem:[#allocation20_spill] sm:$0xff] %v3056_v9  ;;  %v174_v13 = vmax.f32 %v3050_v62, %v90_v63  ;;  %v177_v16 = vmax.f32 %v3054_v7, %v3056_v9  ;;  %v93_v19 = vld [vmem:[#allocation2 + $0x170] sm:$0xff]  ;;  %v94_v22 = vld [vmem:[#allocation2 + $0x178] sm:$0xff] }
  0x39   :  { %133 = vmax.xlane.f32.xlu1 %v132_v25  ;;  %v180_v25 = vmax.f32 %v93_v19, %v94_v22  ;;  %v103_v63 = vld [vmem:[#allocation2 + $0x1c0] sm:$0xff]  ;;  %v106_v19 = vld [vmem:[#allocation2 + $0x1d8] sm:$0xff]  ;;  %v681_v57 = vld [vmem:[#allocation5 + $0xd0] sm:$0xff] }
  0x3a   :  { %v682_v62 = vld [vmem:[#allocation5 + $0xd8] sm:$0xff] }
  0x3b   :  { %136 = vmax.xlane.f32.xlu0 %v135_v28  ;;  %v3061_v28 = vld [vmem:[#allocation2 + $0x180] sm:$0xff]  ;;  %v722_v9 = vld [vmem:[#allocation5 + $0x218] sm:$0xff] }
  0x3c   :  { %3923 = vst [vmem:[#allocation21_spill] sm:$0xff] %v3061_v28  ;;  %v730_v7 = vld [vmem:[#allocation5 + $0x258] sm:$0xff] }
  0x3d   :  { %139 = vmax.xlane.f32.xlu1 %v138_v31  ;;  %v3063_v31 = vld [vmem:[#allocation2 + $0x188] sm:$0xff] }
  0x3e   :  { %3924 = vst [vmem:[#allocation22_spill] sm:$0xff] %v3063_v31 }
  0x3f   :  { %142 = vmax.xlane.f32.xlu0 %v141_v34  ;;  %v183_v34 = vmax.f32 %v3061_v28, %v3063_v31  ;;  %v108_v31 = vld [vmem:[#allocation2 + $0x1e8] sm:$0xff] }
  0x41   :  { %145 = vmax.xlane.f32.xlu1 %v144_v37  ;;  %v97_v37 = vld [vmem:[#allocation2 + $0x190] sm:$0xff] }
  0x43   :  { %148 = vmax.xlane.f32.xlu0 %v147_v40  ;;  %v98_v40 = vld [vmem:[#allocation2 + $0x198] sm:$0xff] }
  0x45   :  { %151 = vmax.xlane.f32.xlu1 %v150_v43  ;;  %v186_v43 = vmax.f32 %v97_v37, %v98_v40  ;;  %v109_v37 = vld [vmem:[#allocation2 + $0x1f0] sm:$0xff]  ;;  %v110_v40 = vld [vmem:[#allocation2 + $0x1f8] sm:$0xff] }
  0x47   :  { %154 = vmax.xlane.f32.xlu0 %v153_v46  ;;  %v99_v46 = vld [vmem:[#allocation2 + $0x1a0] sm:$0xff] }
  0x49   :  { %157 = vmax.xlane.f32.xlu1 %v156_v49  ;;  %v100_v49 = vld [vmem:[#allocation2 + $0x1a8] sm:$0xff] }
  0x4b   :  { %160 = vmax.xlane.f32.xlu0 %v159_v52  ;;  %v189_v52 = vmax.f32 %v99_v46, %v100_v49  ;;  %v656_v46 = vld [vmem:[#allocation5 + $0x8] sm:$0xff] }
  0x4c   :  { %v664_v49 = vld [vmem:[#allocation5 + $0x48] sm:$0xff] }
  0x4d   :  { %163 = vmax.xlane.f32.xlu1 %v162_v55  ;;  %v101_v55 = vld [vmem:[#allocation2 + $0x1b0] sm:$0xff] }
  0x4f   :  { %166 = vmax.xlane.f32.xlu0 %v165_v58  ;;  %v102_v58 = vld [vmem:[#allocation2 + $0x1b8] sm:$0xff] }
  0x51   :  { %169 = vmax.xlane.f32.xlu1 %v168_v61  ;;  %v192_v61 = vmax.f32 %v101_v55, %v102_v58  ;;  %v2293_v55 = vpack.c.bf16 %v664_v49, %v656_v46  ;;  %v666_v58 = vld [vmem:[#allocation5 + $0x58] sm:$0xff]  ;;  %v673_v46 = vld [vmem:[#allocation5 + $0x90] sm:$0xff] }
  0x53   :  { %172 = vmax.xlane.f32.xlu0 %v171_v3  ;;  %v104_v3 = vld [vmem:[#allocation2 + $0x1c8] sm:$0xff]  ;;  %2294 = vmatprep.subr.bf16.mxu0 %v2293_v55 }
  0x55   :  { %175 = vmax.xlane.f32.xlu1 %v174_v13  ;;  %v195_v13 = vmax.f32 %v103_v63, %v104_v3  ;;  %v663_v63 = vld [vmem:[#allocation5 + $0x40] sm:$0xff] }
  0x57   :  { %178 = vmax.xlane.f32.xlu0 %v177_v16  ;;  %v105_v16 = vld [vmem:[#allocation2 + $0x1d0] sm:$0xff] }
  0x58   :  { %v198_v22 = vmax.f32 %v105_v16, %v106_v19  ;;  %v665_v16 = vld [vmem:[#allocation5 + $0x50] sm:$0xff]  ;;  %v672_v19 = vld [vmem:[#allocation5 + $0x88] sm:$0xff] }
  0x5b   :  { %181 = vmax.xlane.f32.xlu0 %v180_v25  ;;  %v107_v25 = vld [vmem:[#allocation2 + $0x1e0] sm:$0xff] }
  0x5f   :  { %184 = vmax.xlane.f32.xlu0 %v183_v34  ;;  %v201_v34 = vmax.f32 %v107_v25, %v108_v31  ;;  %v680_v31 = vld [vmem:[#allocation5 + $0xc8] sm:$0xff]  ;;  %v674_v25 = vld [vmem:[#allocation5 + $0x98] sm:$0xff] }
  0x63   :  { %187 = vmax.xlane.f32.xlu0 %v186_v43  ;;  %v204_v43 = vmax.f32 %v109_v37, %v110_v40  ;;  %v2361_v37 = vpack.c.bf16 %v682_v62, %v674_v25  ;;  %v671_v40 = vld [vmem:[#allocation5 + $0x80] sm:$0xff]  ;;  %v712_v25 = vld [vmem:[#allocation5 + $0x1c8] sm:$0xff] }
  0x67   :  { %190 = vmax.xlane.f32.xlu0 %v189_v52  ;;  %v658_v52 = vld [vmem:[#allocation5 + $0x18] sm:$0xff] }
  0x68   :  { %v2357_v3 = vpack.c.bf16 %v666_v58, %v658_v52  ;;  %v688_v52 = vld [vmem:[#allocation5 + $0x108] sm:$0xff] }
  0x69   :  { %v696_v58 = vld [vmem:[#allocation5 + $0x148] sm:$0xff] }
  0x6a   :  { %2358 = vmatprep.subr.bf16.mxu1 %v2357_v3  ;;  %v2301_v55 = vpack.c.bf16 %v696_v58, %v688_v52  ;;  %v695_v3 = vld [vmem:[#allocation5 + $0x140] sm:$0xff]  ;;  %v705_v52 = vld [vmem:[#allocation5 + $0x190] sm:$0xff] }
  0x6b   :  { %193 = vmax.xlane.f32.xlu0 %v192_v61  ;;  %v655_v61 = vld [vmem:[#allocation5] sm:$0xff]  ;;  %v713_v58 = vld [vmem:[#allocation5 + $0x1d0] sm:$0xff] }
  0x6c   :  { %v2295_v28 = vpack.c.bf16 %v663_v63, %v655_v61  ;;  %v2363_v61 = vpack.c.bf16 %v681_v57, %v673_v46  ;;  %v690_v63 = vld [vmem:[#allocation5 + $0x118] sm:$0xff]  ;;  %v711_v57 = vld [vmem:[#allocation5 + $0x1c0] sm:$0xff] }
  0x6e   :  { %2296 = vmatpush1.bf16.msra.mxu0 %v2295_v28  ;;  %v689_v28 = vld [vmem:[#allocation5 + $0x110] sm:$0xff] }
  0x6f   :  { %196 = vmax.xlane.f32.xlu0 %v195_v13  ;;  %v657_v13 = vld [vmem:[#allocation5 + $0x10] sm:$0xff] }
  0x73   :  { %199 = vmax.xlane.f32.xlu0 %v198_v22  ;;  %v2359_v22 = vpack.c.bf16 %v665_v16, %v657_v13  ;;  %v698_v13 = vld [vmem:[#allocation5 + $0x158] sm:$0xff]  ;;  %v687_v16 = vld [vmem:[#allocation5 + $0x100] sm:$0xff] }
  0x74   :  { %v2365_v56 = vpack.c.bf16 %v698_v13, %v690_v63  ;;  %v2303_v62 = vpack.c.bf16 %v695_v3, %v687_v16  ;;  %v720_v63 = vld [vmem:[#allocation5 + $0x208] sm:$0xff]  ;;  %v2371_v16 = vpack.c.bf16 %v713_v58, %v705_v52  ;;  %v727_v3 = vld [vmem:[#allocation5 + $0x240] sm:$0xff]  ;;  %v745_v58 = vld [vmem:[#allocation5 + $0x2d0] sm:$0xff] }
  0x75   :  { %2360 = vmatpush1.bf16.msra.mxu1 %v2359_v22  ;;  %v706_v22 = vld [vmem:[#allocation5 + $0x198] sm:$0xff]  ;;  %v728_v13 = vld [vmem:[#allocation5 + $0x248] sm:$0xff] }
  0x76   :  { %2362 = vmatprep.subr.bf16.mxu1 %v2361_v37  ;;  %v703_v37 = vld [vmem:[#allocation5 + $0x180] sm:$0xff] }
  0x77   :  { %202 = vmax.xlane.f32.xlu0 %v201_v34  ;;  %v2297_v34 = vpack.c.bf16 %v680_v31, %v672_v19  ;;  %v697_v19 = vld [vmem:[#allocation5 + $0x150] sm:$0xff]  ;;  %v704_v31 = vld [vmem:[#allocation5 + $0x188] sm:$0xff] }
  0x79   :  { %2298 = vmatprep.subr.bf16.mxu0 %v2297_v34  ;;  %2364 = vmatpush1.bf16.msra.mxu1 %v2363_v61  ;;  %v714_v34 = vld [vmem:[#allocation5 + $0x1d8] sm:$0xff]  ;;  %v2309_v61 = vpack.c.bf16 %v728_v13, %v720_v63  ;;  %v752_v63 = vld [vmem:[#allocation5 + $0x308] sm:$0xff] }
  0x7a   :  { %2366 = vmatprep.subr.bf16.mxu1 %v2365_v56  ;;  %v2369_v46 = vpack.c.bf16 %v714_v34, %v706_v22  ;;  %v736_v56 = vld [vmem:[#allocation5 + $0x288] sm:$0xff]  ;;  %v738_v22 = vld [vmem:[#allocation5 + $0x298] sm:$0xff] }
  0x7b   :  { %205 = vmax.xlane.f32.xlu0 %v204_v43  ;;  %v679_v43 = vld [vmem:[#allocation5 + $0xc0] sm:$0xff]  ;;  %v746_v34 = vld [vmem:[#allocation5 + $0x2d8] sm:$0xff] }
  0x7c   :  { %v2299_v49 = vpack.c.bf16 %v679_v43, %v671_v40  ;;  %v2367_v40 = vpack.c.bf16 %v697_v19, %v689_v28  ;;  %v2305_v43 = vpack.c.bf16 %v712_v25, %v704_v31  ;;  %v721_v28 = vld [vmem:[#allocation5 + $0x210] sm:$0xff]  ;;  %v2373_v19 = vpack.c.bf16 %v730_v7, %v722_v9  ;;  %v744_v25 = vld [vmem:[#allocation5 + $0x2c8] sm:$0xff]  ;;  %v754_v7 = vld [vmem:[#allocation5 + $0x318] sm:$0xff] }
  0x7d   :  { %v729_v31 = vld [vmem:[#allocation5 + $0x250] sm:$0xff]  ;;  %v2377_v52 = vpack.c.bf16 %v746_v34, %v738_v22  ;;  %v762_v9 = vld [vmem:[#allocation5 + $0x358] sm:$0xff] }
  0x7e   :  { %2300 = vmatpush1.bf16.msra.mxu0 %v2299_v49  ;;  %v2307_v49 = vpack.c.bf16 %v711_v57, %v703_v37  ;;  %2368 = vmatpush1.bf16.msra.mxu1 %v2367_v40  ;;  %v2313_v37 = vpack.c.bf16 %v744_v25, %v736_v56  ;;  %v735_v40 = vld [vmem:[#allocation5 + $0x280] sm:$0xff]  ;;  %v737_v57 = vld [vmem:[#allocation5 + $0x290] sm:$0xff]  ;;  %v768_v56 = vld [vmem:[#allocation5 + $0x388] sm:$0xff] }
  0x7f   :  { %2302 = vmatprep.subr.bf16.mxu0 %v2301_v55  ;;  %v719_v55 = vld [vmem:[#allocation5 + $0x200] sm:$0xff]  ;;  %2370 = vmatprep.subr.bf16.mxu1 %v2369_v46  ;;  %v760_v46 = vld [vmem:[#allocation5 + $0x348] sm:$0xff]  ;;  %v770_v25 = vld [vmem:[#allocation5 + $0x398] sm:$0xff] }
  0x80   :  { %v2311_v51 = vpack.c.bf16 %v727_v3, %v719_v55  ;;  %v2317_v55 = vpack.c.bf16 %v760_v46, %v752_v63  ;;  %v753_v3 = vld [vmem:[#allocation5 + $0x310] sm:$0xff]  ;;  %v778_v22 = vld [vmem:[#allocation5 + $0x3d8] sm:$0xff]  ;;  %v784_v63 = vld [vmem:[#allocation5 + $0x408] sm:$0xff] }
  0x81   :  { %v786_v46 = vld [vmem:[#allocation5 + $0x418] sm:$0xff] }
  0x82   :  { %2304 = vmatpush1.bf16.msra.mxu0 %v2303_v62  ;;  %2372 = vmatpush1.bf16.msra.mxu1 %v2371_v16  ;;  %v2375_v62 = vpack.c.bf16 %v729_v31, %v721_v28  ;;  %v751_v16 = vld [vmem:[#allocation5 + $0x300] sm:$0xff]  ;;  %v2381_v28 = vpack.c.bf16 %v762_v9, %v754_v7  ;;  %v761_v31 = vld [vmem:[#allocation5 + $0x350] sm:$0xff]  ;;  %v794_v7 = vld [vmem:[#allocation5 + $0x458] sm:$0xff] }
  0x83   :  { %2306 = vmatprep.subr.bf16.mxu0 %v2305_v43  ;;  %v743_v43 = vld [vmem:[#allocation5 + $0x2c0] sm:$0xff]  ;;  %2374 = vmatprep.subr.bf16.mxu1 %v2373_v19  ;;  %v776_v19 = vld [vmem:[#allocation5 + $0x3c8] sm:$0xff] }
  0x84   :  { %v2315_v13 = vpack.c.bf16 %v743_v43, %v735_v40  ;;  %v2321_v40 = vpack.c.bf16 %v776_v19, %v768_v56  ;;  %v769_v43 = vld [vmem:[#allocation5 + $0x390] sm:$0xff]  ;;  %v2389_v56 = vpack.c.bf16 %v794_v7, %v786_v46  ;;  %v807_v46 = vld [vmem:[#allocation5 + $0x4c0] sm:$0xff] }
  0x85   :  { %v793_v19 = vld [vmem:[#allocation5 + $0x450] sm:$0xff] }
  0x86   :  { %2308 = vmatpush1.bf16.msra.mxu0 %v2307_v49  ;;  %2376 = vmatpush1.bf16.msra.mxu1 %v2375_v62  ;;  %v2379_v49 = vpack.c.bf16 %v745_v58, %v737_v57  ;;  %v767_v62 = vld [vmem:[#allocation5 + $0x380] sm:$0xff]  ;;  %v2385_v57 = vpack.c.bf16 %v778_v22, %v770_v25  ;;  %v777_v58 = vld [vmem:[#allocation5 + $0x3d0] sm:$0xff]  ;;  %v800_v25 = vld [vmem:[#allocation5 + $0x488] sm:$0xff] }
  0x87   :  { %2310 = vmatprep.subr.bf16.mxu0 %v2309_v61  ;;  %v759_v61 = vld [vmem:[#allocation5 + $0x340] sm:$0xff]  ;;  %2378 = vmatprep.subr.bf16.mxu1 %v2377_v52  ;;  %v792_v52 = vld [vmem:[#allocation5 + $0x448] sm:$0xff]  ;;  %v801_v7 = vld [vmem:[#allocation5 + $0x490] sm:$0xff] }
  0x88   :  { %v2319_v34 = vpack.c.bf16 %v759_v61, %v751_v16  ;;  %v791_v16 = vld [vmem:[#allocation5 + $0x440] sm:$0xff]  ;;  %v785_v61 = vld [vmem:[#allocation5 + $0x410] sm:$0xff]  ;;  %v808_v22 = vld [vmem:[#allocation5 + $0x4c8] sm:$0xff] }
  0x8a   :  { %2312 = vmatpush1.bf16.msra.mxu0 %v2311_v51  ;;  %2380 = vmatpush1.bf16.msra.mxu1 %v2379_v49  ;;  %v2383_v51 = vpack.c.bf16 %v761_v31, %v753_v3  ;;  %v2325_v49 = vpack.c.bf16 %v792_v52, %v784_v63  ;;  %v799_v63 = vld [vmem:[#allocation5 + $0x480] sm:$0xff] }
  0x8b   :  { %2314 = vmatprep.subr.bf16.mxu0 %v2313_v37  ;;  %v775_v37 = vld [vmem:[#allocation5 + $0x3c0] sm:$0xff]  ;;  %2382 = vmatprep.subr.bf16.mxu1 %v2381_v28 }
  0x8c   :  { %v2323_v9 = vpack.c.bf16 %v775_v37, %v767_v62  ;;  %v810_v62 = vld [vmem:[#allocation5 + $0x4d8] sm:$0xff] }
  0x8e   :  { %2316 = vmatpush1.bf16.msra.mxu0 %v2315_v13  ;;  %2384 = vmatpush1.bf16.msra.mxu1 %v2383_v51  ;;  %v2387_v13 = vpack.c.bf16 %v777_v58, %v769_v43 }
  0x8f   :  { %2318 = vmatprep.subr.bf16.mxu0 %v2317_v55  ;;  %v783_v55 = vld [vmem:[#allocation5 + $0x400] sm:$0xff]  ;;  %2386 = vmatprep.subr.bf16.mxu1 %v2385_v57  ;;  %v2329_v57 = vpack.c.bf16 %v808_v22, %v800_v25 }
  0x90   :  { %v2327_v58 = vpack.c.bf16 %v791_v16, %v783_v55  ;;  %v816_v55 = vld [vmem:[#allocation5 + $0x508] sm:$0xff] }
  0x91   :  { %v824_v16 = vld [vmem:[#allocation5 + $0x548] sm:$0xff] }
  0x92   :  { %2320 = vmatpush1.bf16.msra.mxu0 %v2319_v34  ;;  %2388 = vmatpush1.bf16.msra.mxu1 %v2387_v13  ;;  %v2333_v22 = vpack.c.bf16 %v824_v16, %v816_v55 }
  0x93   :  { %2322 = vmatprep.subr.bf16.mxu0 %v2321_v40  ;;  %v802_v40 = vld [vmem:[#allocation5 + $0x498] sm:$0xff]  ;;  %2390 = vmatprep.subr.bf16.mxu1 %v2389_v56 }
  0x96   :  { %2324 = vmatpush1.bf16.msra.mxu0 %v2323_v9  ;;  %v809_v9 = vld [vmem:[#allocation5 + $0x4d0] sm:$0xff] }
  0x97   :  { %2326 = vmatprep.subr.bf16.mxu0 %v2325_v49  ;;  %v818_v49 = vld [vmem:[#allocation5 + $0x518] sm:$0xff]  ;;  %v2395_v56 = vpack.c.bf16 %v809_v9, %v801_v7 }
  0x9a   :  { %2328 = vmatpush1.bf16.msra.mxu0 %v2327_v58 }
  0x9b   :  { %2330 = vmatprep.subr.bf16.mxu0 %v2329_v57 }
  0xb8   :  { %v113_v50 = vpop.xlane.xlu0 %112 }
  0xb9   :  { %v207_v3 = vsub.f32 %v2926_v0, %v113_v50  ;;  %v208_v28 = vsub.f32 %v2928_v1, %v113_v50  ;;  %v2391_v50 = vpack.c.bf16 %v793_v19, %v785_v61  ;;  %v826_v61 = vld [vmem:[#allocation5 + $0x558] sm:$0xff] }
  0xba   :  { %v119_v31 = vpop.xlane.xlu1 %118 }
  0xbb   :  { %v211_v34 = vsub.f32 %v2936_v5, %v119_v31  ;;  %v212_v51 = vsub.f32 %v2938_v6, %v119_v31  ;;  %v271_v37 = vmul.f32 1.442695, %v207_v3  ;;  %v273_v43 = vmul.f32 1.442695, %v208_v28  ;;  %2392 = vmatpush1.bf16.msra.mxu1 %v2391_v50 }
  0xbc   :  { %v116_v0 = vpop.xlane.xlu0 %115  ;;  %v2393_v3 = vpack.c.bf16 %v810_v62, %v802_v40  ;;  %v2397_v62 = vpack.c.bf16 %v826_v61, %v818_v49 }
  0xbd   :  { %v279_v52 = vmul.f32 1.442695, %v211_v34  ;;  %v281_v1 = vmul.f32 1.442695, %v212_v51  ;;  %2557 = vpow2.f32 %v271_v37  ;;  %v209_v5 = vsub.f32 %v2930_v2, %v116_v0  ;;  %v815_v34 = vld [vmem:[#allocation5 + $0x500] sm:$0xff]  ;;  %v817_v37 = vld [vmem:[#allocation5 + $0x510] sm:$0xff] }
  0xbe   :  { %v210_v6 = vsub.f32 %v2934_v4, %v116_v0  ;;  %v122_v31 = vpop.xlane.xlu1 %121  ;;  %2559 = vpow2.f32 %v273_v43  ;;  %v2331_v2 = vpack.c.bf16 %v807_v46, %v799_v63  ;;  %v823_v51 = vld [vmem:[#allocation5 + $0x540] sm:$0xff]  ;;  %2394 = vmatprep.subr.bf16.mxu1 %v2393_v3  ;;  %v825_v43 = vld [vmem:[#allocation5 + $0x550] sm:$0xff] }
  0xbf   :  { %v213_v28 = vsub.f32 %v2942_v8, %v122_v31  ;;  %v214_v13 = vsub.f32 %v2946_v10, %v122_v31  ;;  %v275_v19 = vmul.f32 1.442695, %v209_v5  ;;  %2561 = vpow2.f32 %v279_v52  ;;  %2396 = vmatpush1.bf16.msra.mxu1 %v2395_v56 }
  0xc0   :  { %v277_v25 = vmul.f32 1.442695, %v210_v6  ;;  %2563 = vpow2.f32 %v281_v1  ;;  %v125_v4 = vpop.xlane.xlu0 %124  ;;  %2332 = vmatpush1.bf16.msra.mxu0 %v2331_v2  ;;  %v2335_v52 = vpack.c.bf16 %v823_v51, %v815_v34  ;;  %2398 = vmatprep.subr.bf16.mxu1 %v2397_v62 }
  0xc1   :  { %2565 = vpow2.f32 %v275_v19  ;;  %v215_v8 = vsub.f32 %v2948_v11, %v125_v4  ;;  %v283_v40 = vmul.f32 1.442695, %v213_v28  ;;  %v216_v58 = vsub.f32 %v2950_v12, %v125_v4  ;;  %2334 = vmatprep.subr.bf16.mxu0 %v2333_v22 }
  0xc2   :  { %v128_v10 = vpop.xlane.xlu1 %127  ;;  %2567 = vpow2.f32 %v277_v25  ;;  %v285_v63 = vmul.f32 1.442695, %v214_v13  ;;  %v2399_v11 = vpack.c.bf16 %v825_v43, %v817_v37  ;;  %v832_v43 = vld [vmem:[#allocation5 + $0x588] sm:$0xff] }
  0xc3   :  { %v217_v0 = vsub.f32 %v2954_v14, %v128_v10  ;;  %v218_v50 = vsub.f32 %v2956_v15, %v128_v10  ;;  %v287_v57 = vmul.f32 1.442695, %v215_v8  ;;  %2569 = vpow2.f32 %v283_v40 }
  0xc4   :  { %v131_v1 = vpop.xlane.xlu0 %130  ;;  %v289_v5 = vmul.f32 1.442695, %v216_v58  ;;  %2571 = vpow2.f32 %v285_v63  ;;  %2336 = vmatpush1.bf16.msra.mxu0 %v2335_v52  ;;  %2400 = vmatpush1.bf16.msra.mxu1 %v2399_v11  ;;  %v840_v58 = vld [vmem:[#allocation5 + $0x5c8] sm:$0xff] }
  0xc5   :  { %v219_v46 = vsub.f32 %v2960_v17, %v131_v1  ;;  %v220_v12 = vsub.f32 %v2962_v18, %v131_v1  ;;  %v291_v14 = vmul.f32 1.442695, %v217_v0  ;;  %v293_v9 = vmul.f32 1.442695, %v218_v50  ;;  %v834_v1 = vld [vmem:[#allocation5 + $0x598] sm:$0xff] }
  0xc6   :  { %v134_v7 = vpop.xlane.xlu1 %133  ;;  %2573 = vpow2.f32 %v287_v57  ;;  %v842_v50 = vld [vmem:[#allocation5 + $0x5d8] sm:$0xff]  ;;  %v2337_v57 = vpack.c.bf16 %v840_v58, %v832_v43 }
  0xc7   :  { %v3081_v6 = vpop.eup %2557  ;;  %v221_v31 = vsub.f32 %v2966_v20, %v134_v7  ;;  %v222_v55 = vsub.f32 %v2968_v21, %v134_v7  ;;  %v295_v16 = vmul.f32 1.442695, %v219_v46  ;;  %2575 = vpow2.f32 %v289_v5  ;;  %v831_v5 = vld [vmem:[#allocation5 + $0x580] sm:$0xff] }
  0xc8   :  { %v3084_v15 = vpop.eup %2559  ;;  %v137_v3 = vpop.xlane.xlu0 %136  ;;  %v297_v20 = vmul.f32 1.442695, %v220_v12  ;;  %2577 = vpow2.f32 %v291_v14  ;;  %2338 = vmatprep.subr.bf16.mxu0 %v2337_v57 }
  0xc9   :  { %v3087_v17 = vpop.eup %2561  ;;  %v399_v18 = vadd.f32 %v3084_v15, %v3081_v6  ;;  %v223_v49 = vsub.f32 %v2972_v23, %v137_v3  ;;  %v299_v21 = vmul.f32 1.442695, %v221_v31  ;;  %v224_v25 = vsub.f32 %v2974_v24, %v137_v3 }
  0xca   :  { %v3091_v28 = vpop.xlane.xlu1 %139  ;;  %v3093_v13 = vpop.eup %2563  ;;  %2579 = vpow2.f32 %v293_v9  ;;  %v301_v4 = vmul.f32 1.442695, %v222_v55  ;;  %v2401_v3 = vpack.c.bf16 %v842_v50, %v834_v1 }
  0xcb   :  { %v3096_v61 = vpop.eup %2565  ;;  %400 = vadd.xlane.f32.xlu1 %v399_v18  ;;  %2581 = vpow2.f32 %v295_v16  ;;  %v303_v51 = vmul.f32 1.442695, %v223_v49  ;;  %v405_v24 = vadd.f32 %v3093_v13, %v3087_v17  ;;  %v225_v37 = vsub.f32 %v2978_v26, %v3091_v28  ;;  %v833_v18 = vld [vmem:[#allocation5 + $0x590] sm:$0xff] }
  0xcc   :  { %v3098_v19 = vpop.eup %2567  ;;  %v143_v2 = vpop.xlane.xlu0 %142  ;;  %2583 = vpow2.f32 %v297_v20  ;;  %v226_v11 = vsub.f32 %v2980_v27, %v3091_v28  ;;  %v841_v28 = vld [vmem:[#allocation5 + $0x5d0] sm:$0xff]  ;;  %2402 = vmatprep.subr.bf16.mxu1 %v2401_v3 }
  0xcd   :  { %v227_v56 = vsub.f32 %v2984_v29, %v143_v2  ;;  %v228_v22 = vsub.f32 %v2986_v30, %v143_v2  ;;  %v402_v23 = vadd.f32 %v3098_v19, %v3096_v61  ;;  %v3107_v8 = vpop.eup %2569  ;;  %2585 = vpow2.f32 %v299_v21  ;;  %v857_v3 = vld [vmem:[#allocation5 + $0x650] sm:$0xff] }
  0xce   :  { %v3105_v34 = vpop.xlane.xlu1 %145  ;;  %v3111_v62 = vpop.eup %2571  ;;  %v305_v29 = vmul.f32 1.442695, %v224_v25  ;;  %2587 = vpow2.f32 %v301_v4  ;;  %v307_v31 = vmul.f32 1.442695, %v225_v37  ;;  %v309_v49 = vmul.f32 1.442695, %v226_v11 }
  0xcf   :  { %v311_v40 = vmul.f32 1.442695, %v227_v56  ;;  %v313_v10 = vmul.f32 1.442695, %v228_v22  ;;  %403 = vadd.xlane.f32.xlu1 %v402_v23  ;;  %v229_v27 = vsub.f32 %v2990_v32, %v3105_v34  ;;  %v230_v21 = vsub.f32 %v2992_v33, %v3105_v34  ;;  %v848_v56 = vld [vmem:[#allocation5 + $0x608] sm:$0xff]  ;;  %v858_v37 = vld [vmem:[#allocation5 + $0x658] sm:$0xff] }
  0xd0   :  { %v149_v30 = vpop.xlane.xlu0 %148  ;;  %v3121_v46 = vpop.eup %2573  ;;  %v856_v22 = vld [vmem:[#allocation5 + $0x648] sm:$0xff]  ;;  %v2403_v34 = vpack.c.bf16 %v841_v28, %v833_v18  ;;  %v855_v11 = vld [vmem:[#allocation5 + $0x640] sm:$0xff] }
  0xd1   :  { %2589 = vpow2.f32 %v311_v40  ;;  %v231_v63 = vsub.f32 %v2996_v35, %v149_v30  ;;  %v232_v0 = vsub.f32 %v2998_v36, %v149_v30  ;;  %v408_v35 = vadd.f32 %v3111_v62, %v3107_v8  ;;  %v839_v36 = vld [vmem:[#allocation5 + $0x5c0] sm:$0xff]  ;;  %v3125_v12 = vpop.eup %2575  ;;  %v850_v30 = vld [vmem:[#allocation5 + $0x618] sm:$0xff] }
  0xd2   :  { %v3117_v52 = vpop.xlane.xlu1 %151  ;;  %2591 = vpow2.f32 %v313_v10  ;;  %v3129_v9 = vpop.eup %2577  ;;  %v2339_v32 = vpack.c.bf16 %v839_v36, %v831_v5  ;;  %v315_v40 = vmul.f32 1.442695, %v229_v27  ;;  %v317_v58 = vmul.f32 1.442695, %v230_v21  ;;  %2404 = vmatpush1.bf16.msra.mxu1 %v2403_v34  ;;  %v849_v27 = vld [vmem:[#allocation5 + $0x610] sm:$0xff]  ;;  %v864_v21 = vld [vmem:[#allocation5 + $0x688] sm:$0xff] }
  0xd3   :  { %2593 = vpow2.f32 %v303_v51  ;;  %v319_v26 = vmul.f32 1.442695, %v231_v63  ;;  %v321_v7 = vmul.f32 1.442695, %v232_v0  ;;  %406 = vadd.xlane.f32.xlu1 %v405_v24  ;;  %v233_v33 = vsub.f32 %v3002_v38, %v3117_v52 }
  0xd4   :  { %2595 = vpow2.f32 %v305_v29  ;;  %v155_v14 = vpop.xlane.xlu0 %154  ;;  %v3133_v20 = vpop.eup %2579  ;;  %2340 = vmatpush1.bf16.msra.mxu0 %v2339_v32  ;;  %v234_v63 = vsub.f32 %v3004_v39, %v3117_v52  ;;  %v2341_v38 = vpack.c.bf16 %v856_v22, %v848_v56  ;;  %v2405_v52 = vpack.c.bf16 %v858_v37, %v850_v30  ;;  %v872_v32 = vld [vmem:[#allocation5 + $0x6c8] sm:$0xff]  ;;  %v871_v37 = vld [vmem:[#allocation5 + $0x6c0] sm:$0xff] }
  0xd5   :  { %2597 = vpow2.f32 %v319_v26  ;;  %v235_v55 = vsub.f32 %v3008_v41, %v155_v14  ;;  %v236_v16 = vsub.f32 %v3010_v42, %v155_v14  ;;  %v3137_v25 = vpop.eup %2581  ;;  %v411_v41 = vadd.f32 %v3125_v12, %v3121_v46 }
  0xd6   :  { %2599 = vpow2.f32 %v321_v7  ;;  %v3141_v42 = vpop.xlane.xlu1 %157  ;;  %v3143_v23 = vpop.eup %2583  ;;  %v323_v7 = vmul.f32 1.442695, %v233_v33  ;;  %2342 = vmatprep.subr.bf16.mxu0 %v2341_v38  ;;  %2406 = vmatprep.subr.bf16.mxu1 %v2405_v52  ;;  %v863_v33 = vld [vmem:[#allocation5 + $0x680] sm:$0xff]  ;;  %v2345_v30 = vpack.c.bf16 %v872_v32, %v864_v21  ;;  %v3926_v52 = vld [vmem:[#allocation15_spill] sm:$0xff]  ;;  %v881_v32 = vld [vmem:[#allocation5 + $0x710] sm:$0xff] }
  0xd7   :  { %v327_v2 = vmul.f32 1.442695, %v235_v55  ;;  %v329_v4 = vmul.f32 1.442695, %v236_v16  ;;  %409 = vadd.xlane.f32.xlu1 %v408_v35  ;;  %2601 = vpow2.f32 %v307_v31  ;;  %v3147_v10 = vpop.eup %2585  ;;  %v237_v39 = vsub.f32 %v3014_v44, %v3141_v42  ;;  %v887_v21 = vld [vmem:[#allocation5 + $0x740] sm:$0xff] }
  0xd8   :  { %v161_v51 = vpop.xlane.xlu0 %160  ;;  %v3151_v43 = vpop.eup %2587  ;;  %v325_v44 = vmul.f32 1.442695, %v234_v63  ;;  %v238_v16 = vsub.f32 %v3016_v45, %v3141_v42  ;;  %v2407_v45 = vpack.c.bf16 %v857_v3, %v849_v27  ;;  %v890_v27 = vld [vmem:[#allocation5 + $0x758] sm:$0xff]  ;;  %v879_v3 = vld [vmem:[#allocation5 + $0x700] sm:$0xff] }
  0xd9   :  { %2603 = vpow2.f32 %v327_v2  ;;  %v239_v24 = vsub.f32 %v3020_v47, %v161_v51  ;;  %v240_v29 = vsub.f32 %v3022_v48, %v161_v51  ;;  %v414_v47 = vadd.f32 %v3133_v20, %v3129_v9  ;;  %v847_v48 = vld [vmem:[#allocation5 + $0x600] sm:$0xff]  ;;  %v866_v51 = vld [vmem:[#allocation5 + $0x698] sm:$0xff] }
  0xda   :  { %2605 = vpow2.f32 %v329_v4  ;;  %v3169_v31 = vpop.xlane.xlu1 %163  ;;  %v2343_v18 = vpack.c.bf16 %v855_v11, %v847_v48  ;;  %2408 = vmatpush1.bf16.msra.mxu1 %v2407_v45  ;;  %v888_v48 = vld [vmem:[#allocation5 + $0x748] sm:$0xff] }
  0xdb   :  { %v3155_v0 = vpop.eup %2589  ;;  %v335_v1 = vmul.f32 1.442695, %v239_v24  ;;  %v337_v50 = vmul.f32 1.442695, %v240_v29  ;;  %412 = vadd.xlane.f32.xlu1 %v411_v41  ;;  %2607 = vpow2.f32 %v309_v49  ;;  %v417_v49 = vadd.f32 %v3143_v23, %v3137_v25 }
  0xdc   :  { %v3159_v57 = vpop.eup %2591  ;;  %v167_v26 = vpop.xlane.xlu0 %166  ;;  %2609 = vpow2.f32 %v315_v40  ;;  %v331_v41 = vmul.f32 1.442695, %v237_v39  ;;  %2344 = vmatpush1.bf16.msra.mxu0 %v2343_v18  ;;  %v874_v40 = vld [vmem:[#allocation5 + $0x6d8] sm:$0xff]  ;;  %v420_v24 = vadd.f32 %v3151_v43, %v3147_v10  ;;  %v333_v29 = vmul.f32 1.442695, %v238_v16  ;;  %v3927_v16 = vld [vmem:[#allocation19_spill] sm:$0xff] }
  0xdd   :  { %v3163_v35 = vpop.eup %2593  ;;  %2611 = vpow2.f32 %v335_v1  ;;  %v243_v5 = vsub.f32 %v3032_v53, %v167_v26  ;;  %v244_v36 = vsub.f32 %v3034_v54, %v167_v26  ;;  %v429_v14 = vadd.f32 %v3159_v57, %v3155_v0  ;;  %2346 = vmatprep.subr.bf16.mxu0 %v2345_v30 }
  0xde   :  { %v3171_v55 = vpop.eup %2595  ;;  %2613 = vpow2.f32 %v337_v50  ;;  %v3195_v50 = vpop.xlane.xlu1 %169 }
  0xdf   :  { %v3175_v28 = vpop.eup %2597  ;;  %v343_v53 = vmul.f32 1.442695, %v243_v5  ;;  %v345_v54 = vmul.f32 1.442695, %v244_v36  ;;  %415 = vadd.xlane.f32.xlu1 %v414_v47  ;;  %430 = vadd.xlane.f32.xlu0 %v429_v14  ;;  %2615 = vpow2.f32 %v317_v58  ;;  %v865_v58 = vld [vmem:[#allocation5 + $0x690] sm:$0xff]  ;;  %v3193_v1 = vadd.f32 %v3171_v55, %v3163_v35  ;;  %v880_v47 = vld [vmem:[#allocation5 + $0x708] sm:$0xff] }
  0xe0   :  { %v3179_v2 = vpop.eup %2599  ;;  %v173_v4 = vpop.xlane.xlu0 %172  ;;  %2617 = vpow2.f32 %v323_v7  ;;  %v3925_v7 = vld [vmem:[#allocation14_spill] sm:$0xff]  ;;  %v242_v5 = vsub.f32 %v3926_v52, %v3169_v31  ;;  %v2409_v36 = vpack.c.bf16 %v874_v40, %v866_v51  ;;  %v882_v14 = vld [vmem:[#allocation5 + $0x718] sm:$0xff] }
  0xe1   :  { %2619 = vpow2.f32 %v343_v53  ;;  %v247_v42 = vsub.f32 %v3044_v59, %v173_v4  ;;  %v248_v56 = vsub.f32 %v3046_v60, %v173_v4  ;;  %v435_v22 = vadd.f32 %v3179_v2, %v3175_v28  ;;  %v3185_v34 = vpop.eup %2601  ;;  %v873_v59 = vld [vmem:[#allocation5 + $0x6d0] sm:$0xff] }
  0xe2   :  { %2621 = vpow2.f32 %v345_v54  ;;  %v241_v39 = vsub.f32 %v3925_v7, %v3169_v31  ;;  %v3928_v53 = vld [vmem:[#allocation20_spill] sm:$0xff]  ;;  %2410 = vmatprep.subr.bf16.mxu1 %v2409_v36  ;;  %v2347_v31 = vpack.c.bf16 %v871_v37, %v863_v33  ;;  %v2411_v45 = vpack.c.bf16 %v873_v59, %v865_v58  ;;  %v3930_v7 = vld [vmem:[#allocation17_spill] sm:$0xff] }
  0xe3   :  { %v3189_v63 = vpop.eup %2603  ;;  %v351_v60 = vmul.f32 1.442695, %v247_v42  ;;  %v353_v38 = vmul.f32 1.442695, %v248_v56  ;;  %418 = vadd.xlane.f32.xlu1 %v417_v49  ;;  %436 = vadd.xlane.f32.xlu0 %v435_v22  ;;  %2623 = vpow2.f32 %v325_v44  ;;  %v889_v4 = vld [vmem:[#allocation5 + $0x750] sm:$0xff]  ;;  %v2349_v42 = vpack.c.bf16 %v888_v48, %v880_v47  ;;  %v896_v56 = vld [vmem:[#allocation5 + $0x788] sm:$0xff] }
  0xe4   :  { %v3197_v11 = vpop.eup %2605  ;;  %v179_v26 = vpop.xlane.xlu0 %178  ;;  %2625 = vpow2.f32 %v331_v41  ;;  %v904_v22 = vld [vmem:[#allocation5 + $0x7c8] sm:$0xff]  ;;  %v246_v52 = vsub.f32 %v3930_v7, %v3195_v50  ;;  %2348 = vmatpush1.bf16.msra.mxu0 %v2347_v31  ;;  %2412 = vmatpush1.bf16.msra.mxu1 %v2411_v45  ;;  %v2413_v37 = vpack.c.bf16 %v890_v27, %v882_v14  ;;  %v2351_v58 = vpack.c.bf16 %v887_v21, %v879_v3 }
  0xe5   :  { %v3203_v44 = vpop.eup %2607  ;;  %2627 = vpow2.f32 %v351_v60  ;;  %v251_v18 = vsub.f32 %v3927_v16, %v179_v26  ;;  %v252_v54 = vsub.f32 %v3928_v53, %v179_v26  ;;  %v441_v49 = vadd.f32 %v3197_v11, %v3189_v63  ;;  %v3929_v60 = vld [vmem:[#allocation16_spill] sm:$0xff]  ;;  %v898_v16 = vld [vmem:[#allocation5 + $0x798] sm:$0xff]  ;;  %2350 = vmatprep.subr.bf16.mxu0 %v2349_v42  ;;  %v903_v53 = vld [vmem:[#allocation5 + $0x7c0] sm:$0xff] }
  0xe6   :  { %v3209_v41 = vpop.eup %2609  ;;  %2629 = vpow2.f32 %v353_v38  ;;  %v245_v26 = vsub.f32 %v3929_v60, %v3195_v50  ;;  %v906_v38 = vld [vmem:[#allocation5 + $0x7d8] sm:$0xff]  ;;  %v2415_v59 = vpack.c.bf16 %v889_v4, %v881_v32  ;;  %v339_v50 = vmul.f32 1.442695, %v241_v39  ;;  %2414 = vmatprep.subr.bf16.mxu1 %v2413_v37  ;;  %v3931_v42 = vld [vmem:[#allocation18_spill] sm:$0xff] }
  0xe7   :  { %v3211_v51 = vpop.eup %2611  ;;  %v359_v40 = vmul.f32 1.442695, %v251_v18  ;;  %v361_v30 = vmul.f32 1.442695, %v252_v54  ;;  %421 = vadd.xlane.f32.xlu1 %v420_v24  ;;  %442 = vadd.xlane.f32.xlu0 %v441_v49  ;;  %2631 = vpow2.f32 %v333_v29  ;;  %v895_v24 = vld [vmem:[#allocation5 + $0x780] sm:$0xff]  ;;  %v176_v18 = vpop.xlane.xlu1 %175  ;;  %v897_v54 = vld [vmem:[#allocation5 + $0x790] sm:$0xff]  ;;  %v2353_v14 = vpack.c.bf16 %v904_v22, %v896_v56 }
  0xe8   :  { %v3217_v36 = vpop.eup %2613  ;;  %v3219_v33 = vpop.xlane.xlu0 %181  ;;  %v905_v29 = vld [vmem:[#allocation5 + $0x7d0] sm:$0xff]  ;;  %v341_v31 = vmul.f32 1.442695, %v242_v5  ;;  %v2417_v27 = vpack.c.bf16 %v906_v38, %v898_v16  ;;  %v426_v39 = vadd.f32 %v3203_v44, %v3185_v34  ;;  %v347_v21 = vmul.f32 1.442695, %v245_v26  ;;  %2352 = vmatpush1.bf16.msra.mxu0 %v2351_v58  ;;  %2416 = vmatpush1.bf16.msra.mxu1 %v2415_v59  ;;  %v3933_v60 = vld [vmem:[#allocation22_spill] sm:$0xff] }
  0xe9   :  { %v3221_v47 = vpop.eup %2615  ;;  %2633 = vpow2.f32 %v359_v40  ;;  %v447_v48 = vadd.f32 %v3217_v36, %v3211_v51  ;;  %v349_v45 = vmul.f32 1.442695, %v246_v52  ;;  %v249_v40 = vsub.f32 %v3931_v42, %v176_v18  ;;  %2354 = vmatprep.subr.bf16.mxu0 %v2353_v14  ;;  %v2749_v38 = vld [vmem:[#allocation2 + $0x158] sm:$0xff]  ;;  %v2750_v59 = vld [vmem:[#allocation2 + $0x170] sm:$0xff] }
  0xea   :  { %v3225_v49 = vpop.eup %2617  ;;  %2635 = vpow2.f32 %v361_v30  ;;  %v2355_v5 = vpack.c.bf16 %v903_v53, %v895_v24  ;;  %v2419_v56 = vpack.c.bf16 %v905_v29, %v897_v54  ;;  %v3932_v30 = vld [vmem:[#allocation21_spill] sm:$0xff]  ;;  %2418 = vmatprep.subr.bf16.mxu1 %v2417_v27  ;;  %v432_v52 = vadd.f32 %v3221_v47, %v3209_v41 }
  0xeb   :  { %v3227_v3 = vpop.eup %2619  ;;  %424 = vadd.xlane.f32.xlu1 %v3193_v1  ;;  %448 = vadd.xlane.f32.xlu0 %v447_v48  ;;  %2637 = vpow2.f32 %v339_v50  ;;  %v250_v37 = vsub.f32 %v2749_v38, %v176_v18  ;;  %v253_v24 = vsub.f32 %v2750_v59, %v3219_v33  ;;  %v2751_v54 = vld [vmem:[#allocation2 + $0x178] sm:$0xff]  ;;  %v355_v14 = vmul.f32 1.442695, %v249_v40 }
  0xec   :  { %v3232_v32 = vpop.eup %2621  ;;  %v185_v4 = vpop.xlane.xlu0 %184  ;;  %2639 = vpow2.f32 %v341_v31  ;;  %v254_v29 = vsub.f32 %v2751_v54, %v3219_v33  ;;  %2356 = vmatpush1.bf16.msra.mxu0 %v2355_v5  ;;  %2420 = vmatpush1.bf16.msra.mxu1 %v2419_v56  ;;  %v2752_v5 = vld [vmem:[#allocation2 + $0x190] sm:$0xff]  ;;  %v2755_v38 = vld [vmem:[#allocation2 + $0x198] sm:$0xff] }
  0xed   :  { %v3235_v22 = vpop.eup %2623  ;;  %v255_v1 = vsub.f32 %v3932_v30, %v185_v4  ;;  %v256_v7 = vsub.f32 %v3933_v60, %v185_v4  ;;  %v453_v26 = vadd.f32 %v3232_v32, %v3227_v3  ;;  %2641 = vpow2.f32 %v347_v21  ;;  %v2753_v30 = vld [vmem:[#allocation2 + $0x1a0] sm:$0xff]  ;;  %v2754_v60 = vld [vmem:[#allocation2 + $0x1a8] sm:$0xff] }
  0xee   :  { %v3241_v16 = vpop.eup %2625  ;;  %2643 = vpow2.f32 %v349_v45  ;;  %v363_v21 = vmul.f32 1.442695, %v253_v24  ;;  %v438_v33 = vadd.f32 %v3235_v22, %v3225_v49  ;;  %v365_v42 = vmul.f32 1.442695, %v254_v29 }
  0xef   :  { %v3245_v58 = vpop.eup %2627  ;;  %v367_v48 = vmul.f32 1.442695, %v255_v1  ;;  %v369_v50 = vmul.f32 1.442695, %v256_v7  ;;  %427 = vadd.xlane.f32.xlu1 %v426_v39  ;;  %454 = vadd.xlane.f32.xlu0 %v453_v26  ;;  %v357_v39 = vmul.f32 1.442695, %v250_v37 }
  0xf0   :  { %v3248_v53 = vpop.eup %2629  ;;  %v188_v31 = vpop.xlane.xlu0 %187 }
  0xf1   :  { %2645 = vpow2.f32 %v367_v48  ;;  %v459_v18 = vadd.f32 %v3248_v53, %v3245_v58  ;;  %v3253_v27 = vpop.eup %2631  ;;  %v257_v56 = vsub.f32 %v2752_v5, %v188_v31 }
  0xf2   :  { %2647 = vpow2.f32 %v369_v50  ;;  %v444_v48 = vadd.f32 %v3253_v27, %v3241_v16 }
  0xf3   :  { %v3255_v4 = vpop.eup %2633  ;;  %433 = vadd.xlane.f32.xlu1 %v432_v52  ;;  %460 = vadd.xlane.f32.xlu0 %v459_v18  ;;  %2649 = vpow2.f32 %v355_v14  ;;  %v258_v52 = vsub.f32 %v2755_v38, %v188_v31  ;;  %v371_v14 = vmul.f32 1.442695, %v257_v56  ;;  %v2756_v31 = vld [vmem:[#allocation2 + $0x1b0] sm:$0xff] }
  0xf4   :  { %v3259_v45 = vpop.eup %2635  ;;  %v191_v40 = vpop.xlane.xlu0 %190  ;;  %2651 = vpow2.f32 %v357_v39  ;;  %v2757_v39 = vld [vmem:[#allocation2 + $0x1b8] sm:$0xff] }
  0xf5   :  { %v259_v1 = vsub.f32 %v2753_v30, %v191_v40  ;;  %v260_v7 = vsub.f32 %v2754_v60, %v191_v40  ;;  %v465_v26 = vadd.f32 %v3259_v45, %v3255_v4  ;;  %v3263_v37 = vpop.eup %2637  ;;  %2653 = vpow2.f32 %v363_v21  ;;  %v668_v60 = vld [vmem:[#allocation5 + $0x68] sm:$0xff] }
  0xf6   :  { %3934 = vst [vmem:[#allocation14_spill] sm:$0xff] %v3263_v37  ;;  %v3267_v50 = vpop.eup %2639  ;;  %2655 = vpow2.f32 %v365_v42  ;;  %v373_v5 = vmul.f32 1.442695, %v258_v52 }
  0xf7   :  { %v375_v59 = vmul.f32 1.442695, %v259_v1  ;;  %v377_v24 = vmul.f32 1.442695, %v260_v7  ;;  %439 = vadd.xlane.f32.xlu1 %v438_v33  ;;  %466 = vadd.xlane.f32.xlu0 %v465_v26  ;;  %3935 = vst [vmem:[#allocation15_spill] sm:$0xff] %v3267_v50  ;;  %v3269_v29 = vpop.eup %2641  ;;  %v450_v42 = vadd.f32 %v3267_v50, %v3263_v37  ;;  %v660_v1 = vld [vmem:[#allocation5 + $0x28] sm:$0xff] }
  0xf8   :  { %v194_v54 = vpop.xlane.xlu0 %193  ;;  %3936 = vst [vmem:[#allocation19_spill] sm:$0xff] %v3269_v29  ;;  %v3271_v21 = vpop.eup %2643  ;;  %v2421_v38 = vpack.c.bf16 %v668_v60, %v660_v1 }
  0xf9   :  { %2657 = vpow2.f32 %v375_v59  ;;  %v261_v18 = vsub.f32 %v2756_v31, %v194_v54  ;;  %v262_v40 = vsub.f32 %v2757_v39, %v194_v54  ;;  %3937 = vst [vmem:[#allocation20_spill] sm:$0xff] %v3271_v21  ;;  %v662_v59 = vld [vmem:[#allocation5 + $0x38] sm:$0xff]  ;;  %v2758_v31 = vld [vmem:[#allocation2 + $0x1c0] sm:$0xff] }
  0xfa   :  { %2659 = vpow2.f32 %v377_v24  ;;  %v670_v54 = vld [vmem:[#allocation5 + $0x78] sm:$0xff]  ;;  %v2759_v24 = vld [vmem:[#allocation2 + $0x1c8] sm:$0xff]  ;;  %2422 = vmatprep.subr.bf16.mxu0 %v2421_v38 }
  0xfb   :  { %v3273_v33 = vpop.eup %2645  ;;  %v379_v30 = vmul.f32 1.442695, %v261_v18  ;;  %445 = vadd.xlane.f32.xlu1 %v444_v48  ;;  %v381_v56 = vmul.f32 1.442695, %v262_v40  ;;  %2661 = vpow2.f32 %v371_v14  ;;  %v2485_v50 = vpack.c.bf16 %v670_v54, %v662_v59  ;;  %v2761_v38 = vld [vmem:[#allocation2 + $0x1d8] sm:$0xff] }
  0xfc   :  { %3938 = vst [vmem:[#allocation16_spill] sm:$0xff] %v3273_v33  ;;  %v3277_v7 = vpop.eup %2647  ;;  %v197_v26 = vpop.xlane.xlu0 %196  ;;  %2663 = vpow2.f32 %v373_v5  ;;  %v456_v14 = vadd.f32 %v3271_v21, %v3269_v29  ;;  %v692_v21 = vld [vmem:[#allocation5 + $0x128] sm:$0xff] }
  0xfd   :  { %3939 = vst [vmem:[#allocation17_spill] sm:$0xff] %v3277_v7  ;;  %v263_v52 = vsub.f32 %v2758_v31, %v197_v26  ;;  %v264_v39 = vsub.f32 %v2759_v24, %v197_v26  ;;  %v471_v48 = vadd.f32 %v3277_v7, %v3273_v33  ;;  %v3281_v18 = vpop.eup %2649  ;;  %2665 = vpow2.f32 %v379_v30  ;;  %2486 = vmatprep.subr.bf16.mxu1 %v2485_v50  ;;  %v2760_v31 = vld [vmem:[#allocation2 + $0x1d0] sm:$0xff]  ;;  %v700_v29 = vld [vmem:[#allocation5 + $0x168] sm:$0xff]  ;;  %v694_v7 = vld [vmem:[#allocation5 + $0x138] sm:$0xff] }
  0xfe   :  { %3940 = vst [vmem:[#allocation18_spill] sm:$0xff] %v3281_v18  ;;  %v3285_v1 = vpop.eup %2651  ;;  %2667 = vpow2.f32 %v381_v56 }
  0xff   :  { %v383_v37 = vmul.f32 1.442695, %v263_v52  ;;  %v385_v40 = vmul.f32 1.442695, %v264_v39  ;;  %451 = vadd.xlane.f32.xlu1 %v450_v42  ;;  %472 = vadd.xlane.f32.xlu0 %v471_v48  ;;  %3941 = vst [vmem:[#allocation21_spill] sm:$0xff] %v3285_v1  ;;  %v3287_v26 = vpop.eup %2653  ;;  %v462_v56 = vadd.f32 %v3285_v1, %v3281_v18  ;;  %v2763_v48 = vld [vmem:[#allocation2 + $0x1e8] sm:$0xff] }
 0x100   :  { %v200_v60 = vpop.xlane.xlu0 %199  ;;  %3942 = vst [vmem:[#allocation22_spill] sm:$0xff] %v3287_v26  ;;  %v3289_v30 = vpop.eup %2655  ;;  %v685_v18 = vld [vmem:[#allocation5 + $0xf0] sm:$0xff] }
 0x101   :  { %2669 = vpow2.f32 %v383_v37  ;;  %v265_v5 = vsub.f32 %v2760_v31, %v200_v60  ;;  %v266_v59 = vsub.f32 %v2761_v38, %v200_v60  ;;  %3943 = vst [vmem:[#allocation23_spill] sm:$0xff] %v3289_v30  ;;  %v2762_v37 = vld [vmem:[#allocation2 + $0x1e0] sm:$0xff] }
 0x102   :  { %2671 = vpow2.f32 %v385_v40 }
 0x103   :  { %v3291_v42 = vpop.eup %2657  ;;  %v387_v54 = vmul.f32 1.442695, %v265_v5  ;;  %v389_v52 = vmul.f32 1.442695, %v266_v59  ;;  %457 = vadd.xlane.f32.xlu1 %v456_v14  ;;  %v468_v14 = vadd.f32 %v3289_v30, %v3287_v26 }
 0x104   :  { %3944 = vst [vmem:[#allocation24_spill] sm:$0xff] %v3291_v42  ;;  %v3295_v24 = vpop.eup %2659  ;;  %v203_v50 = vpop.xlane.xlu0 %202 }
 0x105   :  { %3945 = vst [vmem:[#allocation25_spill] sm:$0xff] %v3295_v24  ;;  %2673 = vpow2.f32 %v387_v54  ;;  %v267_v39 = vsub.f32 %v2762_v37, %v203_v50  ;;  %v268_v31 = vsub.f32 %v2763_v48, %v203_v50  ;;  %v477_v60 = vadd.f32 %v3295_v24, %v3291_v42  ;;  %v3299_v40 = vpop.eup %2661  ;;  %v2764_v50 = vld [vmem:[#allocation2 + $0x1f0] sm:$0xff]  ;;  %v2765_v48 = vld [vmem:[#allocation2 + $0x1f8] sm:$0xff] }
 0x106   :  { %2675 = vpow2.f32 %v389_v52  ;;  %3946 = vst [vmem:[#allocation26_spill] sm:$0xff] %v3299_v40  ;;  %v3303_v59 = vpop.eup %2663 }
 0x107   :  { %v391_v5 = vmul.f32 1.442695, %v267_v39  ;;  %v393_v38 = vmul.f32 1.442695, %v268_v31  ;;  %463 = vadd.xlane.f32.xlu1 %v462_v56  ;;  %478 = vadd.xlane.f32.xlu0 %v477_v60  ;;  %3947 = vst [vmem:[#allocation27_spill] sm:$0xff] %v3303_v59  ;;  %v3305_v1 = vpop.eup %2665  ;;  %v474_v60 = vadd.f32 %v3303_v59, %v3299_v40  ;;  %v675_v40 = vld [vmem:[#allocation5 + $0xa0] sm:$0xff] }
 0x108   :  { %v206_v54 = vpop.xlane.xlu0 %205  ;;  %3948 = vst [vmem:[#allocation28_spill] sm:$0xff] %v3305_v1  ;;  %v3307_v52 = vpop.eup %2667 }
 0x109   :  { %2677 = vpow2.f32 %v391_v5  ;;  %v269_v37 = vsub.f32 %v2764_v50, %v206_v54  ;;  %v270_v24 = vsub.f32 %v2765_v48, %v206_v54  ;;  %3949 = vst [vmem:[#allocation29_spill] sm:$0xff] %v3307_v52 }
 0x10a   :  { %2679 = vpow2.f32 %v393_v38  ;;  %v480_v38 = vadd.f32 %v3307_v52, %v3305_v1  ;;  %v667_v52 = vld [vmem:[#allocation5 + $0x60] sm:$0xff]  ;;  %v661_v1 = vld [vmem:[#allocation5 + $0x30] sm:$0xff] }
 0x10b   :  { %v3309_v39 = vpop.eup %2669  ;;  %v395_v56 = vmul.f32 1.442695, %v269_v37  ;;  %v397_v31 = vmul.f32 1.442695, %v270_v24  ;;  %469 = vadd.xlane.f32.xlu1 %v468_v14 }
 0x10c   :  { %3950 = vst [vmem:[#allocation30_spill] sm:$0xff] %v3309_v39  ;;  %v3313_v30 = vpop.eup %2671 }
 0x10d   :  { %3951 = vst [vmem:[#allocation31_spill] sm:$0xff] %v3313_v30  ;;  %2681 = vpow2.f32 %v395_v56  ;;  %v483_v5 = vadd.f32 %v3313_v30, %v3309_v39  ;;  %v684_v30 = vld [vmem:[#allocation5 + $0xe8] sm:$0xff] }
 0x10e   :  { %2683 = vpow2.f32 %v397_v31 }
 0x10f   :  { %v3317_v50 = vpop.eup %2673  ;;  %475 = vadd.xlane.f32.xlu1 %v474_v60  ;;  %484 = vadd.xlane.f32.xlu0 %v483_v5 }
 0x110   :  { %3952 = vst [vmem:[#allocation32_spill] sm:$0xff] %v3317_v50  ;;  %v3321_v54 = vpop.eup %2675 }
 0x111   :  { %3953 = vst [vmem:[#allocation33_spill] sm:$0xff] %v3321_v54  ;;  %v486_v14 = vadd.f32 %v3321_v54, %v3317_v50  ;;  %v659_v50 = vld [vmem:[#allocation5 + $0x20] sm:$0xff] }
 0x113   :  { %v3323_v24 = vpop.eup %2677  ;;  %481 = vadd.xlane.f32.xlu1 %v480_v38 }
 0x114   :  { %3954 = vst [vmem:[#allocation34_spill] sm:$0xff] %v3323_v24  ;;  %v3327_v37 = vpop.eup %2679 }
 0x115   :  { %3955 = vst [vmem:[#allocation35_spill] sm:$0xff] %v3327_v37  ;;  %v489_v48 = vadd.f32 %v3327_v37, %v3323_v24  ;;  %v669_v37 = vld [vmem:[#allocation5 + $0x70] sm:$0xff]  ;;  %v676_v24 = vld [vmem:[#allocation5 + $0xa8] sm:$0xff] }
 0x116   :  { %v2425_v26 = vpack.c.bf16 %v684_v30, %v676_v24  ;;  %v699_v24 = vld [vmem:[#allocation5 + $0x160] sm:$0xff] }
 0x117   :  { %v3331_v56 = vpop.eup %2681  ;;  %487 = vadd.xlane.f32.xlu1 %v486_v14  ;;  %490 = vadd.xlane.f32.xlu0 %v489_v48  ;;  %v678_v14 = vld [vmem:[#allocation5 + $0xb8] sm:$0xff] }
 0x118   :  { %3956 = vst [vmem:[#allocation36_spill] sm:$0xff] %v3331_v56  ;;  %v3333_v31 = vpop.eup %2683  ;;  %v686_v48 = vld [vmem:[#allocation5 + $0xf8] sm:$0xff] }
 0x119   :  { %3957 = vst [vmem:[#allocation37_spill] sm:$0xff] %v3333_v31  ;;  %v492_v60 = vadd.f32 %v3333_v31, %v3331_v56  ;;  %v2423_v56 = vpack.c.bf16 %v667_v52, %v659_v50  ;;  %v2489_v42 = vpack.c.bf16 %v686_v48, %v678_v14  ;;  %v691_v50 = vld [vmem:[#allocation5 + $0x120] sm:$0xff]  ;;  %v693_v14 = vld [vmem:[#allocation5 + $0x130] sm:$0xff] }
 0x11a   :  { %v701_v48 = vld [vmem:[#allocation5 + $0x170] sm:$0xff] }
 0x11b   :  { %493 = vadd.xlane.f32.xlu1 %v492_v60 }
 0x158   :  { %v401_v5 = vpop.xlane.xlu1 %400 }
 0x159   :  { %2685 = vrcp.f32 %v401_v5  ;;  %v2487_v5 = vpack.c.bf16 %v669_v37, %v661_v1  ;;  %v2429_v37 = vpack.c.bf16 %v700_v29, %v692_v21 }
 0x15c   :  { %v404_v38 = vpop.xlane.xlu1 %403 }
 0x15d   :  { %2687 = vrcp.f32 %v404_v38  ;;  %v683_v38 = vld [vmem:[#allocation5 + $0xe0] sm:$0xff] }
 0x160   :  { %v407_v54 = vpop.xlane.xlu1 %406 }
 0x161   :  { %2689 = vrcp.f32 %v407_v54  ;;  %v677_v54 = vld [vmem:[#allocation5 + $0xb0] sm:$0xff] }
 0x163   :  { %v2686_v39 = vpop.eup %2685 }
 0x164   :  { %v496_v59 = vmul.f32 %v2686_v39, %v3081_v6  ;;  %v497_v31 = vmul.f32 %v2686_v39, %v3084_v15  ;;  %v410_v60 = vpop.xlane.xlu1 %409  ;;  %v702_v6 = vld [vmem:[#allocation5 + $0x178] sm:$0xff]  ;;  %v2427_v15 = vpack.c.bf16 %v683_v38, %v675_v40  ;;  %v2491_v39 = vpack.c.bf16 %v685_v18, %v677_v54  ;;  %v709_v54 = vld [vmem:[#allocation5 + $0x1b0] sm:$0xff] }
 0x165   :  { %2691 = vrcp.f32 %v410_v60  ;;  %v708_v60 = vld [vmem:[#allocation5 + $0x1a8] sm:$0xff]  ;;  %v2431_v18 = vpack.c.bf16 %v699_v24, %v691_v50 }
 0x166   :  { %591 = vst [vmem:[#allocation8] sm:$0xff] %v496_v59  ;;  %592 = vst [vmem:[#allocation8 + $0x8] sm:$0xff] %v497_v31  ;;  %1039 = vmatprep.mubr.f32.mxu0 %v497_v31  ;;  %1296 = vmatprep.mubr.f32.mxu1 %v497_v31  ;;  %v2493_v31 = vpack.c.bf16 %v702_v6, %v694_v7  ;;  %v2495_v7 = vpack.c.bf16 %v701_v48, %v693_v14  ;;  %v717_v6 = vld [vmem:[#allocation5 + $0x1f0] sm:$0xff]  ;;  %v723_v14 = vld [vmem:[#allocation5 + $0x220] sm:$0xff] }
 0x167   :  { %v2688_v33 = vpop.eup %2687  ;;  %1040 = vmatmul.mubr.f32.vlgmr.msra.gmra.mrb[0].mxu0 %v496_v59  ;;  %1297 = vmatmul.mubr.f32.vlgmr.msra.gmra.mrb[0].mxu1 %v496_v59  ;;  %v731_v48 = vld [vmem:[#allocation5 + $0x260] sm:$0xff] }
 0x168   :  { %v499_v1 = vmul.f32 %v2688_v33, %v3096_v61  ;;  %v500_v52 = vmul.f32 %v2688_v33, %v3098_v19  ;;  %v413_v30 = vpop.xlane.xlu1 %412  ;;  %2424 = vmatpush1.bf16.msra.mxu0 %v2423_v56  ;;  %2488 = vmatpush1.bf16.msra.mxu1 %v2487_v5  ;;  %v716_v61 = vld [vmem:[#allocation5 + $0x1e8] sm:$0xff]  ;;  %v710_v19 = vld [vmem:[#allocation5 + $0x1b8] sm:$0xff]  ;;  %v715_v56 = vld [vmem:[#allocation5 + $0x1e0] sm:$0xff] }
 0x169   :  { %2693 = vrcp.f32 %v413_v30  ;;  %2426 = vmatprep.subr.bf16.mxu0 %v2425_v26  ;;  %2490 = vmatprep.subr.bf16.mxu1 %v2489_v42  ;;  %v718_v33 = vld [vmem:[#allocation5 + $0x1f8] sm:$0xff]  ;;  %v707_v42 = vld [vmem:[#allocation5 + $0x1a0] sm:$0xff]  ;;  %v2433_v5 = vpack.c.bf16 %v716_v61, %v708_v60 }
 0x16a   :  { %593 = vst [vmem:[#allocation8 + $0x10] sm:$0xff] %v499_v1  ;;  %594 = vst [vmem:[#allocation8 + $0x18] sm:$0xff] %v500_v52  ;;  %1045 = vmatprep.mubr.f32.mxu0 %v500_v52  ;;  %1302 = vmatprep.mubr.f32.mxu1 %v500_v52  ;;  %v2497_v38 = vpack.c.bf16 %v718_v33, %v710_v19  ;;  %v2435_v30 = vpack.c.bf16 %v715_v56, %v707_v42  ;;  %v725_v19 = vld [vmem:[#allocation5 + $0x230] sm:$0xff] }
 0x16b   :  { %v2690_v40 = vpop.eup %2689  ;;  %1046 = vmatmul.mubr.f32.gmra.mrb[2].mxu0 %v499_v1  ;;  %1303 = vmatmul.mubr.f32.gmra.mrb[2].mxu1 %v499_v1  ;;  %v724_v1 = vld [vmem:[#allocation5 + $0x228] sm:$0xff]  ;;  %v733_v33 = vld [vmem:[#allocation5 + $0x270] sm:$0xff] }
 0x16c   :  { %v502_v59 = vmul.f32 %v2690_v40, %v3087_v17  ;;  %v503_v26 = vmul.f32 %v2690_v40, %v3093_v13  ;;  %v416_v29 = vpop.xlane.xlu1 %415  ;;  %v431_v21 = vpop.xlane.xlu0 %430  ;;  %2428 = vmatpush1.bf16.msra.mxu0 %v2427_v15  ;;  %2492 = vmatpush1.bf16.msra.mxu1 %v2491_v39  ;;  %v732_v17 = vld [vmem:[#allocation5 + $0x268] sm:$0xff]  ;;  %v726_v13 = vld [vmem:[#allocation5 + $0x238] sm:$0xff] }
 0x16d   :  { %2695 = vrcp.f32 %v416_v29  ;;  %2430 = vmatprep.subr.bf16.mxu0 %v2429_v37  ;;  %2494 = vmatprep.subr.bf16.mxu1 %v2493_v31  ;;  %v734_v15 = vld [vmem:[#allocation5 + $0x278] sm:$0xff]  ;;  %v2499_v31 = vpack.c.bf16 %v717_v6, %v709_v54  ;;  %v2437_v60 = vpack.c.bf16 %v732_v17, %v724_v1  ;;  %v740_v40 = vld [vmem:[#allocation5 + $0x2a8] sm:$0xff]  ;;  %v3355_v29 = vld [vmem:[#allocation5 + $0x2a0] sm:$0xff] }
 0x16e   :  { %595 = vst [vmem:[#allocation8 + $0x20] sm:$0xff] %v502_v59  ;;  %596 = vst [vmem:[#allocation8 + $0x28] sm:$0xff] %v503_v26  ;;  %2697 = vrcp.f32 %v431_v21  ;;  %1051 = vmatprep.mubr.f32.mxu0 %v503_v26  ;;  %1308 = vmatprep.mubr.f32.mxu1 %v503_v26  ;;  %v2501_v61 = vpack.c.bf16 %v734_v15, %v726_v13  ;;  %v2439_v26 = vpack.c.bf16 %v731_v48, %v723_v14  ;;  %v741_v54 = vld [vmem:[#allocation5 + $0x2b0] sm:$0xff]  ;;  %v3363_v13 = vld [vmem:[#allocation5 + $0x328] sm:$0xff] }
 0x16f   :  { %v2692_v52 = vpop.eup %2691  ;;  %1052 = vmatmul.mubr.f32.gmra.mrb[4].mxu0 %v502_v59  ;;  %1309 = vmatmul.mubr.f32.gmra.mrb[4].mxu1 %v502_v59  ;;  %v749_v6 = vld [vmem:[#allocation5 + $0x2f0] sm:$0xff]  ;;  %v766_v15 = vld [vmem:[#allocation5 + $0x378] sm:$0xff] }
 0x170   :  { %v3344_v39 = vmul.f32 %v2692_v52, %v3107_v8  ;;  %v3347_v50 = vmul.f32 %v2692_v52, %v3111_v62  ;;  %v419_v24 = vpop.xlane.xlu1 %418  ;;  %v437_v37 = vpop.xlane.xlu0 %436  ;;  %2432 = vmatpush1.bf16.msra.mxu0 %v2431_v18  ;;  %2496 = vmatpush1.bf16.msra.mxu1 %v2495_v7  ;;  %v748_v8 = vld [vmem:[#allocation5 + $0x2e8] sm:$0xff]  ;;  %v742_v62 = vld [vmem:[#allocation5 + $0x2b8] sm:$0xff] }
 0x171   :  { %2699 = vrcp.f32 %v419_v24  ;;  %2434 = vmatprep.subr.bf16.mxu0 %v2433_v5  ;;  %2498 = vmatprep.subr.bf16.mxu1 %v2497_v38  ;;  %v750_v18 = vld [vmem:[#allocation5 + $0x2f8] sm:$0xff]  ;;  %v2503_v5 = vpack.c.bf16 %v733_v33, %v725_v19  ;;  %v747_v38 = vld [vmem:[#allocation5 + $0x2e0] sm:$0xff]  ;;  %v2441_v1 = vpack.c.bf16 %v748_v8, %v740_v40  ;;  %v2507_v24 = vpack.c.bf16 %v749_v6, %v741_v54  ;;  %v3383_v40 = vld [vmem:[#allocation5 + $0x330] sm:$0xff] }
 0x172   :  { %597 = vst [vmem:[#allocation8 + $0x30] sm:$0xff] %v3344_v39  ;;  %598 = vst [vmem:[#allocation8 + $0x38] sm:$0xff] %v3347_v50  ;;  %2701 = vrcp.f32 %v437_v37  ;;  %1057 = vmatprep.mubr.f32.mxu0 %v3347_v50  ;;  %1314 = vmatprep.mubr.f32.mxu1 %v3347_v50  ;;  %v2505_v17 = vpack.c.bf16 %v750_v18, %v742_v62  ;;  %v3372_v37 = vld [vmem:[#allocation5 + $0x320] sm:$0xff]  ;;  %v3385_v8 = vld [vmem:[#allocation5 + $0x370] sm:$0xff] }
 0x173   :  { %v2694_v59 = vpop.eup %2693  ;;  %1058 = vmatmul.mubr.f32.gmra.mrb[6].mxu0 %v3344_v39  ;;  %1315 = vmatmul.mubr.f32.gmra.mrb[6].mxu1 %v3344_v39  ;;  %v3381_v33 = vld [vmem:[#allocation5 + $0x360] sm:$0xff]  ;;  %v3393_v18 = vld [vmem:[#allocation5 + $0x3a8] sm:$0xff] }
 0x174   :  { %v3358_v21 = vmul.f32 %v2694_v59, %v3121_v46  ;;  %v3361_v7 = vmul.f32 %v2694_v59, %v3125_v12  ;;  %v422_v42 = vpop.xlane.xlu1 %421  ;;  %v443_v56 = vpop.xlane.xlu0 %442  ;;  %2436 = vmatpush1.bf16.msra.mxu0 %v2435_v30  ;;  %2500 = vmatpush1.bf16.msra.mxu1 %v2499_v31  ;;  %v764_v46 = vld [vmem:[#allocation5 + $0x368] sm:$0xff]  ;;  %v758_v12 = vld [vmem:[#allocation5 + $0x338] sm:$0xff]  ;;  %v2443_v30 = vpack.c.bf16 %v747_v38, %v3355_v29 }
 0x175   :  { %2703 = vrcp.f32 %v422_v42  ;;  %2438 = vmatprep.subr.bf16.mxu0 %v2437_v60  ;;  %2502 = vmatprep.subr.bf16.mxu1 %v2501_v61  ;;  %v2445_v19 = vpack.c.bf16 %v764_v46, %v3363_v13  ;;  %v3395_v59 = vld [vmem:[#allocation5 + $0x3e8] sm:$0xff]  ;;  %v2447_v29 = vpack.c.bf16 %v3381_v33, %v3372_v37  ;;  %v2511_v42 = vpack.c.bf16 %v3385_v8, %v3383_v40  ;;  %v3419_v13 = vld [vmem:[#allocation5 + $0x3e0] sm:$0xff]  ;;  %v3421_v46 = vld [vmem:[#allocation5 + $0x3b0] sm:$0xff] }
 0x176   :  { %599 = vst [vmem:[#allocation8 + $0x40] sm:$0xff] %v3358_v21  ;;  %600 = vst [vmem:[#allocation8 + $0x48] sm:$0xff] %v3361_v7  ;;  %2705 = vrcp.f32 %v443_v56  ;;  %1063 = vmatprep.mubr.f32.mxu0 %v3361_v7  ;;  %1320 = vmatprep.mubr.f32.mxu1 %v3361_v7  ;;  %v3409_v56 = vld [vmem:[#allocation5 + $0x3a0] sm:$0xff] }
 0x177   :  { %v2696_v52 = vpop.eup %2695  ;;  %1064 = vmatmul.mubr.f32.gmra.mrb[8].mxu0 %v3358_v21  ;;  %1321 = vmatmul.mubr.f32.gmra.mrb[8].mxu1 %v3358_v21 }
 0x178   :  { %v2698_v31 = vpop.eup %2697  ;;  %v3375_v14 = vmul.f32 %v2696_v52, %v3129_v9  ;;  %v3378_v48 = vmul.f32 %v2696_v52, %v3133_v20  ;;  %v425_v60 = vpop.xlane.xlu1 %424  ;;  %2440 = vmatpush1.bf16.msra.mxu0 %v2439_v26  ;;  %2504 = vmatpush1.bf16.msra.mxu1 %v2503_v5  ;;  %v2509_v20 = vpack.c.bf16 %v766_v15, %v758_v12  ;;  %v3423_v12 = vld [vmem:[#allocation5 + $0x3f0] sm:$0xff]  ;;  %v788_v52 = vld [vmem:[#allocation5 + $0x428] sm:$0xff] }
 0x179   :  { %v449_v61 = vpop.xlane.xlu0 %448  ;;  %v3388_v62 = vmul.f32 %v2698_v31, %v3155_v0  ;;  %v3391_v9 = vmul.f32 %v2698_v31, %v3159_v57  ;;  %2707 = vrcp.f32 %v425_v60  ;;  %2442 = vmatprep.subr.bf16.mxu0 %v2441_v1  ;;  %2506 = vmatprep.subr.bf16.mxu1 %v2505_v17  ;;  %v774_v0 = vld [vmem:[#allocation5 + $0x3b8] sm:$0xff]  ;;  %v2449_v17 = vpack.c.bf16 %v3395_v59, %v3393_v18  ;;  %v3443_v60 = vld [vmem:[#allocation5 + $0x420] sm:$0xff]  ;;  %v789_v59 = vld [vmem:[#allocation5 + $0x430] sm:$0xff] }
 0x17a   :  { %601 = vst [vmem:[#allocation8 + $0x50] sm:$0xff] %v3375_v14  ;;  %602 = vst [vmem:[#allocation8 + $0x58] sm:$0xff] %v3378_v48  ;;  %2709 = vrcp.f32 %v449_v61  ;;  %1069 = vmatprep.mubr.f32.mxu0 %v3378_v48  ;;  %1326 = vmatprep.mubr.f32.mxu1 %v3378_v48  ;;  %v782_v57 = vld [vmem:[#allocation5 + $0x3f8] sm:$0xff]  ;;  %v2515_v31 = vpack.c.bf16 %v3423_v12, %v3421_v46  ;;  %v795_v18 = vld [vmem:[#allocation5 + $0x460] sm:$0xff] }
 0x17b   :  { %v2700_v26 = vpop.eup %2699  ;;  %611 = vst [vmem:[#allocation8 + $0xa0] sm:$0xff] %v3388_v62  ;;  %612 = vst [vmem:[#allocation8 + $0xa8] sm:$0xff] %v3391_v9  ;;  %1070 = vmatmul.mubr.f32.gmra.mrb[10].mxu0 %v3375_v14  ;;  %1327 = vmatmul.mubr.f32.gmra.mrb[10].mxu1 %v3375_v14 }
 0x17c   :  { %v2702_v5 = vpop.eup %2701  ;;  %v3412_v38 = vmul.f32 %v2700_v26, %v3137_v25  ;;  %v3415_v54 = vmul.f32 %v2700_v26, %v3143_v23  ;;  %v428_v6 = vpop.xlane.xlu1 %427  ;;  %2444 = vmatpush1.bf16.msra.mxu0 %v2443_v30  ;;  %2508 = vmatpush1.bf16.msra.mxu1 %v2507_v24  ;;  %v2513_v23 = vpack.c.bf16 %v782_v57, %v774_v0  ;;  %v796_v30 = vld [vmem:[#allocation5 + $0x468] sm:$0xff]  ;;  %v798_v24 = vld [vmem:[#allocation5 + $0x478] sm:$0xff]  ;;  %v797_v0 = vld [vmem:[#allocation5 + $0x470] sm:$0xff] }
 0x17d   :  { %v455_v1 = vpop.xlane.xlu0 %454  ;;  %v3426_v15 = vmul.f32 %v2702_v5, %v3175_v28  ;;  %v3429_v25 = vmul.f32 %v2702_v5, %v3179_v2  ;;  %2711 = vrcp.f32 %v428_v6  ;;  %2446 = vmatprep.subr.bf16.mxu0 %v2445_v19  ;;  %2510 = vmatprep.subr.bf16.mxu1 %v2509_v20  ;;  %v790_v28 = vld [vmem:[#allocation5 + $0x438] sm:$0xff]  ;;  %v2451_v2 = vpack.c.bf16 %v3419_v13, %v3409_v56  ;;  %v812_v56 = vld [vmem:[#allocation5 + $0x4e8] sm:$0xff] }
 0x17e   :  { %603 = vst [vmem:[#allocation8 + $0x60] sm:$0xff] %v3412_v38  ;;  %604 = vst [vmem:[#allocation8 + $0x68] sm:$0xff] %v3415_v54  ;;  %2713 = vrcp.f32 %v455_v1  ;;  %1075 = vmatprep.mubr.f32.mxu0 %v3415_v54  ;;  %1332 = vmatprep.mubr.f32.mxu1 %v3415_v54  ;;  %v2453_v20 = vpack.c.bf16 %v796_v30, %v788_v52  ;;  %v2519_v5 = vpack.c.bf16 %v797_v0, %v789_v59 }
 0x17f   :  { %v2704_v37 = vpop.eup %2703  ;;  %615 = vst [vmem:[#allocation8 + $0xc0] sm:$0xff] %v3426_v15  ;;  %616 = vst [vmem:[#allocation8 + $0xc8] sm:$0xff] %v3429_v25  ;;  %1076 = vmatmul.mubr.f32.gmra.mrb[12].mxu0 %v3412_v38  ;;  %1333 = vmatmul.mubr.f32.gmra.mrb[12].mxu1 %v3412_v38 }
 0x180   :  { %v2706_v61 = vpop.eup %2705  ;;  %v3446_v19 = vmul.f32 %v2704_v37, %v3147_v10  ;;  %v3449_v33 = vmul.f32 %v2704_v37, %v3151_v43  ;;  %v434_v40 = vpop.xlane.xlu1 %433  ;;  %2448 = vmatpush1.bf16.msra.mxu0 %v2447_v29  ;;  %2512 = vmatpush1.bf16.msra.mxu1 %v2511_v42  ;;  %v2517_v10 = vpack.c.bf16 %v798_v24, %v790_v28  ;;  %v804_v43 = vld [vmem:[#allocation5 + $0x4a8] sm:$0xff]  ;;  %v814_v29 = vld [vmem:[#allocation5 + $0x4f8] sm:$0xff]  ;;  %v811_v28 = vld [vmem:[#allocation5 + $0x4e0] sm:$0xff] }
 0x181   :  { %v461_v8 = vpop.xlane.xlu0 %460  ;;  %v3452_v57 = vmul.f32 %v2706_v61, %v3189_v63  ;;  %v3455_v26 = vmul.f32 %v2706_v61, %v3197_v11  ;;  %2715 = vrcp.f32 %v434_v40  ;;  %2450 = vmatprep.subr.bf16.mxu0 %v2449_v17  ;;  %2514 = vmatprep.subr.bf16.mxu1 %v2513_v23  ;;  %v806_v63 = vld [vmem:[#allocation5 + $0x4b8] sm:$0xff]  ;;  %v2455_v11 = vpack.c.bf16 %v795_v18, %v3443_v60  ;;  %v820_v24 = vld [vmem:[#allocation5 + $0x528] sm:$0xff] }
 0x182   :  { %605 = vst [vmem:[#allocation8 + $0x70] sm:$0xff] %v3446_v19  ;;  %606 = vst [vmem:[#allocation8 + $0x78] sm:$0xff] %v3449_v33  ;;  %2717 = vrcp.f32 %v461_v8  ;;  %1081 = vmatprep.mubr.f32.mxu0 %v3449_v33  ;;  %1338 = vmatprep.mubr.f32.mxu1 %v3449_v33  ;;  %v2457_v12 = vpack.c.bf16 %v812_v56, %v804_v43  ;;  %v2521_v30 = vpack.c.bf16 %v814_v29, %v806_v63  ;;  %v828_v37 = vld [vmem:[#allocation5 + $0x568] sm:$0xff]  ;;  %v821_v43 = vld [vmem:[#allocation5 + $0x530] sm:$0xff] }
 0x183   :  { %v2708_v42 = vpop.eup %2707  ;;  %619 = vst [vmem:[#allocation8 + $0xe0] sm:$0xff] %v3452_v57  ;;  %620 = vst [vmem:[#allocation8 + $0xe8] sm:$0xff] %v3455_v26  ;;  %1082 = vmatmul.mubr.f32.gmra.mrb[14].mxu0 %v3446_v19  ;;  %1339 = vmatmul.mubr.f32.gmra.mrb[14].mxu1 %v3446_v19  ;;  %v836_v56 = vld [vmem:[#allocation5 + $0x5a8] sm:$0xff] }
 0x184   :  { %v2710_v6 = vpop.eup %2709  ;;  %v3467_v1 = vmul.f32 %v2708_v42, %v3163_v35  ;;  %v3470_v17 = vmul.f32 %v2708_v42, %v3171_v55  ;;  %v440_v13 = vpop.xlane.xlu1 %439  ;;  %2452 = vmatpush1.bf16.msra.mxu0 %v2451_v2  ;;  %2516 = vmatpush1.bf16.msra.mxu1 %v2515_v31  ;;  %v803_v35 = vld [vmem:[#allocation5 + $0x4a0] sm:$0xff]  ;;  %v805_v55 = vld [vmem:[#allocation5 + $0x4b0] sm:$0xff]  ;;  %v822_v2 = vld [vmem:[#allocation5 + $0x538] sm:$0xff] }
 0x185   :  { %v467_v46 = vpop.xlane.xlu0 %466  ;;  %v3473_v23 = vmul.f32 %v2710_v6, %v3211_v51  ;;  %v3476_v52 = vmul.f32 %v2710_v6, %v3217_v36  ;;  %2719 = vrcp.f32 %v440_v13  ;;  %2454 = vmatprep.subr.bf16.mxu0 %v2453_v20  ;;  %2518 = vmatprep.subr.bf16.mxu1 %v2517_v10  ;;  %v813_v51 = vld [vmem:[#allocation5 + $0x4f0] sm:$0xff]  ;;  %v830_v31 = vld [vmem:[#allocation5 + $0x578] sm:$0xff]  ;;  %v2459_v20 = vpack.c.bf16 %v811_v28, %v803_v35  ;;  %v3498_v10 = vld [vmem:[#allocation5 + $0x520] sm:$0xff] }
 0x186   :  { %607 = vst [vmem:[#allocation8 + $0x80] sm:$0xff] %v3467_v1  ;;  %608 = vst [vmem:[#allocation8 + $0x88] sm:$0xff] %v3470_v17  ;;  %2721 = vrcp.f32 %v467_v46  ;;  %1087 = vmatprep.mubr.f32.mxu0 %v3470_v17  ;;  %1344 = vmatprep.mubr.f32.mxu1 %v3470_v17  ;;  %v2523_v0 = vpack.c.bf16 %v813_v51, %v805_v55  ;;  %v844_v29 = vld [vmem:[#allocation5 + $0x5e8] sm:$0xff]  ;;  %v838_v42 = vld [vmem:[#allocation5 + $0x5b8] sm:$0xff] }
 0x187   :  { %v2712_v36 = vpop.eup %2711  ;;  %623 = vst [vmem:[#allocation8 + $0x100] sm:$0xff] %v3473_v23  ;;  %624 = vst [vmem:[#allocation8 + $0x108] sm:$0xff] %v3476_v52  ;;  %1088 = vmatmul.mubr.f32.gmra.mrb[16].mxu0 %v3467_v1  ;;  %1345 = vmatmul.mubr.f32.gmra.mrb[16].mxu1 %v3467_v1  ;;  %v843_v55 = vld [vmem:[#allocation5 + $0x5e0] sm:$0xff]  ;;  %v2465_v51 = vpack.c.bf16 %v844_v29, %v836_v56  ;;  %v868_v29 = vld [vmem:[#allocation5 + $0x6a8] sm:$0xff] }
 0x188   :  { %v2714_v60 = vpop.eup %2713  ;;  %v3487_v61 = vmul.f32 %v2712_v36, %v3185_v34  ;;  %v3490_v40 = vmul.f32 %v2712_v36, %v3203_v44  ;;  %v446_v8 = vpop.xlane.xlu1 %445  ;;  %2456 = vmatpush1.bf16.msra.mxu0 %v2455_v11  ;;  %2520 = vmatpush1.bf16.msra.mxu1 %v2519_v5  ;;  %v827_v34 = vld [vmem:[#allocation5 + $0x560] sm:$0xff]  ;;  %v2461_v44 = vpack.c.bf16 %v828_v37, %v820_v24  ;;  %v846_v11 = vld [vmem:[#allocation5 + $0x5f8] sm:$0xff]  ;;  %v845_v36 = vld [vmem:[#allocation5 + $0x5f0] sm:$0xff] }
 0x189   :  { %v3493_v18 = vmul.f32 %v2714_v60, %v3227_v3  ;;  %v3496_v59 = vmul.f32 %v2714_v60, %v3232_v32  ;;  %2723 = vrcp.f32 %v446_v8  ;;  %2458 = vmatprep.subr.bf16.mxu0 %v2457_v12  ;;  %2522 = vmatprep.subr.bf16.mxu1 %v2521_v30  ;;  %v2525_v3 = vpack.c.bf16 %v830_v31, %v822_v2  ;;  %v829_v32 = vld [vmem:[#allocation5 + $0x570] sm:$0xff]  ;;  %v852_v37 = vld [vmem:[#allocation5 + $0x628] sm:$0xff]  ;;  %v854_v31 = vld [vmem:[#allocation5 + $0x638] sm:$0xff] }
 0x18a   :  { %609 = vst [vmem:[#allocation8 + $0x90] sm:$0xff] %v3487_v61  ;;  %610 = vst [vmem:[#allocation8 + $0x98] sm:$0xff] %v3490_v40  ;;  %1093 = vmatprep.mubr.f32.mxu0 %v3490_v40  ;;  %1350 = vmatprep.mubr.f32.mxu1 %v3490_v40  ;;  %v2463_v30 = vpack.c.bf16 %v827_v34, %v3498_v10  ;;  %v2529_v24 = vpack.c.bf16 %v846_v11, %v838_v42  ;;  %v860_v2 = vld [vmem:[#allocation5 + $0x668] sm:$0xff]  ;;  %v862_v60 = vld [vmem:[#allocation5 + $0x678] sm:$0xff] }
 0x18b   :  { %v2716_v63 = vpop.eup %2715  ;;  %627 = vst [vmem:[#allocation8 + $0x120] sm:$0xff] %v3493_v18  ;;  %628 = vst [vmem:[#allocation8 + $0x128] sm:$0xff] %v3496_v59  ;;  %1094 = vmatmul.mubr.f32.gmra.mrb[18].mxu0 %v3487_v61  ;;  %1351 = vmatmul.mubr.f32.gmra.mrb[18].mxu1 %v3487_v61  ;;  %v2533_v56 = vpack.c.bf16 %v862_v60, %v854_v31  ;;  %v870_v11 = vld [vmem:[#allocation5 + $0x6b8] sm:$0xff] }
 0x18c   :  { %v2718_v5 = vpop.eup %2717  ;;  %v3509_v6 = vmul.f32 %v2716_v63, %v3209_v41  ;;  %v3512_v13 = vmul.f32 %v2716_v63, %v3221_v47  ;;  %v452_v46 = vpop.xlane.xlu1 %451  ;;  %1099 = vmatprep.mubr.f32.mxu0 %v3391_v9  ;;  %1356 = vmatprep.mubr.f32.mxu1 %v3391_v9  ;;  %v2527_v41 = vpack.c.bf16 %v829_v32, %v821_v43  ;;  %v835_v47 = vld [vmem:[#allocation5 + $0x5a0] sm:$0xff]  ;;  %v853_v63 = vld [vmem:[#allocation5 + $0x630] sm:$0xff]  ;;  %v886_v31 = vld [vmem:[#allocation5 + $0x738] sm:$0xff] }
 0x18d   :  { %v473_v12 = vpop.xlane.xlu0 %472  ;;  %v3518_v35 = vmul.f32 %v2718_v5, %v3245_v58  ;;  %v3521_v28 = vmul.f32 %v2718_v5, %v3248_v53  ;;  %2725 = vrcp.f32 %v452_v46  ;;  %2460 = vmatpush1.bf16.msra.mxu0 %v2459_v20  ;;  %2524 = vmatpush1.bf16.msra.mxu1 %v2523_v0  ;;  %v837_v58 = vld [vmem:[#allocation5 + $0x5b0] sm:$0xff]  ;;  %v2467_v34 = vpack.c.bf16 %v843_v55, %v835_v47  ;;  %v851_v43 = vld [vmem:[#allocation5 + $0x620] sm:$0xff]  ;;  %v878_v5 = vld [vmem:[#allocation5 + $0x6f8] sm:$0xff] }
 0x18e   :  { %613 = vst [vmem:[#allocation8 + $0xb0] sm:$0xff] %v3509_v6  ;;  %614 = vst [vmem:[#allocation8 + $0xb8] sm:$0xff] %v3512_v13  ;;  %2727 = vrcp.f32 %v473_v12  ;;  %2462 = vmatprep.subr.bf16.mxu0 %v2461_v44  ;;  %2526 = vmatprep.subr.bf16.mxu1 %v2525_v3  ;;  %v859_v32 = vld [vmem:[#allocation5 + $0x660] sm:$0xff]  ;;  %v894_v60 = vld [vmem:[#allocation5 + $0x778] sm:$0xff] }
 0x18f   :  { %v2720_v53 = vpop.eup %2719  ;;  %631 = vst [vmem:[#allocation8 + $0x140] sm:$0xff] %v3518_v35  ;;  %632 = vst [vmem:[#allocation8 + $0x148] sm:$0xff] %v3521_v28  ;;  %1100 = vmatmul.mubr.f32.gmra.mrb[20].mxu0 %v3388_v62  ;;  %1357 = vmatmul.mubr.f32.gmra.mrb[20].mxu1 %v3388_v62  ;;  %v2471_v47 = vpack.c.bf16 %v859_v32, %v851_v43 }
 0x190   :  { %v2722_v8 = vpop.eup %2721  ;;  %v3530_v20 = vmul.f32 %v2720_v53, %v3225_v49  ;;  %v3533_v0 = vmul.f32 %v2720_v53, %v3235_v22  ;;  %v458_v10 = vpop.xlane.xlu1 %457  ;;  %1105 = vmatprep.mubr.f32.mxu0 %v3512_v13  ;;  %1362 = vmatprep.mubr.f32.mxu1 %v3512_v13  ;;  %v2531_v49 = vpack.c.bf16 %v845_v36, %v837_v58  ;;  %v869_v58 = vld [vmem:[#allocation5 + $0x6b0] sm:$0xff] }
 0x191   :  { %v3538_v44 = vmul.f32 %v2722_v8, %v3255_v4  ;;  %v3541_v3 = vmul.f32 %v2722_v8, %v3259_v45  ;;  %2729 = vrcp.f32 %v458_v10  ;;  %2464 = vmatpush1.bf16.msra.mxu0 %v2463_v30  ;;  %2528 = vmatpush1.bf16.msra.mxu1 %v2527_v41  ;;  %v2469_v22 = vpack.c.bf16 %v860_v2, %v852_v37  ;;  %v861_v4 = vld [vmem:[#allocation5 + $0x670] sm:$0xff]  ;;  %v876_v45 = vld [vmem:[#allocation5 + $0x6e8] sm:$0xff]  ;;  %v3958_v10 = vld [vmem:[#allocation14_spill] sm:$0xff] }
 0x192   :  { %617 = vst [vmem:[#allocation8 + $0xd0] sm:$0xff] %v3530_v20  ;;  %618 = vst [vmem:[#allocation8 + $0xd8] sm:$0xff] %v3533_v0  ;;  %2466 = vmatprep.subr.bf16.mxu0 %v2465_v51  ;;  %2530 = vmatprep.subr.bf16.mxu1 %v2529_v24  ;;  %v2535_v55 = vpack.c.bf16 %v861_v4, %v853_v63  ;;  %v867_v51 = vld [vmem:[#allocation5 + $0x6a0] sm:$0xff]  ;;  %v877_v36 = vld [vmem:[#allocation5 + $0x6f0] sm:$0xff] }
 0x193   :  { %v2724_v42 = vpop.eup %2723  ;;  %635 = vst [vmem:[#allocation8 + $0x160] sm:$0xff] %v3538_v44  ;;  %636 = vst [vmem:[#allocation8 + $0x168] sm:$0xff] %v3541_v3  ;;  %1106 = vmatmul.mubr.f32.gmra.mrb[22].mxu0 %v3509_v6  ;;  %1363 = vmatmul.mubr.f32.gmra.mrb[22].mxu1 %v3509_v6  ;;  %v875_v24 = vld [vmem:[#allocation5 + $0x6e0] sm:$0xff]  ;;  %v884_v37 = vld [vmem:[#allocation5 + $0x728] sm:$0xff] }
 0x194   :  { %v3550_v46 = vmul.f32 %v2724_v42, %v3241_v16  ;;  %v3553_v12 = vmul.f32 %v2724_v42, %v3253_v27  ;;  %v464_v30 = vpop.xlane.xlu1 %463  ;;  %v479_v41 = vpop.xlane.xlu0 %478  ;;  %1111 = vmatprep.mubr.f32.mxu0 %v3429_v25  ;;  %1368 = vmatprep.mubr.f32.mxu1 %v3429_v25  ;;  %v2473_v16 = vpack.c.bf16 %v876_v45, %v868_v29  ;;  %v892_v2 = vld [vmem:[#allocation5 + $0x768] sm:$0xff]  ;;  %v3961_v4 = vld [vmem:[#allocation17_spill] sm:$0xff]  ;;  %v883_v45 = vld [vmem:[#allocation5 + $0x720] sm:$0xff] }
 0x195   :  { %2731 = vrcp.f32 %v464_v30  ;;  %2468 = vmatpush1.bf16.msra.mxu0 %v2467_v34  ;;  %2532 = vmatpush1.bf16.msra.mxu1 %v2531_v49  ;;  %v2537_v27 = vpack.c.bf16 %v878_v5, %v870_v11  ;;  %v3959_v49 = vld [vmem:[#allocation15_spill] sm:$0xff]  ;;  %v2539_v42 = vpack.c.bf16 %v877_v36, %v869_v58  ;;  %v891_v11 = vld [vmem:[#allocation5 + $0x760] sm:$0xff]  ;;  %v2477_v5 = vpack.c.bf16 %v892_v2, %v884_v37  ;;  %v910_v58 = vld [vmem:[#allocation5 + $0x7f8] sm:$0xff] }
 0x196   :  { %621 = vst [vmem:[#allocation8 + $0xf0] sm:$0xff] %v3550_v46  ;;  %622 = vst [vmem:[#allocation8 + $0xf8] sm:$0xff] %v3553_v12  ;;  %2733 = vrcp.f32 %v479_v41  ;;  %2470 = vmatprep.subr.bf16.mxu0 %v2469_v22  ;;  %2534 = vmatprep.subr.bf16.mxu1 %v2533_v56  ;;  %v2475_v22 = vpack.c.bf16 %v875_v24, %v867_v51  ;;  %v3960_v56 = vld [vmem:[#allocation16_spill] sm:$0xff]  ;;  %v2541_v30 = vpack.c.bf16 %v894_v60, %v886_v31  ;;  %v900_v24 = vld [vmem:[#allocation5 + $0x7a8] sm:$0xff] }
 0x197   :  { %v2726_v53 = vpop.eup %2725  ;;  %1112 = vmatmul.mubr.f32.gmra.mrb[24].mxu0 %v3426_v15  ;;  %1369 = vmatmul.mubr.f32.gmra.mrb[24].mxu1 %v3426_v15  ;;  %v885_v41 = vld [vmem:[#allocation5 + $0x730] sm:$0xff]  ;;  %v3962_v36 = vld [vmem:[#allocation19_spill] sm:$0xff]  ;;  %v2479_v60 = vpack.c.bf16 %v891_v11, %v883_v45  ;;  %v3965_v11 = vld [vmem:[#allocation21_spill] sm:$0xff] }
 0x198   :  { %v2728_v8 = vpop.eup %2727  ;;  %v3562_v34 = vmul.f32 %v2726_v53, %v3958_v10  ;;  %v3565_v43 = vmul.f32 %v2726_v53, %v3959_v49  ;;  %v470_v32 = vpop.xlane.xlu1 %469  ;;  %1117 = vmatprep.mubr.f32.mxu0 %v3533_v0  ;;  %1374 = vmatprep.mubr.f32.mxu1 %v3533_v0  ;;  %v893_v51 = vld [vmem:[#allocation5 + $0x770] sm:$0xff]  ;;  %v899_v10 = vld [vmem:[#allocation5 + $0x7a0] sm:$0xff] }
 0x199   :  { %v3570_v63 = vmul.f32 %v2728_v8, %v3960_v56  ;;  %v3573_v29 = vmul.f32 %v2728_v8, %v3961_v4  ;;  %2735 = vrcp.f32 %v470_v32  ;;  %2472 = vmatpush1.bf16.msra.mxu0 %v2471_v47  ;;  %2536 = vmatpush1.bf16.msra.mxu1 %v2535_v55  ;;  %v908_v47 = vld [vmem:[#allocation5 + $0x7e8] sm:$0xff]  ;;  %v902_v55 = vld [vmem:[#allocation5 + $0x7b8] sm:$0xff]  ;;  %v2543_v8 = vpack.c.bf16 %v893_v51, %v885_v41  ;;  %v907_v49 = vld [vmem:[#allocation5 + $0x7e0] sm:$0xff] }
 0x19a   :  { %625 = vst [vmem:[#allocation8 + $0x110] sm:$0xff] %v3562_v34  ;;  %626 = vst [vmem:[#allocation8 + $0x118] sm:$0xff] %v3565_v43  ;;  %2474 = vmatprep.subr.bf16.mxu0 %v2473_v16  ;;  %2538 = vmatprep.subr.bf16.mxu1 %v2537_v27  ;;  %v3963_v27 = vld [vmem:[#allocation20_spill] sm:$0xff]  ;;  %v2481_v32 = vpack.c.bf16 %v908_v47, %v900_v24  ;;  %v2545_v56 = vpack.c.bf16 %v910_v58, %v902_v55  ;;  %v3967_v47 = vld [vmem:[#allocation25_spill] sm:$0xff] }
 0x19b   :  { %v2730_v53 = vpop.eup %2729  ;;  %639 = vst [vmem:[#allocation8 + $0x180] sm:$0xff] %v3570_v63  ;;  %640 = vst [vmem:[#allocation8 + $0x188] sm:$0xff] %v3573_v29  ;;  %1118 = vmatmul.mubr.f32.gmra.mrb[26].mxu0 %v3530_v20  ;;  %1375 = vmatmul.mubr.f32.gmra.mrb[26].mxu1 %v3530_v20  ;;  %v901_v4 = vld [vmem:[#allocation5 + $0x7b0] sm:$0xff] }
 0x19c   :  { %v3582_v16 = vmul.f32 %v2730_v53, %v3962_v36  ;;  %v3585_v37 = vmul.f32 %v2730_v53, %v3963_v27  ;;  %v476_v2 = vpop.xlane.xlu1 %475  ;;  %v485_v31 = vpop.xlane.xlu0 %484  ;;  %1123 = vmatprep.mubr.f32.mxu0 %v3455_v26  ;;  %1380 = vmatprep.mubr.f32.mxu1 %v3455_v26  ;;  %v909_v53 = vld [vmem:[#allocation5 + $0x7f0] sm:$0xff] }
 0x19d   :  { %2737 = vrcp.f32 %v476_v2  ;;  %2476 = vmatpush1.bf16.msra.mxu0 %v2475_v22  ;;  %2540 = vmatpush1.bf16.msra.mxu1 %v2539_v42  ;;  %v3964_v42 = vld [vmem:[#allocation18_spill] sm:$0xff]  ;;  %v2547_v58 = vpack.c.bf16 %v909_v53, %v901_v4 }
 0x19e   :  { %629 = vst [vmem:[#allocation8 + $0x130] sm:$0xff] %v3582_v16  ;;  %630 = vst [vmem:[#allocation8 + $0x138] sm:$0xff] %v3585_v37  ;;  %2739 = vrcp.f32 %v485_v31  ;;  %2478 = vmatprep.subr.bf16.mxu0 %v2477_v5  ;;  %2542 = vmatprep.subr.bf16.mxu1 %v2541_v30  ;;  %v2483_v5 = vpack.c.bf16 %v907_v49, %v899_v10  ;;  %v3966_v30 = vld [vmem:[#allocation24_spill] sm:$0xff]  ;;  %v3968_v2 = vld [vmem:[#allocation22_spill] sm:$0xff] }
 0x19f   :  { %v2732_v36 = vpop.eup %2731  ;;  %1124 = vmatmul.mubr.f32.gmra.mrb[28].mxu0 %v3452_v57  ;;  %1381 = vmatmul.mubr.f32.gmra.mrb[28].mxu1 %v3452_v57  ;;  %v3970_v4 = vld [vmem:[#allocation26_spill] sm:$0xff] }
 0x1a0   :  { %v2734_v22 = vpop.eup %2733  ;;  %v3594_v45 = vmul.f32 %v2732_v36, %v3964_v42  ;;  %v3597_v41 = vmul.f32 %v2732_v36, %v3965_v11  ;;  %v482_v51 = vpop.xlane.xlu1 %481  ;;  %1129 = vmatprep.mubr.f32.mxu0 %v3553_v12  ;;  %1386 = vmatprep.mubr.f32.mxu1 %v3553_v12  ;;  %v3971_v36 = vld [vmem:[#allocation27_spill] sm:$0xff]  ;;  %v3972_v11 = vld [vmem:[#allocation30_spill] sm:$0xff] }
 0x1a1   :  { %v3602_v24 = vmul.f32 %v2734_v22, %v3966_v30  ;;  %v3605_v55 = vmul.f32 %v2734_v22, %v3967_v47  ;;  %2741 = vrcp.f32 %v482_v51  ;;  %2480 = vmatpush1.bf16.msra.mxu0 %v2479_v60  ;;  %2544 = vmatpush1.bf16.msra.mxu1 %v2543_v8  ;;  %v3969_v60 = vld [vmem:[#allocation23_spill] sm:$0xff] }
 0x1a2   :  { %633 = vst [vmem:[#allocation8 + $0x150] sm:$0xff] %v3594_v45  ;;  %634 = vst [vmem:[#allocation8 + $0x158] sm:$0xff] %v3597_v41  ;;  %2482 = vmatprep.subr.bf16.mxu0 %v2481_v32  ;;  %2546 = vmatprep.subr.bf16.mxu1 %v2545_v56 }
 0x1a3   :  { %v2736_v27 = vpop.eup %2735  ;;  %643 = vst [vmem:[#allocation8 + $0x1a0] sm:$0xff] %v3602_v24  ;;  %644 = vst [vmem:[#allocation8 + $0x1a8] sm:$0xff] %v3605_v55  ;;  %1130 = vmatmul.mubr.f32.gmra.mrb[30].mxu0 %v3550_v46  ;;  %1387 = vmatmul.mubr.f32.gmra.mrb[30].mxu1 %v3550_v46 }
 0x1a4   :  { %v3614_v31 = vmul.f32 %v2736_v27, %v3968_v2  ;;  %v3617_v8 = vmul.f32 %v2736_v27, %v3969_v60  ;;  %v488_v10 = vpop.xlane.xlu1 %487  ;;  %v491_v49 = vpop.xlane.xlu0 %490  ;;  %1135 = vmatprep.mubr.f32.mxu0 %v3476_v52  ;;  %1392 = vmatprep.mubr.f32.mxu1 %v3476_v52  ;;  %v3975_v2 = vld [vmem:[#allocation29_spill] sm:$0xff] }
 0x1a5   :  { %2743 = vrcp.f32 %v488_v10  ;;  %2484 = vmatpush1.bf16.msra.mxu0 %v2483_v5  ;;  %2548 = vmatpush1.bf16.msra.mxu1 %v2547_v58  ;;  %v3973_v5 = vld [vmem:[#allocation31_spill] sm:$0xff]  ;;  %v3974_v58 = vld [vmem:[#allocation28_spill] sm:$0xff] }
 0x1a6   :  { %637 = vst [vmem:[#allocation8 + $0x170] sm:$0xff] %v3614_v31  ;;  %638 = vst [vmem:[#allocation8 + $0x178] sm:$0xff] %v3617_v8  ;;  %2745 = vrcp.f32 %v491_v49 }
 0x1a7   :  { %v2738_v32 = vpop.eup %2737  ;;  %1136 = vmatmul.mubr.f32.gmra.mrb[32].mxu0 %v3473_v23  ;;  %1393 = vmatmul.mubr.f32.gmra.mrb[32].mxu1 %v3473_v23 }
 0x1a8   :  { %v2740_v56 = vpop.eup %2739  ;;  %v3626_v53 = vmul.f32 %v2738_v32, %v3970_v4  ;;  %v3629_v22 = vmul.f32 %v2738_v32, %v3971_v36  ;;  %v494_v42 = vpop.xlane.xlu1 %493  ;;  %1141 = vmatprep.mubr.f32.mxu0 %v3565_v43  ;;  %1398 = vmatprep.mubr.f32.mxu1 %v3565_v43  ;;  %v3976_v32 = vld [vmem:[#allocation32_spill] sm:$0xff]  ;;  %v3977_v4 = vld [vmem:[#allocation33_spill] sm:$0xff] }
 0x1a9   :  { %v3634_v51 = vmul.f32 %v2740_v56, %v3972_v11  ;;  %v3637_v30 = vmul.f32 %v2740_v56, %v3973_v5  ;;  %2747 = vrcp.f32 %v494_v42  ;;  %v3978_v42 = vld [vmem:[#allocation34_spill] sm:$0xff]  ;;  %v3979_v5 = vld [vmem:[#allocation35_spill] sm:$0xff] }
 0x1aa   :  { %641 = vst [vmem:[#allocation8 + $0x190] sm:$0xff] %v3626_v53  ;;  %642 = vst [vmem:[#allocation8 + $0x198] sm:$0xff] %v3629_v22 }
 0x1ab   :  { %v2742_v47 = vpop.eup %2741  ;;  %647 = vst [vmem:[#allocation8 + $0x1c0] sm:$0xff] %v3634_v51  ;;  %648 = vst [vmem:[#allocation8 + $0x1c8] sm:$0xff] %v3637_v30  ;;  %1142 = vmatmul.mubr.f32.gmra.mrb[34].mxu0 %v3562_v34  ;;  %1399 = vmatmul.mubr.f32.gmra.mrb[34].mxu1 %v3562_v34 }
 0x1ac   :  { %v3646_v27 = vmul.f32 %v2742_v47, %v3974_v58  ;;  %v3649_v60 = vmul.f32 %v2742_v47, %v3975_v2  ;;  %1147 = vmatprep.mubr.f32.mxu0 %v3496_v59  ;;  %1404 = vmatprep.mubr.f32.mxu1 %v3496_v59  ;;  %v3980_v2 = vld [vmem:[#allocation36_spill] sm:$0xff] }
 0x1ae   :  { %645 = vst [vmem:[#allocation8 + $0x1b0] sm:$0xff] %v3646_v27  ;;  %646 = vst [vmem:[#allocation8 + $0x1b8] sm:$0xff] %v3649_v60 }
 0x1af   :  { %v2744_v10 = vpop.eup %2743  ;;  %1148 = vmatmul.mubr.f32.gmra.mrb[36].mxu0 %v3493_v18  ;;  %1405 = vmatmul.mubr.f32.gmra.mrb[36].mxu1 %v3493_v18 }
 0x1b0   :  { %v2746_v49 = vpop.eup %2745  ;;  %v3658_v56 = vmul.f32 %v2744_v10, %v3976_v32  ;;  %v3661_v36 = vmul.f32 %v2744_v10, %v3977_v4  ;;  %1153 = vmatprep.mubr.f32.mxu0 %v3585_v37  ;;  %1410 = vmatprep.mubr.f32.mxu1 %v3585_v37  ;;  %v3981_v32 = vld [vmem:[#allocation37_spill] sm:$0xff] }
 0x1b1   :  { %v3666_v11 = vmul.f32 %v2746_v49, %v3978_v42  ;;  %v3669_v47 = vmul.f32 %v2746_v49, %v3979_v5  ;;  %v2766_v49 = vld [vmem:[#allocation8 + $0x8] sm:$0xff]  ;;  %v2767_v42 = vld [vmem:[#allocation8] sm:$0xff]  ;;  %v2768_v5 = vld [vmem:[#allocation8 + $0x18] sm:$0xff] }
 0x1b2   :  { %649 = vst [vmem:[#allocation8 + $0x1d0] sm:$0xff] %v3658_v56  ;;  %650 = vst [vmem:[#allocation8 + $0x1d8] sm:$0xff] %v3661_v36 }
 0x1b3   :  { %v2748_v58 = vpop.eup %2747  ;;  %651 = vst [vmem:[#allocation8 + $0x1e0] sm:$0xff] %v3666_v11  ;;  %652 = vst [vmem:[#allocation8 + $0x1e8] sm:$0xff] %v3669_v47  ;;  %1154 = vmatmul.mubr.f32.gmra.mrb[38].mxu0 %v3582_v16  ;;  %1411 = vmatmul.mubr.f32.gmra.mrb[38].mxu1 %v3582_v16 }
 0x1b4   :  { %v3678_v10 = vmul.f32 %v2748_v58, %v3980_v2  ;;  %v3681_v4 = vmul.f32 %v2748_v58, %v3981_v32  ;;  %1159 = vmatprep.mubr.f32.mxu0 %v3521_v28  ;;  %1416 = vmatprep.mubr.f32.mxu1 %v3521_v28  ;;  %v2769_v58 = vld [vmem:[#allocation8 + $0x10] sm:$0xff]  ;;  %v2770_v2 = vld [vmem:[#allocation8 + $0x28] sm:$0xff]  ;;  %v2771_v32 = vld [vmem:[#allocation8 + $0x20] sm:$0xff] }
 0x1b6   :  { %653 = vst [vmem:[#allocation8 + $0x1f0] sm:$0xff] %v3678_v10  ;;  %654 = vst [vmem:[#allocation8 + $0x1f8] sm:$0xff] %v3681_v4 }
 0x1b7   :  { %1160 = vmatmul.mubr.f32.gmra.mrb[40].mxu0 %v3518_v35  ;;  %1417 = vmatmul.mubr.f32.gmra.mrb[40].mxu1 %v3518_v35 }
 0x1b8   :  { %1165 = vmatprep.mubr.f32.mxu0 %v3597_v41  ;;  %1422 = vmatprep.mubr.f32.mxu1 %v3597_v41 }
 0x1bb   :  { %1166 = vmatmul.mubr.f32.gmra.mrb[42].mxu0 %v3594_v45  ;;  %1423 = vmatmul.mubr.f32.gmra.mrb[42].mxu1 %v3594_v45 }
 0x1bc   :  { %1171 = vmatprep.mubr.f32.mxu0 %v3541_v3  ;;  %1428 = vmatprep.mubr.f32.mxu1 %v3541_v3 }
 0x1bf   :  { %1172 = vmatmul.mubr.f32.gmra.mrb[44].mxu0 %v3538_v44  ;;  %1429 = vmatmul.mubr.f32.gmra.mrb[44].mxu1 %v3538_v44 }
 0x1c0   :  { %1177 = vmatprep.mubr.f32.mxu0 %v3617_v8  ;;  %1434 = vmatprep.mubr.f32.mxu1 %v3617_v8 }
 0x1c3   :  { %1178 = vmatmul.mubr.f32.gmra.mrb[46].mxu0 %v3614_v31  ;;  %1435 = vmatmul.mubr.f32.gmra.mrb[46].mxu1 %v3614_v31 }
 0x1c4   :  { %1183 = vmatprep.mubr.f32.mxu0 %v3573_v29  ;;  %1440 = vmatprep.mubr.f32.mxu1 %v3573_v29 }
 0x1c7   :  { %1184 = vmatmul.mubr.f32.gmra.mrb[48].mxu0 %v3570_v63  ;;  %1441 = vmatmul.mubr.f32.gmra.mrb[48].mxu1 %v3570_v63 }
 0x1c8   :  { %1189 = vmatprep.mubr.f32.mxu0 %v3629_v22  ;;  %1446 = vmatprep.mubr.f32.mxu1 %v3629_v22 }
 0x1cb   :  { %1190 = vmatmul.mubr.f32.gmra.mrb[50].mxu0 %v3626_v53  ;;  %1447 = vmatmul.mubr.f32.gmra.mrb[50].mxu1 %v3626_v53 }
 0x1cc   :  { %1195 = vmatprep.mubr.f32.mxu0 %v3605_v55  ;;  %1452 = vmatprep.mubr.f32.mxu1 %v3605_v55 }
 0x1cf   :  { %1196 = vmatmul.mubr.f32.gmra.mrb[52].mxu0 %v3602_v24  ;;  %1453 = vmatmul.mubr.f32.gmra.mrb[52].mxu1 %v3602_v24 }
 0x1d0   :  { %1201 = vmatprep.mubr.f32.mxu0 %v3649_v60  ;;  %1458 = vmatprep.mubr.f32.mxu1 %v3649_v60 }
 0x1d3   :  { %1202 = vmatmul.mubr.f32.gmra.mrb[54].mxu0 %v3646_v27  ;;  %1459 = vmatmul.mubr.f32.gmra.mrb[54].mxu1 %v3646_v27 }
 0x1d4   :  { %1207 = vmatprep.mubr.f32.mxu0 %v3637_v30  ;;  %1464 = vmatprep.mubr.f32.mxu1 %v3637_v30 }
 0x1d7   :  { %1208 = vmatmul.mubr.f32.gmra.mrb[56].mxu0 %v3634_v51  ;;  %1465 = vmatmul.mubr.f32.gmra.mrb[56].mxu1 %v3634_v51 }
 0x1d8   :  { %1213 = vmatprep.mubr.f32.mxu0 %v3661_v36  ;;  %1470 = vmatprep.mubr.f32.mxu1 %v3661_v36 }
 0x1db   :  { %1214 = vmatmul.mubr.f32.gmra.mrb[58].mxu0 %v3658_v56  ;;  %1471 = vmatmul.mubr.f32.gmra.mrb[58].mxu1 %v3658_v56 }
 0x1dc   :  { %1219 = vmatprep.mubr.f32.mxu0 %v3669_v47  ;;  %1476 = vmatprep.mubr.f32.mxu1 %v3669_v47 }
 0x1df   :  { %1220 = vmatmul.mubr.f32.gmra.mrb[60].mxu0 %v3666_v11  ;;  %1477 = vmatmul.mubr.f32.gmra.mrb[60].mxu1 %v3666_v11 }
 0x1e0   :  { %1225 = vmatprep.mubr.f32.mxu0 %v3681_v4  ;;  %1482 = vmatprep.mubr.f32.mxu1 %v3681_v4 }
 0x1e3   :  { %1226 = vmatmul.mubr.f32.gmra.mrb[62].mxu0 %v3678_v10  ;;  %1483 = vmatmul.mubr.f32.gmra.mrb[62].mxu1 %v3678_v10 }
 0x1e4   :  { %1553 = vmatprep.mubr.f32.mxu0 %v2766_v49  ;;  %1810 = vmatprep.mubr.f32.mxu1 %v2766_v49 }
 0x1e7   :  { %1554 = vmatmul.mubr.f32.vlgmr.msra.gmra.mrb[64].mxu0 %v2767_v42  ;;  %1811 = vmatmul.mubr.f32.vlgmr.msra.gmra.mrb[64].mxu1 %v2767_v42 }
 0x1e8   :  { %1559 = vmatprep.mubr.f32.mxu0 %v2768_v5  ;;  %1816 = vmatprep.mubr.f32.mxu1 %v2768_v5 }
 0x1eb   :  { %1560 = vmatmul.mubr.f32.gmra.mrb[66].mxu0 %v2769_v58  ;;  %1817 = vmatmul.mubr.f32.gmra.mrb[66].mxu1 %v2769_v58 }
 0x1ec   :  { %1565 = vmatprep.mubr.f32.mxu0 %v2770_v2  ;;  %1822 = vmatprep.mubr.f32.mxu1 %v2770_v2 }
 0x1ef   :  { %1566 = vmatmul.mubr.f32.gmra.mrb[68].mxu0 %v2771_v32  ;;  %1823 = vmatmul.mubr.f32.gmra.mrb[68].mxu1 %v2771_v32 }
 0x1f0   :  { %1571 = vmatprep.mubr.f32.mxu0 %v3347_v50  ;;  %1828 = vmatprep.mubr.f32.mxu1 %v3347_v50 }
 0x1f3   :  { %1572 = vmatmul.mubr.f32.gmra.mrb[70].mxu0 %v3344_v39  ;;  %1829 = vmatmul.mubr.f32.gmra.mrb[70].mxu1 %v3344_v39 }
 0x1f4   :  { %1577 = vmatprep.mubr.f32.mxu0 %v3361_v7  ;;  %1834 = vmatprep.mubr.f32.mxu1 %v3361_v7 }
 0x1f7   :  { %1578 = vmatmul.mubr.f32.gmra.mrb[72].mxu0 %v3358_v21  ;;  %1835 = vmatmul.mubr.f32.gmra.mrb[72].mxu1 %v3358_v21 }
 0x1f8   :  { %1583 = vmatprep.mubr.f32.mxu0 %v3378_v48  ;;  %1840 = vmatprep.mubr.f32.mxu1 %v3378_v48 }
 0x1fb   :  { %1584 = vmatmul.mubr.f32.gmra.mrb[74].mxu0 %v3375_v14  ;;  %1841 = vmatmul.mubr.f32.gmra.mrb[74].mxu1 %v3375_v14 }
 0x1fc   :  { %1589 = vmatprep.mubr.f32.mxu0 %v3415_v54  ;;  %1846 = vmatprep.mubr.f32.mxu1 %v3415_v54 }
 0x1ff   :  { %1590 = vmatmul.mubr.f32.gmra.mrb[76].mxu0 %v3412_v38  ;;  %1847 = vmatmul.mubr.f32.gmra.mrb[76].mxu1 %v3412_v38 }
 0x200   :  { %1595 = vmatprep.mubr.f32.mxu0 %v3449_v33  ;;  %1852 = vmatprep.mubr.f32.mxu1 %v3449_v33 }
 0x203   :  { %1596 = vmatmul.mubr.f32.gmra.mrb[78].mxu0 %v3446_v19  ;;  %1853 = vmatmul.mubr.f32.gmra.mrb[78].mxu1 %v3446_v19 }
 0x204   :  { %1601 = vmatprep.mubr.f32.mxu0 %v3470_v17  ;;  %1858 = vmatprep.mubr.f32.mxu1 %v3470_v17 }
 0x207   :  { %1602 = vmatmul.mubr.f32.gmra.mrb[80].mxu0 %v3467_v1  ;;  %1859 = vmatmul.mubr.f32.gmra.mrb[80].mxu1 %v3467_v1 }
 0x208   :  { %1607 = vmatprep.mubr.f32.mxu0 %v3490_v40  ;;  %1864 = vmatprep.mubr.f32.mxu1 %v3490_v40 }
 0x20b   :  { %1608 = vmatmul.mubr.f32.gmra.mrb[82].mxu0 %v3487_v61  ;;  %1865 = vmatmul.mubr.f32.gmra.mrb[82].mxu1 %v3487_v61 }
 0x20c   :  { %1613 = vmatprep.mubr.f32.mxu0 %v3391_v9  ;;  %1870 = vmatprep.mubr.f32.mxu1 %v3391_v9 }
 0x20f   :  { %1614 = vmatmul.mubr.f32.gmra.mrb[84].mxu0 %v3388_v62  ;;  %1871 = vmatmul.mubr.f32.gmra.mrb[84].mxu1 %v3388_v62 }
 0x210   :  { %1619 = vmatprep.mubr.f32.mxu0 %v3512_v13  ;;  %1876 = vmatprep.mubr.f32.mxu1 %v3512_v13 }
 0x213   :  { %1620 = vmatmul.mubr.f32.gmra.mrb[86].mxu0 %v3509_v6  ;;  %1877 = vmatmul.mubr.f32.gmra.mrb[86].mxu1 %v3509_v6 }
 0x214   :  { %1625 = vmatprep.mubr.f32.mxu0 %v3429_v25  ;;  %1882 = vmatprep.mubr.f32.mxu1 %v3429_v25 }
 0x217   :  { %1626 = vmatmul.mubr.f32.gmra.mrb[88].mxu0 %v3426_v15  ;;  %1883 = vmatmul.mubr.f32.gmra.mrb[88].mxu1 %v3426_v15 }
 0x218   :  { %1631 = vmatprep.mubr.f32.mxu0 %v3533_v0  ;;  %1888 = vmatprep.mubr.f32.mxu1 %v3533_v0 }
 0x21b   :  { %1632 = vmatmul.mubr.f32.gmra.mrb[90].mxu0 %v3530_v20  ;;  %1889 = vmatmul.mubr.f32.gmra.mrb[90].mxu1 %v3530_v20 }
 0x21c   :  { %1637 = vmatprep.mubr.f32.mxu0 %v3455_v26  ;;  %1894 = vmatprep.mubr.f32.mxu1 %v3455_v26 }
 0x21f   :  { %1638 = vmatmul.mubr.f32.gmra.mrb[92].mxu0 %v3452_v57  ;;  %1895 = vmatmul.mubr.f32.gmra.mrb[92].mxu1 %v3452_v57 }
 0x220   :  { %1643 = vmatprep.mubr.f32.mxu0 %v3553_v12  ;;  %1900 = vmatprep.mubr.f32.mxu1 %v3553_v12 }
 0x223   :  { %1644 = vmatmul.mubr.f32.gmra.mrb[94].mxu0 %v3550_v46  ;;  %1901 = vmatmul.mubr.f32.gmra.mrb[94].mxu1 %v3550_v46 }
 0x224   :  { %1649 = vmatprep.mubr.f32.mxu0 %v3476_v52  ;;  %1906 = vmatprep.mubr.f32.mxu1 %v3476_v52 }
 0x227   :  { %1650 = vmatmul.mubr.f32.gmra.mrb[96].mxu0 %v3473_v23  ;;  %1907 = vmatmul.mubr.f32.gmra.mrb[96].mxu1 %v3473_v23 }
 0x228   :  { %1655 = vmatprep.mubr.f32.mxu0 %v3565_v43  ;;  %1912 = vmatprep.mubr.f32.mxu1 %v3565_v43 }
 0x22b   :  { %1656 = vmatmul.mubr.f32.gmra.mrb[98].mxu0 %v3562_v34  ;;  %1913 = vmatmul.mubr.f32.gmra.mrb[98].mxu1 %v3562_v34 }
 0x22c   :  { %1661 = vmatprep.mubr.f32.mxu0 %v3496_v59  ;;  %1918 = vmatprep.mubr.f32.mxu1 %v3496_v59 }
 0x22f   :  { %1662 = vmatmul.mubr.f32.gmra.mrb[100].mxu0 %v3493_v18  ;;  %1919 = vmatmul.mubr.f32.gmra.mrb[100].mxu1 %v3493_v18 }
 0x230   :  { %1667 = vmatprep.mubr.f32.mxu0 %v3585_v37  ;;  %1924 = vmatprep.mubr.f32.mxu1 %v3585_v37 }
 0x233   :  { %1668 = vmatmul.mubr.f32.gmra.mrb[102].mxu0 %v3582_v16  ;;  %1925 = vmatmul.mubr.f32.gmra.mrb[102].mxu1 %v3582_v16 }
 0x234   :  { %1673 = vmatprep.mubr.f32.mxu0 %v3521_v28  ;;  %1930 = vmatprep.mubr.f32.mxu1 %v3521_v28 }
 0x237   :  { %1674 = vmatmul.mubr.f32.gmra.mrb[104].mxu0 %v3518_v35  ;;  %1931 = vmatmul.mubr.f32.gmra.mrb[104].mxu1 %v3518_v35 }
 0x238   :  { %1679 = vmatprep.mubr.f32.mxu0 %v3597_v41  ;;  %1936 = vmatprep.mubr.f32.mxu1 %v3597_v41 }
 0x23a   :  { %v1041_v39 = vpop.f32.mrb[0].mxu0  ;;  %v1298_v50 = vpop.f32.mrb[0].mxu1 }
 0x23b   :  { %2003 = vst [vmem:[#allocation7] sm:$0xff] %v1041_v39  ;;  %2005 = vst [vmem:[#allocation7 + $0x10] sm:$0xff] %v1298_v50  ;;  %v1043_v21 = vpop.f32.mrb[1].mxu0  ;;  %v1300_v7 = vpop.f32.mrb[1].mxu1  ;;  %1680 = vmatmul.mubr.f32.gmra.mrb[106].mxu0 %v3594_v45  ;;  %1937 = vmatmul.mubr.f32.gmra.mrb[106].mxu1 %v3594_v45 }
 0x23c   :  { %2004 = vst [vmem:[#allocation7 + $0x8] sm:$0xff] %v1043_v21  ;;  %2006 = vst [vmem:[#allocation7 + $0x18] sm:$0xff] %v1300_v7  ;;  %1685 = vmatprep.mubr.f32.mxu0 %v3541_v3  ;;  %1942 = vmatprep.mubr.f32.mxu1 %v3541_v3 }
 0x23e   :  { %v1047_v14 = vpop.f32.mrb[2].mxu0  ;;  %v1304_v48 = vpop.f32.mrb[2].mxu1 }
 0x23f   :  { %2011 = vst [vmem:[#allocation7 + $0x40] sm:$0xff] %v1047_v14  ;;  %2013 = vst [vmem:[#allocation7 + $0x50] sm:$0xff] %v1304_v48  ;;  %v1049_v62 = vpop.f32.mrb[3].mxu0  ;;  %v1306_v9 = vpop.f32.mrb[3].mxu1  ;;  %1686 = vmatmul.mubr.f32.gmra.mrb[108].mxu0 %v3538_v44  ;;  %1943 = vmatmul.mubr.f32.gmra.mrb[108].mxu1 %v3538_v44 }
 0x240   :  { %2012 = vst [vmem:[#allocation7 + $0x48] sm:$0xff] %v1049_v62  ;;  %2014 = vst [vmem:[#allocation7 + $0x58] sm:$0xff] %v1306_v9  ;;  %1691 = vmatprep.mubr.f32.mxu0 %v3617_v8  ;;  %1948 = vmatprep.mubr.f32.mxu1 %v3617_v8 }
 0x242   :  { %v1053_v38 = vpop.f32.mrb[4].mxu0  ;;  %v1310_v54 = vpop.f32.mrb[4].mxu1 }
 0x243   :  { %2019 = vst [vmem:[#allocation7 + $0x80] sm:$0xff] %v1053_v38  ;;  %2021 = vst [vmem:[#allocation7 + $0x90] sm:$0xff] %v1310_v54  ;;  %v1055_v15 = vpop.f32.mrb[5].mxu0  ;;  %v1312_v25 = vpop.f32.mrb[5].mxu1  ;;  %1692 = vmatmul.mubr.f32.gmra.mrb[110].mxu0 %v3614_v31  ;;  %1949 = vmatmul.mubr.f32.gmra.mrb[110].mxu1 %v3614_v31 }
 0x244   :  { %2020 = vst [vmem:[#allocation7 + $0x88] sm:$0xff] %v1055_v15  ;;  %2022 = vst [vmem:[#allocation7 + $0x98] sm:$0xff] %v1312_v25  ;;  %1697 = vmatprep.mubr.f32.mxu0 %v3573_v29  ;;  %1954 = vmatprep.mubr.f32.mxu1 %v3573_v29 }
 0x246   :  { %v1059_v19 = vpop.f32.mrb[6].mxu0  ;;  %v1316_v33 = vpop.f32.mrb[6].mxu1 }
 0x247   :  { %2027 = vst [vmem:[#allocation7 + $0xc0] sm:$0xff] %v1059_v19  ;;  %2029 = vst [vmem:[#allocation7 + $0xd0] sm:$0xff] %v1316_v33  ;;  %v1061_v57 = vpop.f32.mrb[7].mxu0  ;;  %v1318_v26 = vpop.f32.mrb[7].mxu1  ;;  %1698 = vmatmul.mubr.f32.gmra.mrb[112].mxu0 %v3570_v63  ;;  %1955 = vmatmul.mubr.f32.gmra.mrb[112].mxu1 %v3570_v63 }
 0x248   :  { %2028 = vst [vmem:[#allocation7 + $0xc8] sm:$0xff] %v1061_v57  ;;  %2030 = vst [vmem:[#allocation7 + $0xd8] sm:$0xff] %v1318_v26  ;;  %1703 = vmatprep.mubr.f32.mxu0 %v3629_v22  ;;  %1960 = vmatprep.mubr.f32.mxu1 %v3629_v22 }
 0x24a   :  { %v1065_v1 = vpop.f32.mrb[8].mxu0  ;;  %v1322_v17 = vpop.f32.mrb[8].mxu1 }
 0x24b   :  { %2035 = vst [vmem:[#allocation7 + $0x100] sm:$0xff] %v1065_v1  ;;  %2037 = vst [vmem:[#allocation7 + $0x110] sm:$0xff] %v1322_v17  ;;  %v1067_v23 = vpop.f32.mrb[9].mxu0  ;;  %v1324_v52 = vpop.f32.mrb[9].mxu1  ;;  %1704 = vmatmul.mubr.f32.gmra.mrb[114].mxu0 %v3626_v53  ;;  %1961 = vmatmul.mubr.f32.gmra.mrb[114].mxu1 %v3626_v53 }
 0x24c   :  { %2036 = vst [vmem:[#allocation7 + $0x108] sm:$0xff] %v1067_v23  ;;  %2038 = vst [vmem:[#allocation7 + $0x118] sm:$0xff] %v1324_v52  ;;  %1709 = vmatprep.mubr.f32.mxu0 %v3605_v55  ;;  %1966 = vmatprep.mubr.f32.mxu1 %v3605_v55 }
 0x24e   :  { %v1071_v61 = vpop.f32.mrb[10].mxu0  ;;  %v1328_v40 = vpop.f32.mrb[10].mxu1 }
 0x24f   :  { %2043 = vst [vmem:[#allocation7 + $0x140] sm:$0xff] %v1071_v61  ;;  %2045 = vst [vmem:[#allocation7 + $0x150] sm:$0xff] %v1328_v40  ;;  %v1073_v18 = vpop.f32.mrb[11].mxu0  ;;  %v1330_v59 = vpop.f32.mrb[11].mxu1  ;;  %1710 = vmatmul.mubr.f32.gmra.mrb[116].mxu0 %v3602_v24  ;;  %1967 = vmatmul.mubr.f32.gmra.mrb[116].mxu1 %v3602_v24 }
 0x250   :  { %2044 = vst [vmem:[#allocation7 + $0x148] sm:$0xff] %v1073_v18  ;;  %2046 = vst [vmem:[#allocation7 + $0x158] sm:$0xff] %v1330_v59  ;;  %1715 = vmatprep.mubr.f32.mxu0 %v3649_v60  ;;  %1972 = vmatprep.mubr.f32.mxu1 %v3649_v60 }
 0x252   :  { %v1077_v6 = vpop.f32.mrb[12].mxu0  ;;  %v1334_v13 = vpop.f32.mrb[12].mxu1 }
 0x253   :  { %2051 = vst [vmem:[#allocation7 + $0x180] sm:$0xff] %v1077_v6  ;;  %2053 = vst [vmem:[#allocation7 + $0x190] sm:$0xff] %v1334_v13  ;;  %v1079_v35 = vpop.f32.mrb[13].mxu0  ;;  %v1336_v28 = vpop.f32.mrb[13].mxu1  ;;  %1716 = vmatmul.mubr.f32.gmra.mrb[118].mxu0 %v3646_v27  ;;  %1973 = vmatmul.mubr.f32.gmra.mrb[118].mxu1 %v3646_v27 }
 0x254   :  { %2052 = vst [vmem:[#allocation7 + $0x188] sm:$0xff] %v1079_v35  ;;  %2054 = vst [vmem:[#allocation7 + $0x198] sm:$0xff] %v1336_v28  ;;  %1721 = vmatprep.mubr.f32.mxu0 %v3637_v30  ;;  %1978 = vmatprep.mubr.f32.mxu1 %v3637_v30 }
 0x256   :  { %v1083_v20 = vpop.f32.mrb[14].mxu0  ;;  %v1340_v0 = vpop.f32.mrb[14].mxu1 }
 0x257   :  { %2059 = vst [vmem:[#allocation7 + $0x1c0] sm:$0xff] %v1083_v20  ;;  %2061 = vst [vmem:[#allocation7 + $0x1d0] sm:$0xff] %v1340_v0  ;;  %v1085_v44 = vpop.f32.mrb[15].mxu0  ;;  %v1342_v3 = vpop.f32.mrb[15].mxu1  ;;  %1722 = vmatmul.mubr.f32.gmra.mrb[120].mxu0 %v3634_v51  ;;  %1979 = vmatmul.mubr.f32.gmra.mrb[120].mxu1 %v3634_v51 }
 0x258   :  { %2060 = vst [vmem:[#allocation7 + $0x1c8] sm:$0xff] %v1085_v44  ;;  %2062 = vst [vmem:[#allocation7 + $0x1d8] sm:$0xff] %v1342_v3  ;;  %1727 = vmatprep.mubr.f32.mxu0 %v3661_v36  ;;  %1984 = vmatprep.mubr.f32.mxu1 %v3661_v36 }
 0x25a   :  { %v1089_v46 = vpop.f32.mrb[16].mxu0  ;;  %v1346_v12 = vpop.f32.mrb[16].mxu1 }
 0x25b   :  { %2067 = vst [vmem:[#allocation7 + $0x200] sm:$0xff] %v1089_v46  ;;  %2069 = vst [vmem:[#allocation7 + $0x210] sm:$0xff] %v1346_v12  ;;  %v1091_v34 = vpop.f32.mrb[17].mxu0  ;;  %v1348_v43 = vpop.f32.mrb[17].mxu1  ;;  %1728 = vmatmul.mubr.f32.gmra.mrb[122].mxu0 %v3658_v56  ;;  %1985 = vmatmul.mubr.f32.gmra.mrb[122].mxu1 %v3658_v56 }
 0x25c   :  { %2068 = vst [vmem:[#allocation7 + $0x208] sm:$0xff] %v1091_v34  ;;  %2070 = vst [vmem:[#allocation7 + $0x218] sm:$0xff] %v1348_v43  ;;  %1733 = vmatprep.mubr.f32.mxu0 %v3669_v47  ;;  %1990 = vmatprep.mubr.f32.mxu1 %v3669_v47 }
 0x25e   :  { %v1095_v63 = vpop.f32.mrb[18].mxu0  ;;  %v1352_v29 = vpop.f32.mrb[18].mxu1 }
 0x25f   :  { %2075 = vst [vmem:[#allocation7 + $0x240] sm:$0xff] %v1095_v63  ;;  %2077 = vst [vmem:[#allocation7 + $0x250] sm:$0xff] %v1352_v29  ;;  %v1097_v16 = vpop.f32.mrb[19].mxu0  ;;  %v1354_v37 = vpop.f32.mrb[19].mxu1  ;;  %1734 = vmatmul.mubr.f32.gmra.mrb[124].mxu0 %v3666_v11  ;;  %1991 = vmatmul.mubr.f32.gmra.mrb[124].mxu1 %v3666_v11 }
 0x260   :  { %2076 = vst [vmem:[#allocation7 + $0x248] sm:$0xff] %v1097_v16  ;;  %2078 = vst [vmem:[#allocation7 + $0x258] sm:$0xff] %v1354_v37  ;;  %1739 = vmatprep.mubr.f32.mxu0 %v3681_v4  ;;  %1996 = vmatprep.mubr.f32.mxu1 %v3681_v4 }
 0x262   :  { %v1101_v45 = vpop.f32.mrb[20].mxu0  ;;  %v1358_v41 = vpop.f32.mrb[20].mxu1 }
 0x263   :  { %2083 = vst [vmem:[#allocation7 + $0x280] sm:$0xff] %v1101_v45  ;;  %2085 = vst [vmem:[#allocation7 + $0x290] sm:$0xff] %v1358_v41  ;;  %v1103_v24 = vpop.f32.mrb[21].mxu0  ;;  %v1360_v55 = vpop.f32.mrb[21].mxu1  ;;  %1740 = vmatmul.mubr.f32.gmra.mrb[126].mxu0 %v3678_v10  ;;  %1997 = vmatmul.mubr.f32.gmra.mrb[126].mxu1 %v3678_v10 }
 0x264   :  { %2084 = vst [vmem:[#allocation7 + $0x288] sm:$0xff] %v1103_v24  ;;  %2086 = vst [vmem:[#allocation7 + $0x298] sm:$0xff] %v1360_v55 }
 0x266   :  { %v1107_v31 = vpop.f32.mrb[22].mxu0  ;;  %v1364_v8 = vpop.f32.mrb[22].mxu1 }
 0x267   :  { %2091 = vst [vmem:[#allocation7 + $0x2c0] sm:$0xff] %v1107_v31  ;;  %2093 = vst [vmem:[#allocation7 + $0x2d0] sm:$0xff] %v1364_v8  ;;  %v1109_v53 = vpop.f32.mrb[23].mxu0  ;;  %v1366_v22 = vpop.f32.mrb[23].mxu1 }
 0x268   :  { %2092 = vst [vmem:[#allocation7 + $0x2c8] sm:$0xff] %v1109_v53  ;;  %2094 = vst [vmem:[#allocation7 + $0x2d8] sm:$0xff] %v1366_v22 }
 0x26a   :  { %v1113_v51 = vpop.f32.mrb[24].mxu0  ;;  %v1370_v30 = vpop.f32.mrb[24].mxu1 }
 0x26b   :  { %2099 = vst [vmem:[#allocation7 + $0x300] sm:$0xff] %v1113_v51  ;;  %2101 = vst [vmem:[#allocation7 + $0x310] sm:$0xff] %v1370_v30  ;;  %v1115_v27 = vpop.f32.mrb[25].mxu0  ;;  %v1372_v60 = vpop.f32.mrb[25].mxu1 }
 0x26c   :  { %2100 = vst [vmem:[#allocation7 + $0x308] sm:$0xff] %v1115_v27  ;;  %2102 = vst [vmem:[#allocation7 + $0x318] sm:$0xff] %v1372_v60 }
 0x26e   :  { %v1119_v56 = vpop.f32.mrb[26].mxu0  ;;  %v1376_v36 = vpop.f32.mrb[26].mxu1 }
 0x26f   :  { %2107 = vst [vmem:[#allocation7 + $0x340] sm:$0xff] %v1119_v56  ;;  %2109 = vst [vmem:[#allocation7 + $0x350] sm:$0xff] %v1376_v36  ;;  %v1121_v11 = vpop.f32.mrb[27].mxu0  ;;  %v1378_v47 = vpop.f32.mrb[27].mxu1 }
 0x270   :  { %2108 = vst [vmem:[#allocation7 + $0x348] sm:$0xff] %v1121_v11  ;;  %2110 = vst [vmem:[#allocation7 + $0x358] sm:$0xff] %v1378_v47 }
 0x272   :  { %v1125_v10 = vpop.f32.mrb[28].mxu0  ;;  %v1382_v4 = vpop.f32.mrb[28].mxu1 }
 0x273   :  { %2115 = vst [vmem:[#allocation7 + $0x380] sm:$0xff] %v1125_v10  ;;  %2117 = vst [vmem:[#allocation7 + $0x390] sm:$0xff] %v1382_v4  ;;  %v1127_v49 = vpop.f32.mrb[29].mxu0  ;;  %v1384_v42 = vpop.f32.mrb[29].mxu1 }
 0x274   :  { %2116 = vst [vmem:[#allocation7 + $0x388] sm:$0xff] %v1127_v49  ;;  %2118 = vst [vmem:[#allocation7 + $0x398] sm:$0xff] %v1384_v42 }
 0x276   :  { %v1131_v5 = vpop.f32.mrb[30].mxu0  ;;  %v1388_v58 = vpop.f32.mrb[30].mxu1 }
 0x277   :  { %2123 = vst [vmem:[#allocation7 + $0x3c0] sm:$0xff] %v1131_v5  ;;  %2125 = vst [vmem:[#allocation7 + $0x3d0] sm:$0xff] %v1388_v58  ;;  %v1133_v2 = vpop.f32.mrb[31].mxu0  ;;  %v1390_v32 = vpop.f32.mrb[31].mxu1 }
 0x278   :  { %2124 = vst [vmem:[#allocation7 + $0x3c8] sm:$0xff] %v1133_v2  ;;  %2126 = vst [vmem:[#allocation7 + $0x3d8] sm:$0xff] %v1390_v32 }
 0x27a   :  { %v1137_v39 = vpop.f32.mrb[32].mxu0  ;;  %v1394_v50 = vpop.f32.mrb[32].mxu1 }
 0x27b   :  { %2131 = vst [vmem:[#allocation7 + $0x400] sm:$0xff] %v1137_v39  ;;  %2133 = vst [vmem:[#allocation7 + $0x410] sm:$0xff] %v1394_v50  ;;  %v1139_v21 = vpop.f32.mrb[33].mxu0  ;;  %v1396_v7 = vpop.f32.mrb[33].mxu1 }
 0x27c   :  { %2132 = vst [vmem:[#allocation7 + $0x408] sm:$0xff] %v1139_v21  ;;  %2134 = vst [vmem:[#allocation7 + $0x418] sm:$0xff] %v1396_v7 }
 0x27e   :  { %v1143_v14 = vpop.f32.mrb[34].mxu0  ;;  %v1400_v48 = vpop.f32.mrb[34].mxu1 }
 0x27f   :  { %2139 = vst [vmem:[#allocation7 + $0x440] sm:$0xff] %v1143_v14  ;;  %2141 = vst [vmem:[#allocation7 + $0x450] sm:$0xff] %v1400_v48  ;;  %v1145_v62 = vpop.f32.mrb[35].mxu0  ;;  %v1402_v9 = vpop.f32.mrb[35].mxu1 }
 0x280   :  { %2140 = vst [vmem:[#allocation7 + $0x448] sm:$0xff] %v1145_v62  ;;  %2142 = vst [vmem:[#allocation7 + $0x458] sm:$0xff] %v1402_v9 }
 0x282   :  { %v1149_v38 = vpop.f32.mrb[36].mxu0  ;;  %v1406_v54 = vpop.f32.mrb[36].mxu1 }
 0x283   :  { %2147 = vst [vmem:[#allocation7 + $0x480] sm:$0xff] %v1149_v38  ;;  %2149 = vst [vmem:[#allocation7 + $0x490] sm:$0xff] %v1406_v54  ;;  %v1151_v15 = vpop.f32.mrb[37].mxu0  ;;  %v1408_v25 = vpop.f32.mrb[37].mxu1 }
 0x284   :  { %2148 = vst [vmem:[#allocation7 + $0x488] sm:$0xff] %v1151_v15  ;;  %2150 = vst [vmem:[#allocation7 + $0x498] sm:$0xff] %v1408_v25 }
 0x286   :  { %v1155_v19 = vpop.f32.mrb[38].mxu0  ;;  %v1412_v33 = vpop.f32.mrb[38].mxu1 }
 0x287   :  { %2155 = vst [vmem:[#allocation7 + $0x4c0] sm:$0xff] %v1155_v19  ;;  %2157 = vst [vmem:[#allocation7 + $0x4d0] sm:$0xff] %v1412_v33  ;;  %v1157_v57 = vpop.f32.mrb[39].mxu0  ;;  %v1414_v26 = vpop.f32.mrb[39].mxu1 }
 0x288   :  { %2156 = vst [vmem:[#allocation7 + $0x4c8] sm:$0xff] %v1157_v57  ;;  %2158 = vst [vmem:[#allocation7 + $0x4d8] sm:$0xff] %v1414_v26 }
 0x28a   :  { %v1161_v1 = vpop.f32.mrb[40].mxu0  ;;  %v1418_v17 = vpop.f32.mrb[40].mxu1 }
 0x28b   :  { %2163 = vst [vmem:[#allocation7 + $0x500] sm:$0xff] %v1161_v1  ;;  %2165 = vst [vmem:[#allocation7 + $0x510] sm:$0xff] %v1418_v17  ;;  %v1163_v23 = vpop.f32.mrb[41].mxu0  ;;  %v1420_v52 = vpop.f32.mrb[41].mxu1 }
 0x28c   :  { %2164 = vst [vmem:[#allocation7 + $0x508] sm:$0xff] %v1163_v23  ;;  %2166 = vst [vmem:[#allocation7 + $0x518] sm:$0xff] %v1420_v52 }
 0x28e   :  { %v1167_v61 = vpop.f32.mrb[42].mxu0  ;;  %v1424_v40 = vpop.f32.mrb[42].mxu1 }
 0x28f   :  { %2171 = vst [vmem:[#allocation7 + $0x540] sm:$0xff] %v1167_v61  ;;  %2173 = vst [vmem:[#allocation7 + $0x550] sm:$0xff] %v1424_v40  ;;  %v1169_v18 = vpop.f32.mrb[43].mxu0  ;;  %v1426_v59 = vpop.f32.mrb[43].mxu1 }
 0x290   :  { %2172 = vst [vmem:[#allocation7 + $0x548] sm:$0xff] %v1169_v18  ;;  %2174 = vst [vmem:[#allocation7 + $0x558] sm:$0xff] %v1426_v59 }
 0x292   :  { %v1173_v6 = vpop.f32.mrb[44].mxu0  ;;  %v1430_v13 = vpop.f32.mrb[44].mxu1 }
 0x293   :  { %2179 = vst [vmem:[#allocation7 + $0x580] sm:$0xff] %v1173_v6  ;;  %2181 = vst [vmem:[#allocation7 + $0x590] sm:$0xff] %v1430_v13  ;;  %v1175_v35 = vpop.f32.mrb[45].mxu0  ;;  %v1432_v28 = vpop.f32.mrb[45].mxu1 }
 0x294   :  { %2180 = vst [vmem:[#allocation7 + $0x588] sm:$0xff] %v1175_v35  ;;  %2182 = vst [vmem:[#allocation7 + $0x598] sm:$0xff] %v1432_v28 }
 0x296   :  { %v1179_v20 = vpop.f32.mrb[46].mxu0  ;;  %v1436_v0 = vpop.f32.mrb[46].mxu1 }
 0x297   :  { %2187 = vst [vmem:[#allocation7 + $0x5c0] sm:$0xff] %v1179_v20  ;;  %2189 = vst [vmem:[#allocation7 + $0x5d0] sm:$0xff] %v1436_v0  ;;  %v1181_v44 = vpop.f32.mrb[47].mxu0  ;;  %v1438_v3 = vpop.f32.mrb[47].mxu1 }
 0x298   :  { %2188 = vst [vmem:[#allocation7 + $0x5c8] sm:$0xff] %v1181_v44  ;;  %2190 = vst [vmem:[#allocation7 + $0x5d8] sm:$0xff] %v1438_v3 }
 0x29a   :  { %v1185_v46 = vpop.f32.mrb[48].mxu0  ;;  %v1442_v12 = vpop.f32.mrb[48].mxu1 }
 0x29b   :  { %2195 = vst [vmem:[#allocation7 + $0x600] sm:$0xff] %v1185_v46  ;;  %2197 = vst [vmem:[#allocation7 + $0x610] sm:$0xff] %v1442_v12  ;;  %v1187_v34 = vpop.f32.mrb[49].mxu0  ;;  %v1444_v43 = vpop.f32.mrb[49].mxu1 }
 0x29c   :  { %2196 = vst [vmem:[#allocation7 + $0x608] sm:$0xff] %v1187_v34  ;;  %2198 = vst [vmem:[#allocation7 + $0x618] sm:$0xff] %v1444_v43 }
 0x29e   :  { %v1191_v63 = vpop.f32.mrb[50].mxu0  ;;  %v1448_v29 = vpop.f32.mrb[50].mxu1 }
 0x29f   :  { %2203 = vst [vmem:[#allocation7 + $0x640] sm:$0xff] %v1191_v63  ;;  %2205 = vst [vmem:[#allocation7 + $0x650] sm:$0xff] %v1448_v29  ;;  %v1193_v16 = vpop.f32.mrb[51].mxu0  ;;  %v1450_v37 = vpop.f32.mrb[51].mxu1 }
 0x2a0   :  { %2204 = vst [vmem:[#allocation7 + $0x648] sm:$0xff] %v1193_v16  ;;  %2206 = vst [vmem:[#allocation7 + $0x658] sm:$0xff] %v1450_v37 }
 0x2a2   :  { %v1197_v45 = vpop.f32.mrb[52].mxu0  ;;  %v1454_v41 = vpop.f32.mrb[52].mxu1 }
 0x2a3   :  { %2211 = vst [vmem:[#allocation7 + $0x680] sm:$0xff] %v1197_v45  ;;  %2213 = vst [vmem:[#allocation7 + $0x690] sm:$0xff] %v1454_v41  ;;  %v1199_v24 = vpop.f32.mrb[53].mxu0  ;;  %v1456_v55 = vpop.f32.mrb[53].mxu1 }
 0x2a4   :  { %2212 = vst [vmem:[#allocation7 + $0x688] sm:$0xff] %v1199_v24  ;;  %2214 = vst [vmem:[#allocation7 + $0x698] sm:$0xff] %v1456_v55 }
 0x2a6   :  { %v1203_v31 = vpop.f32.mrb[54].mxu0  ;;  %v1460_v8 = vpop.f32.mrb[54].mxu1 }
 0x2a7   :  { %2219 = vst [vmem:[#allocation7 + $0x6c0] sm:$0xff] %v1203_v31  ;;  %2221 = vst [vmem:[#allocation7 + $0x6d0] sm:$0xff] %v1460_v8  ;;  %v1205_v53 = vpop.f32.mrb[55].mxu0  ;;  %v1462_v22 = vpop.f32.mrb[55].mxu1 }
 0x2a8   :  { %2220 = vst [vmem:[#allocation7 + $0x6c8] sm:$0xff] %v1205_v53  ;;  %2222 = vst [vmem:[#allocation7 + $0x6d8] sm:$0xff] %v1462_v22 }
 0x2aa   :  { %v1209_v51 = vpop.f32.mrb[56].mxu0  ;;  %v1466_v30 = vpop.f32.mrb[56].mxu1 }
 0x2ab   :  { %2227 = vst [vmem:[#allocation7 + $0x700] sm:$0xff] %v1209_v51  ;;  %2229 = vst [vmem:[#allocation7 + $0x710] sm:$0xff] %v1466_v30  ;;  %v1211_v27 = vpop.f32.mrb[57].mxu0  ;;  %v1468_v60 = vpop.f32.mrb[57].mxu1 }
 0x2ac   :  { %2228 = vst [vmem:[#allocation7 + $0x708] sm:$0xff] %v1211_v27  ;;  %2230 = vst [vmem:[#allocation7 + $0x718] sm:$0xff] %v1468_v60 }
 0x2ae   :  { %v1215_v56 = vpop.f32.mrb[58].mxu0  ;;  %v1472_v36 = vpop.f32.mrb[58].mxu1 }
 0x2af   :  { %2235 = vst [vmem:[#allocation7 + $0x740] sm:$0xff] %v1215_v56  ;;  %2237 = vst [vmem:[#allocation7 + $0x750] sm:$0xff] %v1472_v36  ;;  %v1217_v11 = vpop.f32.mrb[59].mxu0  ;;  %v1474_v47 = vpop.f32.mrb[59].mxu1 }
 0x2b0   :  { %2236 = vst [vmem:[#allocation7 + $0x748] sm:$0xff] %v1217_v11  ;;  %2238 = vst [vmem:[#allocation7 + $0x758] sm:$0xff] %v1474_v47 }
 0x2b2   :  { %v1221_v10 = vpop.f32.mrb[60].mxu0  ;;  %v1478_v4 = vpop.f32.mrb[60].mxu1 }
 0x2b3   :  { %2243 = vst [vmem:[#allocation7 + $0x780] sm:$0xff] %v1221_v10  ;;  %2245 = vst [vmem:[#allocation7 + $0x790] sm:$0xff] %v1478_v4  ;;  %v1223_v49 = vpop.f32.mrb[61].mxu0  ;;  %v1480_v42 = vpop.f32.mrb[61].mxu1 }
 0x2b4   :  { %2244 = vst [vmem:[#allocation7 + $0x788] sm:$0xff] %v1223_v49  ;;  %2246 = vst [vmem:[#allocation7 + $0x798] sm:$0xff] %v1480_v42 }
 0x2b6   :  { %v1227_v5 = vpop.f32.mrb[62].mxu0  ;;  %v1484_v58 = vpop.f32.mrb[62].mxu1 }
 0x2b7   :  { %2251 = vst [vmem:[#allocation7 + $0x7c0] sm:$0xff] %v1227_v5  ;;  %2253 = vst [vmem:[#allocation7 + $0x7d0] sm:$0xff] %v1484_v58  ;;  %v1229_v2 = vpop.f32.mrb[63].mxu0  ;;  %v1486_v32 = vpop.f32.mrb[63].mxu1 }
 0x2b8   :  { %2252 = vst [vmem:[#allocation7 + $0x7c8] sm:$0xff] %v1229_v2  ;;  %2254 = vst [vmem:[#allocation7 + $0x7d8] sm:$0xff] %v1486_v32 }
 0x2ba   :  { %v1555_v39 = vpop.f32.mrb[64].mxu0  ;;  %v1812_v50 = vpop.f32.mrb[64].mxu1 }
 0x2bb   :  { %2827 = shalt.err (!%p2824_p6)
}
 0x2bc   :  { %s2828_s16 = scalar_lea.hbm %s3882_s3, 8192 }
 0x2bd   :  { %p2829_p7 = scmp.ne.s32.totalorder %s3882_s3, %s2828_s16  ;;  %p2832_p8 = scmp.lt.u32.totalorder %s2828_s16, %s3882_s3 }
 0x2bf   :  { %p2834_p9 = pnand %p2832_p8, %p2829_p7 }
 0x2c1   :  { %2837 = shalt.err (!%p2834_p9)
}
 0x2c2   :  { %2282 = dma.vmem_to_hbm [thread:$0]  %s2277_s12, 8192, %s3882_s3, [#allocation9], %s2869_s22, %s2869_s22, %s2870_s23   ;;  %2007 = vst [vmem:[#allocation7 + $0x20] sm:$0xff] %v1555_v39  ;;  %2009 = vst [vmem:[#allocation7 + $0x30] sm:$0xff] %v1812_v50  ;;  %v1557_v21 = vpop.f32.mrb[65].mxu0  ;;  %v1814_v7 = vpop.f32.mrb[65].mxu1 }
 0x2c3   :  { %2008 = vst [vmem:[#allocation7 + $0x28] sm:$0xff] %v1557_v21  ;;  %2010 = vst [vmem:[#allocation7 + $0x38] sm:$0xff] %v1814_v7  ;;  %v1561_v14 = vpop.f32.mrb[66].mxu0  ;;  %v1818_v48 = vpop.f32.mrb[66].mxu1  ;;  %s2875_s3 = smov [#allocation7]  }
 0x2c4   :  { %2015 = vst [vmem:[#allocation7 + $0x60] sm:$0xff] %v1561_v14  ;;  %2017 = vst [vmem:[#allocation7 + $0x70] sm:$0xff] %v1818_v48  ;;  %v1563_v62 = vpop.f32.mrb[67].mxu0  ;;  %v1820_v9 = vpop.f32.mrb[67].mxu1  ;;  %s2264_s22 = sshll.u32 %s2875_s3, 4  ;;  %s2265_s22 = int_to_ptr.vmem [resolvable:$true] %s2264_s22 }
 0x2c5   :  { %2016 = vst [vmem:[#allocation7 + $0x68] sm:$0xff] %v1563_v62  ;;  %2018 = vst [vmem:[#allocation7 + $0x78] sm:$0xff] %v1820_v9  ;;  %v1567_v38 = vpop.f32.mrb[68].mxu0  ;;  %v1824_v54 = vpop.f32.mrb[68].mxu1  ;;  %s2838_s23 = scalar_lea.vmem %s2265_s22, 32768  ;;  %p2843_p11 = scmp.lt.s32.totalorder %s2265_s22, %s2265_s22 }
 0x2c6   :  { %2023 = vst [vmem:[#allocation7 + $0xa0] sm:$0xff] %v1567_v38  ;;  %2025 = vst [vmem:[#allocation7 + $0xb0] sm:$0xff] %v1824_v54  ;;  %v1569_v15 = vpop.f32.mrb[69].mxu0  ;;  %v1826_v25 = vpop.f32.mrb[69].mxu1  ;;  %p2839_p10 = scmp.ne.s32.totalorder %s2265_s22, %s2838_s23  ;;  %p2844_p12 = scmp.lt.s32.totalorder %s2838_s23, %s2838_s23 }
 0x2c7   :  { %2024 = vst [vmem:[#allocation7 + $0xa8] sm:$0xff] %v1569_v15  ;;  %2026 = vst [vmem:[#allocation7 + $0xb8] sm:$0xff] %v1826_v25  ;;  %v1573_v19 = vpop.f32.mrb[70].mxu0  ;;  %v1830_v33 = vpop.f32.mrb[70].mxu1 }
 0x2c8   :  { %2031 = vst [vmem:[#allocation7 + $0xe0] sm:$0xff] %v1573_v19  ;;  %2033 = vst [vmem:[#allocation7 + $0xf0] sm:$0xff] %v1830_v33  ;;  %v1575_v57 = vpop.f32.mrb[71].mxu0  ;;  %v1832_v26 = vpop.f32.mrb[71].mxu1  ;;  %p2845_p13 = por %p2844_p12, %p2843_p11 }
 0x2c9   :  { %2032 = vst [vmem:[#allocation7 + $0xe8] sm:$0xff] %v1575_v57  ;;  %2034 = vst [vmem:[#allocation7 + $0xf8] sm:$0xff] %v1832_v26 }
 0x2ca   :  { %v1579_v1 = vpop.f32.mrb[72].mxu0  ;;  %v1836_v17 = vpop.f32.mrb[72].mxu1  ;;  %p2846_p0 = pnand %p2845_p13, %p2839_p10 }
 0x2cb   :  { %2039 = vst [vmem:[#allocation7 + $0x120] sm:$0xff] %v1579_v1  ;;  %2041 = vst [vmem:[#allocation7 + $0x130] sm:$0xff] %v1836_v17  ;;  %v1581_v23 = vpop.f32.mrb[73].mxu0  ;;  %v1838_v52 = vpop.f32.mrb[73].mxu1 }
 0x2cc   :  { %2040 = vst [vmem:[#allocation7 + $0x128] sm:$0xff] %v1581_v23  ;;  %2042 = vst [vmem:[#allocation7 + $0x138] sm:$0xff] %v1838_v52 }
 0x2ce   :  { %v1585_v61 = vpop.f32.mrb[74].mxu0  ;;  %v1842_v40 = vpop.f32.mrb[74].mxu1 }
 0x2cf   :  { %2047 = vst [vmem:[#allocation7 + $0x160] sm:$0xff] %v1585_v61  ;;  %2049 = vst [vmem:[#allocation7 + $0x170] sm:$0xff] %v1842_v40  ;;  %v1587_v18 = vpop.f32.mrb[75].mxu0  ;;  %v1844_v59 = vpop.f32.mrb[75].mxu1 }
 0x2d0   :  { %2048 = vst [vmem:[#allocation7 + $0x168] sm:$0xff] %v1587_v18  ;;  %2050 = vst [vmem:[#allocation7 + $0x178] sm:$0xff] %v1844_v59 }
 0x2d2   :  { %v1591_v6 = vpop.f32.mrb[76].mxu0  ;;  %v1848_v13 = vpop.f32.mrb[76].mxu1 }
 0x2d3   :  { %2055 = vst [vmem:[#allocation7 + $0x1a0] sm:$0xff] %v1591_v6  ;;  %2057 = vst [vmem:[#allocation7 + $0x1b0] sm:$0xff] %v1848_v13  ;;  %v1593_v35 = vpop.f32.mrb[77].mxu0  ;;  %v1850_v28 = vpop.f32.mrb[77].mxu1 }
 0x2d4   :  { %2056 = vst [vmem:[#allocation7 + $0x1a8] sm:$0xff] %v1593_v35  ;;  %2058 = vst [vmem:[#allocation7 + $0x1b8] sm:$0xff] %v1850_v28 }
 0x2d6   :  { %v1597_v20 = vpop.f32.mrb[78].mxu0  ;;  %v1854_v0 = vpop.f32.mrb[78].mxu1 }
 0x2d7   :  { %2063 = vst [vmem:[#allocation7 + $0x1e0] sm:$0xff] %v1597_v20  ;;  %2065 = vst [vmem:[#allocation7 + $0x1f0] sm:$0xff] %v1854_v0  ;;  %v1599_v44 = vpop.f32.mrb[79].mxu0  ;;  %v1856_v3 = vpop.f32.mrb[79].mxu1 }
 0x2d8   :  { %2064 = vst [vmem:[#allocation7 + $0x1e8] sm:$0xff] %v1599_v44  ;;  %2066 = vst [vmem:[#allocation7 + $0x1f8] sm:$0xff] %v1856_v3 }
 0x2da   :  { %v1603_v46 = vpop.f32.mrb[80].mxu0  ;;  %v1860_v12 = vpop.f32.mrb[80].mxu1 }
 0x2db   :  { %2071 = vst [vmem:[#allocation7 + $0x220] sm:$0xff] %v1603_v46  ;;  %2073 = vst [vmem:[#allocation7 + $0x230] sm:$0xff] %v1860_v12  ;;  %v1605_v34 = vpop.f32.mrb[81].mxu0  ;;  %v1862_v43 = vpop.f32.mrb[81].mxu1 }
 0x2dc   :  { %2072 = vst [vmem:[#allocation7 + $0x228] sm:$0xff] %v1605_v34  ;;  %2074 = vst [vmem:[#allocation7 + $0x238] sm:$0xff] %v1862_v43 }
 0x2de   :  { %v1609_v63 = vpop.f32.mrb[82].mxu0  ;;  %v1866_v29 = vpop.f32.mrb[82].mxu1 }
 0x2df   :  { %2079 = vst [vmem:[#allocation7 + $0x260] sm:$0xff] %v1609_v63  ;;  %2081 = vst [vmem:[#allocation7 + $0x270] sm:$0xff] %v1866_v29  ;;  %v1611_v16 = vpop.f32.mrb[83].mxu0  ;;  %v1868_v37 = vpop.f32.mrb[83].mxu1 }
 0x2e0   :  { %2080 = vst [vmem:[#allocation7 + $0x268] sm:$0xff] %v1611_v16  ;;  %2082 = vst [vmem:[#allocation7 + $0x278] sm:$0xff] %v1868_v37 }
 0x2e2   :  { %v1615_v45 = vpop.f32.mrb[84].mxu0  ;;  %v1872_v41 = vpop.f32.mrb[84].mxu1 }
 0x2e3   :  { %2087 = vst [vmem:[#allocation7 + $0x2a0] sm:$0xff] %v1615_v45  ;;  %2089 = vst [vmem:[#allocation7 + $0x2b0] sm:$0xff] %v1872_v41  ;;  %v1617_v24 = vpop.f32.mrb[85].mxu0  ;;  %v1874_v55 = vpop.f32.mrb[85].mxu1 }
 0x2e4   :  { %2088 = vst [vmem:[#allocation7 + $0x2a8] sm:$0xff] %v1617_v24  ;;  %2090 = vst [vmem:[#allocation7 + $0x2b8] sm:$0xff] %v1874_v55 }
 0x2e6   :  { %v1621_v31 = vpop.f32.mrb[86].mxu0  ;;  %v1878_v8 = vpop.f32.mrb[86].mxu1 }
 0x2e7   :  { %2095 = vst [vmem:[#allocation7 + $0x2e0] sm:$0xff] %v1621_v31  ;;  %2097 = vst [vmem:[#allocation7 + $0x2f0] sm:$0xff] %v1878_v8  ;;  %v1623_v53 = vpop.f32.mrb[87].mxu0  ;;  %v1880_v22 = vpop.f32.mrb[87].mxu1 }
 0x2e8   :  { %2096 = vst [vmem:[#allocation7 + $0x2e8] sm:$0xff] %v1623_v53  ;;  %2098 = vst [vmem:[#allocation7 + $0x2f8] sm:$0xff] %v1880_v22 }
 0x2ea   :  { %v1627_v51 = vpop.f32.mrb[88].mxu0  ;;  %v1884_v30 = vpop.f32.mrb[88].mxu1 }
 0x2eb   :  { %2103 = vst [vmem:[#allocation7 + $0x320] sm:$0xff] %v1627_v51  ;;  %2105 = vst [vmem:[#allocation7 + $0x330] sm:$0xff] %v1884_v30  ;;  %v1629_v27 = vpop.f32.mrb[89].mxu0  ;;  %v1886_v60 = vpop.f32.mrb[89].mxu1 }
 0x2ec   :  { %2104 = vst [vmem:[#allocation7 + $0x328] sm:$0xff] %v1629_v27  ;;  %2106 = vst [vmem:[#allocation7 + $0x338] sm:$0xff] %v1886_v60 }
 0x2ee   :  { %v1633_v56 = vpop.f32.mrb[90].mxu0  ;;  %v1890_v36 = vpop.f32.mrb[90].mxu1 }
 0x2ef   :  { %2111 = vst [vmem:[#allocation7 + $0x360] sm:$0xff] %v1633_v56  ;;  %2113 = vst [vmem:[#allocation7 + $0x370] sm:$0xff] %v1890_v36  ;;  %v1635_v11 = vpop.f32.mrb[91].mxu0  ;;  %v1892_v47 = vpop.f32.mrb[91].mxu1 }
 0x2f0   :  { %2112 = vst [vmem:[#allocation7 + $0x368] sm:$0xff] %v1635_v11  ;;  %2114 = vst [vmem:[#allocation7 + $0x378] sm:$0xff] %v1892_v47 }
 0x2f2   :  { %v1639_v10 = vpop.f32.mrb[92].mxu0  ;;  %v1896_v4 = vpop.f32.mrb[92].mxu1 }
 0x2f3   :  { %2119 = vst [vmem:[#allocation7 + $0x3a0] sm:$0xff] %v1639_v10  ;;  %2121 = vst [vmem:[#allocation7 + $0x3b0] sm:$0xff] %v1896_v4  ;;  %v1641_v49 = vpop.f32.mrb[93].mxu0  ;;  %v1898_v42 = vpop.f32.mrb[93].mxu1 }
 0x2f4   :  { %2120 = vst [vmem:[#allocation7 + $0x3a8] sm:$0xff] %v1641_v49  ;;  %2122 = vst [vmem:[#allocation7 + $0x3b8] sm:$0xff] %v1898_v42 }
 0x2f6   :  { %v1645_v5 = vpop.f32.mrb[94].mxu0  ;;  %v1902_v58 = vpop.f32.mrb[94].mxu1 }
 0x2f7   :  { %2127 = vst [vmem:[#allocation7 + $0x3e0] sm:$0xff] %v1645_v5  ;;  %2129 = vst [vmem:[#allocation7 + $0x3f0] sm:$0xff] %v1902_v58  ;;  %v1647_v2 = vpop.f32.mrb[95].mxu0  ;;  %v1904_v32 = vpop.f32.mrb[95].mxu1 }
 0x2f8   :  { %2128 = vst [vmem:[#allocation7 + $0x3e8] sm:$0xff] %v1647_v2  ;;  %2130 = vst [vmem:[#allocation7 + $0x3f8] sm:$0xff] %v1904_v32 }
 0x2fa   :  { %v1651_v39 = vpop.f32.mrb[96].mxu0  ;;  %v1908_v50 = vpop.f32.mrb[96].mxu1 }
 0x2fb   :  { %2135 = vst [vmem:[#allocation7 + $0x420] sm:$0xff] %v1651_v39  ;;  %2137 = vst [vmem:[#allocation7 + $0x430] sm:$0xff] %v1908_v50  ;;  %v1653_v21 = vpop.f32.mrb[97].mxu0  ;;  %v1910_v7 = vpop.f32.mrb[97].mxu1 }
 0x2fc   :  { %2136 = vst [vmem:[#allocation7 + $0x428] sm:$0xff] %v1653_v21  ;;  %2138 = vst [vmem:[#allocation7 + $0x438] sm:$0xff] %v1910_v7 }
 0x2fe   :  { %v1657_v14 = vpop.f32.mrb[98].mxu0  ;;  %v1914_v48 = vpop.f32.mrb[98].mxu1 }
 0x2ff   :  { %2143 = vst [vmem:[#allocation7 + $0x460] sm:$0xff] %v1657_v14  ;;  %2145 = vst [vmem:[#allocation7 + $0x470] sm:$0xff] %v1914_v48  ;;  %v1659_v62 = vpop.f32.mrb[99].mxu0  ;;  %v1916_v9 = vpop.f32.mrb[99].mxu1 }
 0x300   :  { %2144 = vst [vmem:[#allocation7 + $0x468] sm:$0xff] %v1659_v62  ;;  %2146 = vst [vmem:[#allocation7 + $0x478] sm:$0xff] %v1916_v9 }
 0x302   :  { %v1663_v38 = vpop.f32.mrb[100].mxu0  ;;  %v1920_v54 = vpop.f32.mrb[100].mxu1 }
 0x303   :  { %2151 = vst [vmem:[#allocation7 + $0x4a0] sm:$0xff] %v1663_v38  ;;  %2153 = vst [vmem:[#allocation7 + $0x4b0] sm:$0xff] %v1920_v54  ;;  %v1665_v15 = vpop.f32.mrb[101].mxu0  ;;  %v1922_v25 = vpop.f32.mrb[101].mxu1 }
 0x304   :  { %2152 = vst [vmem:[#allocation7 + $0x4a8] sm:$0xff] %v1665_v15  ;;  %2154 = vst [vmem:[#allocation7 + $0x4b8] sm:$0xff] %v1922_v25 }
 0x306   :  { %v1669_v19 = vpop.f32.mrb[102].mxu0  ;;  %v1926_v33 = vpop.f32.mrb[102].mxu1 }
 0x307   :  { %2159 = vst [vmem:[#allocation7 + $0x4e0] sm:$0xff] %v1669_v19  ;;  %2161 = vst [vmem:[#allocation7 + $0x4f0] sm:$0xff] %v1926_v33  ;;  %v1671_v57 = vpop.f32.mrb[103].mxu0  ;;  %v1928_v26 = vpop.f32.mrb[103].mxu1 }
 0x308   :  { %2160 = vst [vmem:[#allocation7 + $0x4e8] sm:$0xff] %v1671_v57  ;;  %2162 = vst [vmem:[#allocation7 + $0x4f8] sm:$0xff] %v1928_v26 }
 0x30a   :  { %v1675_v1 = vpop.f32.mrb[104].mxu0  ;;  %v1932_v17 = vpop.f32.mrb[104].mxu1 }
 0x30b   :  { %2167 = vst [vmem:[#allocation7 + $0x520] sm:$0xff] %v1675_v1  ;;  %2169 = vst [vmem:[#allocation7 + $0x530] sm:$0xff] %v1932_v17  ;;  %v1677_v23 = vpop.f32.mrb[105].mxu0  ;;  %v1934_v52 = vpop.f32.mrb[105].mxu1 }
 0x30c   :  { %2168 = vst [vmem:[#allocation7 + $0x528] sm:$0xff] %v1677_v23  ;;  %2170 = vst [vmem:[#allocation7 + $0x538] sm:$0xff] %v1934_v52 }
 0x30e   :  { %v1681_v61 = vpop.f32.mrb[106].mxu0  ;;  %v1938_v40 = vpop.f32.mrb[106].mxu1 }
 0x30f   :  { %2175 = vst [vmem:[#allocation7 + $0x560] sm:$0xff] %v1681_v61  ;;  %2177 = vst [vmem:[#allocation7 + $0x570] sm:$0xff] %v1938_v40  ;;  %v1683_v18 = vpop.f32.mrb[107].mxu0  ;;  %v1940_v59 = vpop.f32.mrb[107].mxu1 }
 0x310   :  { %2176 = vst [vmem:[#allocation7 + $0x568] sm:$0xff] %v1683_v18  ;;  %2178 = vst [vmem:[#allocation7 + $0x578] sm:$0xff] %v1940_v59 }
 0x312   :  { %v1687_v6 = vpop.f32.mrb[108].mxu0  ;;  %v1944_v13 = vpop.f32.mrb[108].mxu1 }
 0x313   :  { %2183 = vst [vmem:[#allocation7 + $0x5a0] sm:$0xff] %v1687_v6  ;;  %2185 = vst [vmem:[#allocation7 + $0x5b0] sm:$0xff] %v1944_v13  ;;  %v1689_v35 = vpop.f32.mrb[109].mxu0  ;;  %v1946_v28 = vpop.f32.mrb[109].mxu1 }
 0x314   :  { %2184 = vst [vmem:[#allocation7 + $0x5a8] sm:$0xff] %v1689_v35  ;;  %2186 = vst [vmem:[#allocation7 + $0x5b8] sm:$0xff] %v1946_v28 }
 0x316   :  { %v1693_v20 = vpop.f32.mrb[110].mxu0  ;;  %v1950_v0 = vpop.f32.mrb[110].mxu1 }
 0x317   :  { %2191 = vst [vmem:[#allocation7 + $0x5e0] sm:$0xff] %v1693_v20  ;;  %2193 = vst [vmem:[#allocation7 + $0x5f0] sm:$0xff] %v1950_v0  ;;  %v1695_v44 = vpop.f32.mrb[111].mxu0  ;;  %v1952_v3 = vpop.f32.mrb[111].mxu1 }
 0x318   :  { %2192 = vst [vmem:[#allocation7 + $0x5e8] sm:$0xff] %v1695_v44  ;;  %2194 = vst [vmem:[#allocation7 + $0x5f8] sm:$0xff] %v1952_v3 }
 0x31a   :  { %v1699_v46 = vpop.f32.mrb[112].mxu0  ;;  %v1956_v12 = vpop.f32.mrb[112].mxu1 }
 0x31b   :  { %2199 = vst [vmem:[#allocation7 + $0x620] sm:$0xff] %v1699_v46  ;;  %2201 = vst [vmem:[#allocation7 + $0x630] sm:$0xff] %v1956_v12  ;;  %v1701_v34 = vpop.f32.mrb[113].mxu0  ;;  %v1958_v43 = vpop.f32.mrb[113].mxu1 }
 0x31c   :  { %2200 = vst [vmem:[#allocation7 + $0x628] sm:$0xff] %v1701_v34  ;;  %2202 = vst [vmem:[#allocation7 + $0x638] sm:$0xff] %v1958_v43 }
 0x31e   :  { %v1705_v63 = vpop.f32.mrb[114].mxu0  ;;  %v1962_v29 = vpop.f32.mrb[114].mxu1 }
 0x31f   :  { %2207 = vst [vmem:[#allocation7 + $0x660] sm:$0xff] %v1705_v63  ;;  %2209 = vst [vmem:[#allocation7 + $0x670] sm:$0xff] %v1962_v29  ;;  %v1707_v16 = vpop.f32.mrb[115].mxu0  ;;  %v1964_v37 = vpop.f32.mrb[115].mxu1 }
 0x320   :  { %2208 = vst [vmem:[#allocation7 + $0x668] sm:$0xff] %v1707_v16  ;;  %2210 = vst [vmem:[#allocation7 + $0x678] sm:$0xff] %v1964_v37 }
 0x322   :  { %v1711_v45 = vpop.f32.mrb[116].mxu0  ;;  %v1968_v41 = vpop.f32.mrb[116].mxu1 }
 0x323   :  { %2215 = vst [vmem:[#allocation7 + $0x6a0] sm:$0xff] %v1711_v45  ;;  %2217 = vst [vmem:[#allocation7 + $0x6b0] sm:$0xff] %v1968_v41  ;;  %v1713_v24 = vpop.f32.mrb[117].mxu0  ;;  %v1970_v55 = vpop.f32.mrb[117].mxu1 }
 0x324   :  { %2216 = vst [vmem:[#allocation7 + $0x6a8] sm:$0xff] %v1713_v24  ;;  %2218 = vst [vmem:[#allocation7 + $0x6b8] sm:$0xff] %v1970_v55 }
 0x326   :  { %v1717_v31 = vpop.f32.mrb[118].mxu0  ;;  %v1974_v8 = vpop.f32.mrb[118].mxu1 }
 0x327   :  { %2223 = vst [vmem:[#allocation7 + $0x6e0] sm:$0xff] %v1717_v31  ;;  %2225 = vst [vmem:[#allocation7 + $0x6f0] sm:$0xff] %v1974_v8  ;;  %v1719_v53 = vpop.f32.mrb[119].mxu0  ;;  %v1976_v22 = vpop.f32.mrb[119].mxu1 }
 0x328   :  { %2224 = vst [vmem:[#allocation7 + $0x6e8] sm:$0xff] %v1719_v53  ;;  %2226 = vst [vmem:[#allocation7 + $0x6f8] sm:$0xff] %v1976_v22 }
 0x32a   :  { %v1723_v51 = vpop.f32.mrb[120].mxu0  ;;  %v1980_v30 = vpop.f32.mrb[120].mxu1 }
 0x32b   :  { %2231 = vst [vmem:[#allocation7 + $0x720] sm:$0xff] %v1723_v51  ;;  %2233 = vst [vmem:[#allocation7 + $0x730] sm:$0xff] %v1980_v30  ;;  %v1725_v27 = vpop.f32.mrb[121].mxu0  ;;  %v1982_v60 = vpop.f32.mrb[121].mxu1 }
 0x32c   :  { %2232 = vst [vmem:[#allocation7 + $0x728] sm:$0xff] %v1725_v27  ;;  %2234 = vst [vmem:[#allocation7 + $0x738] sm:$0xff] %v1982_v60 }
 0x32e   :  { %v1729_v56 = vpop.f32.mrb[122].mxu0  ;;  %v1986_v36 = vpop.f32.mrb[122].mxu1 }
 0x32f   :  { %2239 = vst [vmem:[#allocation7 + $0x760] sm:$0xff] %v1729_v56  ;;  %2241 = vst [vmem:[#allocation7 + $0x770] sm:$0xff] %v1986_v36  ;;  %v1731_v11 = vpop.f32.mrb[123].mxu0  ;;  %v1988_v47 = vpop.f32.mrb[123].mxu1 }
 0x330   :  { %2240 = vst [vmem:[#allocation7 + $0x768] sm:$0xff] %v1731_v11  ;;  %2242 = vst [vmem:[#allocation7 + $0x778] sm:$0xff] %v1988_v47 }
 0x332   :  { %v1735_v10 = vpop.f32.mrb[124].mxu0  ;;  %v1992_v4 = vpop.f32.mrb[124].mxu1 }
 0x333   :  { %2247 = vst [vmem:[#allocation7 + $0x7a0] sm:$0xff] %v1735_v10  ;;  %2249 = vst [vmem:[#allocation7 + $0x7b0] sm:$0xff] %v1992_v4  ;;  %v1737_v49 = vpop.f32.mrb[125].mxu0  ;;  %v1994_v42 = vpop.f32.mrb[125].mxu1 }
 0x334   :  { %2248 = vst [vmem:[#allocation7 + $0x7a8] sm:$0xff] %v1737_v49  ;;  %2250 = vst [vmem:[#allocation7 + $0x7b8] sm:$0xff] %v1994_v42 }
 0x336   :  { %v1741_v5 = vpop.f32.mrb[126].mxu0  ;;  %v1998_v58 = vpop.f32.mrb[126].mxu1 }
 0x337   :  { %2255 = vst [vmem:[#allocation7 + $0x7e0] sm:$0xff] %v1741_v5  ;;  %2257 = vst [vmem:[#allocation7 + $0x7f0] sm:$0xff] %v1998_v58  ;;  %v1743_v2 = vpop.f32.mrb[127].mxu0  ;;  %v2000_v32 = vpop.f32.mrb[127].mxu1 }
 0x338   :  { %2256 = vst [vmem:[#allocation7 + $0x7e8] sm:$0xff] %v1743_v2  ;;  %2258 = vst [vmem:[#allocation7 + $0x7f8] sm:$0xff] %v2000_v32 }
 0x339   :  { %2849 = shalt.err (!%p2846_p0)
}
 0x33a   :  { %s2850_s27 = scalar_lea.hbm %s3881_s2, 32768 }
 0x33b   :  { %p2851_p1 = scmp.ne.s32.totalorder %s3881_s2, %s2850_s27  ;;  %p2854_p2 = scmp.lt.u32.totalorder %s2850_s27, %s3881_s2 }
 0x33d   :  { %p2856_p3 = pnand %p2854_p2, %p2851_p1 }
 0x33f   :  { %2859 = shalt.err (!%p2856_p3)
}
 0x340   :  { %2270 = dma.vmem_to_hbm [thread:$0]  %s2265_s22, 32768, %s3881_s2, [#allocation4], %s2872_s0, %s2872_s0, %s2873_s9  }
 0x341   :  { %2864 = dma.done.wait [#allocation4], 32768  }
 0x342   :  { %2865 = vsyncadd [#allocation4], 4294934528 }
 0x343   :  { %2866 = dma.done.wait [#allocation9], 8192  }
 0x344   :  { %2867 = vsyncadd [#allocation9], 4294959104 }
 0x345   :  { %2289 = vsyncpa [#allocation3], 1 }
 0x346   :  { %2290 = vsyncpa [#allocation6], 1 }
 0x347   :  { %2291 = vsyncpa [#allocation4], 1 }
 0x348   :  { %2292 = vsyncpa [#allocation9], 1 }

</bundles_post_ra>
